<compile_context>
chip_gen: v7x
topology: tpu7x:2x2x1
jax: 0.10.0
libtpu: 0.0.40
codegen_flags: <defaults>
</compile_context>

<pallas_src>
import functools

import jax
import jax.numpy as jnp
from jax.experimental import pallas as pl
from jax.experimental.pallas import tpu as pltpu


def _recovery_kernel(num_layers, padding_value, unroll,
                     h_ref, len_ref, wih_ref, whh_ref, bi_ref, bhn_ref,
                     wlin_ref, blin_ref, out_ref,
                     buf, gi_buf, hstate, mask_buf):
    T, Bt, Hd = buf.shape
    Opad = out_ref.shape[-1]

    # validity mask (t < length); reused for per-step state freezing and the
    # final pad_packed_sequence fill. 1.0 where valid, 0.0 where padded.
    time_idx = jax.lax.broadcasted_iota(jnp.int32, (T, Bt, 1), 0)
    mask_buf[...] = (time_idx < len_ref[...][None, :, :]).astype(jnp.float32)

    for layer in range(num_layers):                    # static python loop
        # ---- hoisted input projection: one big (T*Bt, Hd) x (Hd, 3Hd) matmul
        # gate order along the fused lane axis: [r, z, n]; bias already holds
        # b_ir+b_hr, b_iz+b_hz, b_in (b_hn stays inside the r*(...) term).
        x_all = h_ref[...] if layer == 0 else buf[...]
        gi = jnp.dot(x_all.reshape(T * Bt, Hd), wih_ref[layer],
                     preferred_element_type=jnp.float32) + bi_ref[layer]
        gi_buf[...] = gi.reshape(T, Bt, 3 * Hd)

        w_hh = whh_ref[layer]                          # (Hd, 3Hd) — this layer only
        b_hn = bhn_ref[layer]                          # (1, Hd)
        hstate[...] = jnp.zeros_like(hstate)

        @pl.loop(0, T, unroll=unroll)
        def _(t):
            gi_t = gi_buf[t]                           # (Bt, 3Hd)
            h_prev = hstate[...]                       # (Bt, Hd)
            # single fused recurrent matmul in the serial dependence chain
            gh = jnp.dot(h_prev, w_hh, preferred_element_type=jnp.float32)
            r = jax.nn.sigmoid(gi_t[:, :Hd] + gh[:, :Hd])
            z = jax.nn.sigmoid(gi_t[:, Hd:2 * Hd] + gh[:, Hd:2 * Hd])
            n = jnp.tanh(gi_t[:, 2 * Hd:] + r * (gh[:, 2 * Hd:] + b_hn))
            h_new = (1.0 - z) * n + z * h_prev

            # packed-sequence semantics: only advance state where t < length
            m = mask_buf[t]                            # (Bt, 1), exactly 0/1
            hstate[...] = m * h_new + (1.0 - m) * h_prev
            # layer output; positions >= length are masked after the layer
            # stack (unobservable difference vs. PyTorch's packed execution)
            buf[t] = h_new

    # pad_packed_sequence: positions >= length become padding_value, then the
    # final Linear (applied to padded rows too, like PyTorch). Output is a
    # lane-dense (Opad = multiple of 128) slab; caller slices the real O cols.
    m3 = mask_buf[...]
    x_o = m3 * buf[...] + (1.0 - m3) * jnp.float32(padding_value)
    y = jnp.dot(x_o.reshape(T * Bt, Hd), wlin_ref[...],
                preferred_element_type=jnp.float32) + blin_ref[...]
    out_ref[...] = y.reshape(T, Bt, Opad)


def make_params(key, hidden_dim, output_dim, num_layers):
    """Deterministic init mirroring Recovery.reset(): xavier weights, b_ih=1, b_hh=0."""
    keys = jax.random.split(key, 2 * num_layers + 1)

    def xavier(k, shape, fan_in, fan_out):
        bound = (6.0 / (fan_in + fan_out)) ** 0.5
        return jax.random.uniform(k, shape, jnp.float32, -bound, bound)

    wih, whh = [], []
    for l in range(num_layers):
        # torch weight_ih_l{l}: (3H, H); here stored per-gate transposed (3, H_in, H_out)
        wih.append(xavier(keys[2 * l], (3, hidden_dim, hidden_dim), hidden_dim, 3 * hidden_dim))
        whh.append(xavier(keys[2 * l + 1], (3, hidden_dim, hidden_dim), hidden_dim, 3 * hidden_dim))
    wih = jnp.stack(wih)                                            # (L, 3, H, H)
    whh = jnp.stack(whh)                                            # (L, 3, H, H)
    bih = jnp.ones((num_layers, 3, 1, hidden_dim), jnp.float32)     # bias_ih <- 1
    bhh = jnp.zeros((num_layers, 3, 1, hidden_dim), jnp.float32)    # bias_hh <- 0
    wlin = xavier(keys[-1], (hidden_dim, output_dim), hidden_dim, output_dim)  # stored as W^T
    blin = jnp.zeros((1, output_dim), jnp.float32)                  # linear bias <- 0
    return wih, whh, bih, bhh, wlin, blin


def recovery_forward(H, lengths, params, padding_value, max_seq, num_layers):
    wih, whh, bih, bhh, wlin, blin = params
    B, T, Hd = H.shape
    assert T == max_seq
    O = wlin.shape[1]

    # cuDNN-style gate fusion along the output/lane axis: [r | z | n]
    wih_f = jnp.concatenate([wih[:, 0], wih[:, 1], wih[:, 2]], axis=-1)   # (L, Hd, 3Hd)
    whh_f = jnp.concatenate([whh[:, 0], whh[:, 1], whh[:, 2]], axis=-1)   # (L, Hd, 3Hd)
    bi_f = jnp.concatenate([bih[:, 0] + bhh[:, 0],
                            bih[:, 1] + bhh[:, 1],
                            bih[:, 2]], axis=-1)                          # (L, 1, 3Hd)
    bhn = bhh[:, 2]                                                       # (L, 1, Hd)

    # lane-dense linear output: pad O up to a multiple of 128 (sliced outside)
    Opad = ((O + 127) // 128) * 128
    wlin_p = jnp.zeros((Hd, Opad), jnp.float32).at[:, :O].set(wlin)
    blin_p = jnp.zeros((1, Opad), jnp.float32).at[:, :O].set(blin)

    h_tbd = jnp.transpose(H, (1, 0, 2)).astype(jnp.float32)               # (T, B, Hd)
    len2d = lengths.astype(jnp.int32).reshape(B, 1)

    # batch tiling: 2 parallel tiles (v7x megacore) when per-tile batch stays a
    # multiple of the 8-row sublane constraint; otherwise a single full tile.
    nb = 2 if (B % 16 == 0) else 1
    b_tile = B // nb

    unroll = bool(T <= 32)
    # TODO(synk): optionally cast matmul operands to bf16 on v6e/v7x; kept f32
    # here so results stay bit-tight vs. the f32 reference.
    kernel = functools.partial(_recovery_kernel, num_layers, float(padding_value), unroll)

    grid_spec = pltpu.PrefetchScalarGridSpec(
        num_scalar_prefetch=0,
        grid=(nb,),
        in_specs=[
            pl.BlockSpec((T, b_tile, Hd), lambda i: (0, i, 0)),           # H (time-major)
            pl.BlockSpec((b_tile, 1), lambda i: (i, 0)),                  # lengths
            pl.BlockSpec(wih_f.shape, lambda i: (0, 0, 0)),
            pl.BlockSpec(whh_f.shape, lambda i: (0, 0, 0)),
            pl.BlockSpec(bi_f.shape, lambda i: (0, 0, 0)),
            pl.BlockSpec(bhn.shape, lambda i: (0, 0, 0)),
            pl.BlockSpec(wlin_p.shape, lambda i: (0, 0)),
            pl.BlockSpec(blin_p.shape, lambda i: (0, 0)),
        ],
        out_specs=pl.BlockSpec((T, b_tile, Opad), lambda i: (0, i, 0)),
        scratch_shapes=[
            pltpu.VMEM((T, b_tile, Hd), jnp.float32),      # layer output buffer
            pltpu.VMEM((T, b_tile, 3 * Hd), jnp.float32),  # hoisted input-gate projections
            pltpu.VMEM((b_tile, Hd), jnp.float32),         # GRU hidden state
            pltpu.VMEM((T, b_tile, 1), jnp.float32),       # validity mask (0/1)
        ],
    )

    out_tbo = pl.pallas_call(
        kernel,
        out_shape=jax.ShapeDtypeStruct((T, B, Opad), jnp.float32),
        grid_spec=grid_spec,
        compiler_params=pltpu.CompilerParams(
            dimension_semantics=("parallel",),
            vmem_limit_bytes=32 * 1024 * 1024,
        ),
    )(h_tbd, len2d, wih_f, whh_f, bi_f, bhn, wlin_p, blin_p)
    return jnp.transpose(out_tbo, (1, 0, 2))[:, :, :O]                    # (B, T, O)


def recovery_reference(H, lengths, params, padding_value, num_layers):
    """Pure-JAX reference for validation."""
    wih, whh, bih, bhh, wlin, blin = params
    B, T, Hd = H.shape
    x = H.astype(jnp.float32)
    for layer in range(num_layers):
        h = jnp.zeros((B, Hd), jnp.float32)
        outs = []
        for t in range(T):
            xt = x[:, t, :]
            gi_r = xt @ wih[layer, 0] + bih[layer, 0]
            gi_z = xt @ wih[layer, 1] + bih[layer, 1]
            gi_n = xt @ wih[layer, 2] + bih[layer, 2]
            gh_r = h @ whh[layer, 0] + bhh[layer, 0]
            gh_z = h @ whh[layer, 1] + bhh[layer, 1]
            gh_n = h @ whh[layer, 2] + bhh[layer, 2]
            r = jax.nn.sigmoid(gi_r + gh_r)
            z = jax.nn.sigmoid(gi_z + gh_z)
            n = jnp.tanh(gi_n + r * gh_n)
            hn = (1.0 - z) * n + z * h
            valid = (lengths > t)[:, None]
            h = jnp.where(valid, hn, h)
            outs.append(hn)
        x = jnp.stack(outs, axis=1)
    mask = jnp.arange(T)[None, :, None] < lengths[:, None, None]
    x_o = jnp.where(mask, x, jnp.float32(padding_value))
    return x_o @ wlin + blin.reshape(1, 1, -1)


if __name__ == "__main__":
    B, max_seq, hidden_dim, output_dim, num_layers = 4, 8, 32, 16, 2
    padding_value = -1.0

    key = jax.random.PRNGKey(0)
    k_in, k_par = jax.random.split(key)
    H = jax.random.normal(k_in, (B, max_seq, hidden_dim), jnp.float32)
    t = jnp.array([8, 5, 3, 6], jnp.int32)     # variable sequence lengths

    params = make_params(k_par, hidden_dim, output_dim, num_layers)

    out = recovery_forward(H, t, params, padding_value, max_seq, num_layers)
    out = jax.block_until_ready(out)

    ref = recovery_reference(H, t, params, padding_value, num_layers)
    assert out.shape == (B, max_seq, output_dim)
    assert jnp.allclose(out, ref, atol=1e-4, rtol=1e-4), "mismatch vs pure-JAX reference"

    print("KERNEL_OK")
</pallas_src>

<mosaic_0001>
module attributes {stable_mosaic.version = 11 : i64} {
  func.func @_recovery_kernel(%arg0: i32, %arg1: memref<8x4x32xf32, #tpu.memory_space<vmem>>, %arg2: memref<4x1xi32, #tpu.memory_space<vmem>>, %arg3: memref<2x32x96xf32, #tpu.memory_space<vmem>>, %arg4: memref<2x32x96xf32, #tpu.memory_space<vmem>>, %arg5: memref<2x1x96xf32, #tpu.memory_space<vmem>>, %arg6: memref<2x1x32xf32, #tpu.memory_space<vmem>>, %arg7: memref<32x128xf32, #tpu.memory_space<vmem>>, %arg8: memref<1x128xf32, #tpu.memory_space<vmem>>, %arg9: memref<8x4x128xf32, #tpu.memory_space<vmem>>, %arg10: memref<8x4x32xf32, #tpu.memory_space<vmem>>, %arg11: memref<8x4x96xf32, #tpu.memory_space<vmem>>, %arg12: memref<4x32xf32, #tpu.memory_space<vmem>>, %arg13: memref<8x4x1xf32, #tpu.memory_space<vmem>>) attributes {dimension_semantics = [#tpu.dimension_semantics<parallel>], iteration_bounds = array<i64: 1>, scalar_prefetch = 0 : i64, scratch_operands = 4 : i64, tpu.core_type = #tpu.core_type<tc>, window_params = [{transform_indices = @transform_0, window_bounds = array<i64: 8, 4, 32>}, {transform_indices = @transform_1, window_bounds = array<i64: 4, 1>}, {pipeline_mode = #tpu.pipeline_mode<synchronous>, transform_indices = @transform_2, window_bounds = array<i64: 2, 32, 96>}, {pipeline_mode = #tpu.pipeline_mode<synchronous>, transform_indices = @transform_3, window_bounds = array<i64: 2, 32, 96>}, {pipeline_mode = #tpu.pipeline_mode<synchronous>, transform_indices = @transform_4, window_bounds = array<i64: 2, 1, 96>}, {pipeline_mode = #tpu.pipeline_mode<synchronous>, transform_indices = @transform_5, window_bounds = array<i64: 2, 1, 32>}, {pipeline_mode = #tpu.pipeline_mode<synchronous>, transform_indices = @transform_6, window_bounds = array<i64: 32, 128>}, {pipeline_mode = #tpu.pipeline_mode<synchronous>, transform_indices = @transform_7, window_bounds = array<i64: 1, 128>}, {transform_indices = @transform_8, window_bounds = array<i64: 8, 4, 128>}]} {
    %0 = tpu.iota {dimensions = array<i32: 0>} : vector<8x4x1xi32>
    %c0 = arith.constant 0 : index
    %c0_0 = arith.constant 0 : index
    %1 = vector.load %arg2[%c0, %c0_0] : memref<4x1xi32, #tpu.memory_space<vmem>>, vector<4x1xi32>
    %2 = vector.shape_cast %1 : vector<4x1xi32> to vector<1x4x1xi32>
    %3 = vector.broadcast %2 : vector<1x4x1xi32> to vector<8x4x1xi32>
    %4 = arith.cmpi slt, %0, %3 : vector<8x4x1xi32>
    %5 = arith.extui %4 : vector<8x4x1xi1> to vector<8x4x1xi32>
    %6 = arith.sitofp %5 : vector<8x4x1xi32> to vector<8x4x1xf32>
    %c0_1 = arith.constant 0 : index
    %c0_2 = arith.constant 0 : index
    %c0_3 = arith.constant 0 : index
    %7 = vector.load %arg13[%c0_1, %c0_2, %c0_3] : memref<8x4x1xf32, #tpu.memory_space<vmem>>, vector<8x4x1xf32>
    tpu.vector_store %arg13[%c0_1, %c0_2, %c0_3], %6 {strides = array<i32>} : memref<8x4x1xf32, #tpu.memory_space<vmem>>, vector<8x4x1xf32>,
    %c0_4 = arith.constant 0 : index
    %c0_5 = arith.constant 0 : index
    %c0_6 = arith.constant 0 : index
    %8 = vector.load %arg1[%c0_4, %c0_5, %c0_6] : memref<8x4x32xf32, #tpu.memory_space<vmem>>, vector<8x4x32xf32>
    %9 = vector.shape_cast %8 : vector<8x4x32xf32> to vector<32x32xf32>
    %c0_7 = arith.constant 0 : index
    %c0_8 = arith.constant 0 : index
    %c0_9 = arith.constant 0 : index
    %10 = vector.load %arg3[%c0_7, %c0_8, %c0_9] : memref<2x32x96xf32, #tpu.memory_space<vmem>>, vector<1x32x96xf32>
    %11 = vector.shape_cast %10 : vector<1x32x96xf32> to vector<32x96xf32>
    %cst = arith.constant dense<0.000000e+00> : vector<32x96xf32>
    %12 = tpu.matmul %9, %11, %cst {dimension_numbers = #tpu.dot_dimension_numbers<[1], [0], [0], [1], [0, 0, 1, 1], [], []>} : vector<32x32xf32>, vector<32x96xf32>, vector<32x96xf32> -> vector<32x96xf32>
    %c0_10 = arith.constant 0 : index
    %c0_11 = arith.constant 0 : index
    %c0_12 = arith.constant 0 : index
    %13 = vector.load %arg5[%c0_10, %c0_11, %c0_12] : memref<2x1x96xf32, #tpu.memory_space<vmem>>, vector<1x1x96xf32>
    %14 = vector.shape_cast %13 : vector<1x1x96xf32> to vector<1x96xf32>
    %15 = vector.broadcast %14 : vector<1x96xf32> to vector<32x96xf32>
    %16 = arith.addf %12, %15 : vector<32x96xf32>
    %17 = vector.shape_cast %16 : vector<32x96xf32> to vector<8x4x96xf32>
    %c0_13 = arith.constant 0 : index
    %c0_14 = arith.constant 0 : index
    %c0_15 = arith.constant 0 : index
    %18 = vector.load %arg11[%c0_13, %c0_14, %c0_15] : memref<8x4x96xf32, #tpu.memory_space<vmem>>, vector<8x4x96xf32>
    tpu.vector_store %arg11[%c0_13, %c0_14, %c0_15], %17 {strides = array<i32>} : memref<8x4x96xf32, #tpu.memory_space<vmem>>, vector<8x4x96xf32>,
    %c0_16 = arith.constant 0 : index
    %c0_17 = arith.constant 0 : index
    %c0_18 = arith.constant 0 : index
    %19 = vector.load %arg4[%c0_16, %c0_17, %c0_18] : memref<2x32x96xf32, #tpu.memory_space<vmem>>, vector<1x32x96xf32>
    %20 = vector.shape_cast %19 : vector<1x32x96xf32> to vector<32x96xf32>
    %c0_19 = arith.constant 0 : index
    %c0_20 = arith.constant 0 : index
    %c0_21 = arith.constant 0 : index
    %21 = vector.load %arg6[%c0_19, %c0_20, %c0_21] : memref<2x1x32xf32, #tpu.memory_space<vmem>>, vector<1x1x32xf32>
    %22 = vector.shape_cast %21 : vector<1x1x32xf32> to vector<1x32xf32>
    %cst_22 = arith.constant 0.000000e+00 : f32
    %23 = vector.broadcast %cst_22 : f32 to vector<4x32xf32>
    %c0_23 = arith.constant 0 : index
    %c0_24 = arith.constant 0 : index
    %24 = vector.load %arg12[%c0_23, %c0_24] : memref<4x32xf32, #tpu.memory_space<vmem>>, vector<4x32xf32>
    tpu.vector_store %arg12[%c0_23, %c0_24], %23 {strides = array<i32>} : memref<4x32xf32, #tpu.memory_space<vmem>>, vector<4x32xf32>,
    %c0_i32 = arith.constant 0 : i32
    %c1_i32 = arith.constant 1 : i32
    %25 = arith.muli %c0_i32, %c1_i32 : i32
    %c0_i32_25 = arith.constant 0 : i32
    %26 = arith.addi %c0_i32_25, %25 : i32
    %27 = arith.index_cast %26 : i32 to index
    %c0_26 = arith.constant 0 : index
    %c0_27 = arith.constant 0 : index
    %28 = vector.load %arg11[%27, %c0_26, %c0_27] : memref<8x4x96xf32, #tpu.memory_space<vmem>>, vector<1x4x96xf32>
    %29 = vector.shape_cast %28 : vector<1x4x96xf32> to vector<4x96xf32>
    %c0_28 = arith.constant 0 : index
    %c0_29 = arith.constant 0 : index
    %30 = vector.load %arg12[%c0_28, %c0_29] : memref<4x32xf32, #tpu.memory_space<vmem>>, vector<4x32xf32>
    %cst_30 = arith.constant dense<0.000000e+00> : vector<4x96xf32>
    %31 = tpu.matmul %30, %20, %cst_30 {dimension_numbers = #tpu.dot_dimension_numbers<[1], [0], [0], [1], [0, 0, 1, 1], [], []>} : vector<4x32xf32>, vector<32x96xf32>, vector<4x96xf32> -> vector<4x96xf32>
    %32 = vector.extract_strided_slice %29 {offsets = [0, 0], sizes = [4, 32], strides = [1, 1]} : vector<4x96xf32> to vector<4x32xf32>
    %33 = vector.extract_strided_slice %31 {offsets = [0, 0], sizes = [4, 32], strides = [1, 1]} : vector<4x96xf32> to vector<4x32xf32>
    %34 = arith.addf %32, %33 : vector<4x32xf32>
    %35 = arith.negf %34 : vector<4x32xf32>
    %36 = math.exp %35 : vector<4x32xf32>
    %cst_31 = arith.constant 1.000000e+00 : f32
    %37 = vector.broadcast %cst_31 : f32 to vector<4x32xf32>
    %38 = arith.addf %37, %36 : vector<4x32xf32>
    %39 = arith.divf %37, %38 : vector<4x32xf32>
    %40 = vector.extract_strided_slice %29 {offsets = [0, 32], sizes = [4, 32], strides = [1, 1]} : vector<4x96xf32> to vector<4x32xf32>
    %41 = vector.extract_strided_slice %31 {offsets = [0, 32], sizes = [4, 32], strides = [1, 1]} : vector<4x96xf32> to vector<4x32xf32>
    %42 = arith.addf %40, %41 : vector<4x32xf32>
    %43 = arith.negf %42 : vector<4x32xf32>
    %44 = math.exp %43 : vector<4x32xf32>
    %cst_32 = arith.constant 1.000000e+00 : f32
    %45 = vector.broadcast %cst_32 : f32 to vector<4x32xf32>
    %46 = arith.addf %45, %44 : vector<4x32xf32>
    %47 = arith.divf %45, %46 : vector<4x32xf32>
    %48 = vector.extract_strided_slice %29 {offsets = [0, 64], sizes = [4, 32], strides = [1, 1]} : vector<4x96xf32> to vector<4x32xf32>
    %49 = vector.extract_strided_slice %31 {offsets = [0, 64], sizes = [4, 32], strides = [1, 1]} : vector<4x96xf32> to vector<4x32xf32>
    %50 = vector.broadcast %22 : vector<1x32xf32> to vector<4x32xf32>
    %51 = arith.addf %49, %50 : vector<4x32xf32>
    %52 = arith.mulf %39, %51 : vector<4x32xf32>
    %53 = arith.addf %48, %52 : vector<4x32xf32>
    %54 = math.tanh %53 : vector<4x32xf32>
    %cst_33 = arith.constant 1.000000e+00 : f32
    %55 = vector.broadcast %cst_33 : f32 to vector<4x32xf32>
    %56 = arith.subf %55, %47 : vector<4x32xf32>
    %57 = arith.mulf %56, %54 : vector<4x32xf32>
    %58 = arith.mulf %47, %30 : vector<4x32xf32>
    %59 = arith.addf %57, %58 : vector<4x32xf32>
    %60 = arith.index_cast %26 : i32 to index
    %c0_34 = arith.constant 0 : index
    %c0_35 = arith.constant 0 : index
    %61 = vector.load %arg13[%60, %c0_34, %c0_35] : memref<8x4x1xf32, #tpu.memory_space<vmem>>, vector<1x4x1xf32>
    %62 = vector.shape_cast %61 : vector<1x4x1xf32> to vector<4x1xf32>
    %63 = vector.broadcast %62 : vector<4x1xf32> to vector<4x32xf32>
    %64 = arith.mulf %63, %59 : vector<4x32xf32>
    %cst_36 = arith.constant 1.000000e+00 : f32
    %65 = vector.broadcast %cst_36 : f32 to vector<4x1xf32>
    %66 = arith.subf %65, %62 : vector<4x1xf32>
    %67 = vector.broadcast %66 : vector<4x1xf32> to vector<4x32xf32>
    %68 = arith.mulf %67, %30 : vector<4x32xf32>
    %69 = arith.addf %64, %68 : vector<4x32xf32>
    %c0_37 = arith.constant 0 : index
    %c0_38 = arith.constant 0 : index
    %70 = vector.load %arg12[%c0_37, %c0_38] : memref<4x32xf32, #tpu.memory_space<vmem>>, vector<4x32xf32>
    tpu.vector_store %arg12[%c0_37, %c0_38], %69 {strides = array<i32>} : memref<4x32xf32, #tpu.memory_space<vmem>>, vector<4x32xf32>,
    %71 = arith.index_cast %26 : i32 to index
    %c0_39 = arith.constant 0 : index
    %c0_40 = arith.constant 0 : index
    %72 = vector.load %arg10[%71, %c0_39, %c0_40] : memref<8x4x32xf32, #tpu.memory_space<vmem>>, vector<1x4x32xf32>
    %73 = vector.shape_cast %72 : vector<1x4x32xf32> to vector<4x32xf32>
    %74 = vector.shape_cast %59 : vector<4x32xf32> to vector<1x4x32xf32>
    tpu.vector_store %arg10[%71, %c0_39, %c0_40], %74 {strides = array<i32>} : memref<8x4x32xf32, #tpu.memory_space<vmem>>, vector<1x4x32xf32>,
    %c1_i32_41 = arith.constant 1 : i32
    %c1_i32_42 = arith.constant 1 : i32
    %75 = arith.muli %c1_i32_41, %c1_i32_42 : i32
    %c0_i32_43 = arith.constant 0 : i32
    %76 = arith.addi %c0_i32_43, %75 : i32
    %77 = arith.index_cast %76 : i32 to index
    %c0_44 = arith.constant 0 : index
    %c0_45 = arith.constant 0 : index
    %78 = vector.load %arg11[%77, %c0_44, %c0_45] : memref<8x4x96xf32, #tpu.memory_space<vmem>>, vector<1x4x96xf32>
    %79 = vector.shape_cast %78 : vector<1x4x96xf32> to vector<4x96xf32>
    %c0_46 = arith.constant 0 : index
    %c0_47 = arith.constant 0 : index
    %80 = vector.load %arg12[%c0_46, %c0_47] : memref<4x32xf32, #tpu.memory_space<vmem>>, vector<4x32xf32>
    %cst_48 = arith.constant dense<0.000000e+00> : vector<4x96xf32>
    %81 = tpu.matmul %80, %20, %cst_48 {dimension_numbers = #tpu.dot_dimension_numbers<[1], [0], [0], [1], [0, 0, 1, 1], [], []>} : vector<4x32xf32>, vector<32x96xf32>, vector<4x96xf32> -> vector<4x96xf32>
    %82 = vector.extract_strided_slice %79 {offsets = [0, 0], sizes = [4, 32], strides = [1, 1]} : vector<4x96xf32> to vector<4x32xf32>
    %83 = vector.extract_strided_slice %81 {offsets = [0, 0], sizes = [4, 32], strides = [1, 1]} : vector<4x96xf32> to vector<4x32xf32>
    %84 = arith.addf %82, %83 : vector<4x32xf32>
    %85 = arith.negf %84 : vector<4x32xf32>
    %86 = math.exp %85 : vector<4x32xf32>
    %cst_49 = arith.constant 1.000000e+00 : f32
    %87 = vector.broadcast %cst_49 : f32 to vector<4x32xf32>
    %88 = arith.addf %87, %86 : vector<4x32xf32>
    %89 = arith.divf %87, %88 : vector<4x32xf32>
    %90 = vector.extract_strided_slice %79 {offsets = [0, 32], sizes = [4, 32], strides = [1, 1]} : vector<4x96xf32> to vector<4x32xf32>
    %91 = vector.extract_strided_slice %81 {offsets = [0, 32], sizes = [4, 32], strides = [1, 1]} : vector<4x96xf32> to vector<4x32xf32>
    %92 = arith.addf %90, %91 : vector<4x32xf32>
    %93 = arith.negf %92 : vector<4x32xf32>
    %94 = math.exp %93 : vector<4x32xf32>
    %cst_50 = arith.constant 1.000000e+00 : f32
    %95 = vector.broadcast %cst_50 : f32 to vector<4x32xf32>
    %96 = arith.addf %95, %94 : vector<4x32xf32>
    %97 = arith.divf %95, %96 : vector<4x32xf32>
    %98 = vector.extract_strided_slice %79 {offsets = [0, 64], sizes = [4, 32], strides = [1, 1]} : vector<4x96xf32> to vector<4x32xf32>
    %99 = vector.extract_strided_slice %81 {offsets = [0, 64], sizes = [4, 32], strides = [1, 1]} : vector<4x96xf32> to vector<4x32xf32>
    %100 = vector.broadcast %22 : vector<1x32xf32> to vector<4x32xf32>
    %101 = arith.addf %99, %100 : vector<4x32xf32>
    %102 = arith.mulf %89, %101 : vector<4x32xf32>
    %103 = arith.addf %98, %102 : vector<4x32xf32>
    %104 = math.tanh %103 : vector<4x32xf32>
    %cst_51 = arith.constant 1.000000e+00 : f32
    %105 = vector.broadcast %cst_51 : f32 to vector<4x32xf32>
    %106 = arith.subf %105, %97 : vector<4x32xf32>
    %107 = arith.mulf %106, %104 : vector<4x32xf32>
    %108 = arith.mulf %97, %80 : vector<4x32xf32>
    %109 = arith.addf %107, %108 : vector<4x32xf32>
    %110 = arith.index_cast %76 : i32 to index
    %c0_52 = arith.constant 0 : index
    %c0_53 = arith.constant 0 : index
    %111 = vector.load %arg13[%110, %c0_52, %c0_53] : memref<8x4x1xf32, #tpu.memory_space<vmem>>, vector<1x4x1xf32>
    %112 = vector.shape_cast %111 : vector<1x4x1xf32> to vector<4x1xf32>
    %113 = vector.broadcast %112 : vector<4x1xf32> to vector<4x32xf32>
    %114 = arith.mulf %113, %109 : vector<4x32xf32>
    %cst_54 = arith.constant 1.000000e+00 : f32
    %115 = vector.broadcast %cst_54 : f32 to vector<4x1xf32>
    %116 = arith.subf %115, %112 : vector<4x1xf32>
    %117 = vector.broadcast %116 : vector<4x1xf32> to vector<4x32xf32>
    %118 = arith.mulf %117, %80 : vector<4x32xf32>
    %119 = arith.addf %114, %118 : vector<4x32xf32>
    %c0_55 = arith.constant 0 : index
    %c0_56 = arith.constant 0 : index
    %120 = vector.load %arg12[%c0_55, %c0_56] : memref<4x32xf32, #tpu.memory_space<vmem>>, vector<4x32xf32>
    tpu.vector_store %arg12[%c0_55, %c0_56], %119 {strides = array<i32>} : memref<4x32xf32, #tpu.memory_space<vmem>>, vector<4x32xf32>,
    %121 = arith.index_cast %76 : i32 to index
    %c0_57 = arith.constant 0 : index
    %c0_58 = arith.constant 0 : index
    %122 = vector.load %arg10[%121, %c0_57, %c0_58] : memref<8x4x32xf32, #tpu.memory_space<vmem>>, vector<1x4x32xf32>
    %123 = vector.shape_cast %122 : vector<1x4x32xf32> to vector<4x32xf32>
    %124 = vector.shape_cast %109 : vector<4x32xf32> to vector<1x4x32xf32>
    tpu.vector_store %arg10[%121, %c0_57, %c0_58], %124 {strides = array<i32>} : memref<8x4x32xf32, #tpu.memory_space<vmem>>, vector<1x4x32xf32>,
    %c2_i32 = arith.constant 2 : i32
    %c1_i32_59 = arith.constant 1 : i32
    %125 = arith.muli %c2_i32, %c1_i32_59 : i32
    %c0_i32_60 = arith.constant 0 : i32
    %126 = arith.addi %c0_i32_60, %125 : i32
    %127 = arith.index_cast %126 : i32 to index
    %c0_61 = arith.constant 0 : index
    %c0_62 = arith.constant 0 : index
    %128 = vector.load %arg11[%127, %c0_61, %c0_62] : memref<8x4x96xf32, #tpu.memory_space<vmem>>, vector<1x4x96xf32>
    %129 = vector.shape_cast %128 : vector<1x4x96xf32> to vector<4x96xf32>
    %c0_63 = arith.constant 0 : index
    %c0_64 = arith.constant 0 : index
    %130 = vector.load %arg12[%c0_63, %c0_64] : memref<4x32xf32, #tpu.memory_space<vmem>>, vector<4x32xf32>
    %cst_65 = arith.constant dense<0.000000e+00> : vector<4x96xf32>
    %131 = tpu.matmul %130, %20, %cst_65 {dimension_numbers = #tpu.dot_dimension_numbers<[1], [0], [0], [1], [0, 0, 1, 1], [], []>} : vector<4x32xf32>, vector<32x96xf32>, vector<4x96xf32> -> vector<4x96xf32>
    %132 = vector.extract_strided_slice %129 {offsets = [0, 0], sizes = [4, 32], strides = [1, 1]} : vector<4x96xf32> to vector<4x32xf32>
    %133 = vector.extract_strided_slice %131 {offsets = [0, 0], sizes = [4, 32], strides = [1, 1]} : vector<4x96xf32> to vector<4x32xf32>
    %134 = arith.addf %132, %133 : vector<4x32xf32>
    %135 = arith.negf %134 : vector<4x32xf32>
    %136 = math.exp %135 : vector<4x32xf32>
    %cst_66 = arith.constant 1.000000e+00 : f32
    %137 = vector.broadcast %cst_66 : f32 to vector<4x32xf32>
    %138 = arith.addf %137, %136 : vector<4x32xf32>
    %139 = arith.divf %137, %138 : vector<4x32xf32>
    %140 = vector.extract_strided_slice %129 {offsets = [0, 32], sizes = [4, 32], strides = [1, 1]} : vector<4x96xf32> to vector<4x32xf32>
    %141 = vector.extract_strided_slice %131 {offsets = [0, 32], sizes = [4, 32], strides = [1, 1]} : vector<4x96xf32> to vector<4x32xf32>
    %142 = arith.addf %140, %141 : vector<4x32xf32>
    %143 = arith.negf %142 : vector<4x32xf32>
    %144 = math.exp %143 : vector<4x32xf32>
    %cst_67 = arith.constant 1.000000e+00 : f32
    %145 = vector.broadcast %cst_67 : f32 to vector<4x32xf32>
    %146 = arith.addf %145, %144 : vector<4x32xf32>
    %147 = arith.divf %145, %146 : vector<4x32xf32>
    %148 = vector.extract_strided_slice %129 {offsets = [0, 64], sizes = [4, 32], strides = [1, 1]} : vector<4x96xf32> to vector<4x32xf32>
    %149 = vector.extract_strided_slice %131 {offsets = [0, 64], sizes = [4, 32], strides = [1, 1]} : vector<4x96xf32> to vector<4x32xf32>
    %150 = vector.broadcast %22 : vector<1x32xf32> to vector<4x32xf32>
    %151 = arith.addf %149, %150 : vector<4x32xf32>
    %152 = arith.mulf %139, %151 : vector<4x32xf32>
    %153 = arith.addf %148, %152 : vector<4x32xf32>
    %154 = math.tanh %153 : vector<4x32xf32>
    %cst_68 = arith.constant 1.000000e+00 : f32
    %155 = vector.broadcast %cst_68 : f32 to vector<4x32xf32>
    %156 = arith.subf %155, %147 : vector<4x32xf32>
    %157 = arith.mulf %156, %154 : vector<4x32xf32>
    %158 = arith.mulf %147, %130 : vector<4x32xf32>
    %159 = arith.addf %157, %158 : vector<4x32xf32>
    %160 = arith.index_cast %126 : i32 to index
    %c0_69 = arith.constant 0 : index
    %c0_70 = arith.constant 0 : index
    %161 = vector.load %arg13[%160, %c0_69, %c0_70] : memref<8x4x1xf32, #tpu.memory_space<vmem>>, vector<1x4x1xf32>
    %162 = vector.shape_cast %161 : vector<1x4x1xf32> to vector<4x1xf32>
    %163 = vector.broadcast %162 : vector<4x1xf32> to vector<4x32xf32>
    %164 = arith.mulf %163, %159 : vector<4x32xf32>
    %cst_71 = arith.constant 1.000000e+00 : f32
    %165 = vector.broadcast %cst_71 : f32 to vector<4x1xf32>
    %166 = arith.subf %165, %162 : vector<4x1xf32>
    %167 = vector.broadcast %166 : vector<4x1xf32> to vector<4x32xf32>
    %168 = arith.mulf %167, %130 : vector<4x32xf32>
    %169 = arith.addf %164, %168 : vector<4x32xf32>
    %c0_72 = arith.constant 0 : index
    %c0_73 = arith.constant 0 : index
    %170 = vector.load %arg12[%c0_72, %c0_73] : memref<4x32xf32, #tpu.memory_space<vmem>>, vector<4x32xf32>
    tpu.vector_store %arg12[%c0_72, %c0_73], %169 {strides = array<i32>} : memref<4x32xf32, #tpu.memory_space<vmem>>, vector<4x32xf32>,
    %171 = arith.index_cast %126 : i32 to index
    %c0_74 = arith.constant 0 : index
    %c0_75 = arith.constant 0 : index
    %172 = vector.load %arg10[%171, %c0_74, %c0_75] : memref<8x4x32xf32, #tpu.memory_space<vmem>>, vector<1x4x32xf32>
    %173 = vector.shape_cast %172 : vector<1x4x32xf32> to vector<4x32xf32>
    %174 = vector.shape_cast %159 : vector<4x32xf32> to vector<1x4x32xf32>
    tpu.vector_store %arg10[%171, %c0_74, %c0_75], %174 {strides = array<i32>} : memref<8x4x32xf32, #tpu.memory_space<vmem>>, vector<1x4x32xf32>,
    %c3_i32 = arith.constant 3 : i32
    %c1_i32_76 = arith.constant 1 : i32
    %175 = arith.muli %c3_i32, %c1_i32_76 : i32
    %c0_i32_77 = arith.constant 0 : i32
    %176 = arith.addi %c0_i32_77, %175 : i32
    %177 = arith.index_cast %176 : i32 to index
    %c0_78 = arith.constant 0 : index
    %c0_79 = arith.constant 0 : index
    %178 = vector.load %arg11[%177, %c0_78, %c0_79] : memref<8x4x96xf32, #tpu.memory_space<vmem>>, vector<1x4x96xf32>
    %179 = vector.shape_cast %178 : vector<1x4x96xf32> to vector<4x96xf32>
    %c0_80 = arith.constant 0 : index
    %c0_81 = arith.constant 0 : index
    %180 = vector.load %arg12[%c0_80, %c0_81] : memref<4x32xf32, #tpu.memory_space<vmem>>, vector<4x32xf32>
    %cst_82 = arith.constant dense<0.000000e+00> : vector<4x96xf32>
    %181 = tpu.matmul %180, %20, %cst_82 {dimension_numbers = #tpu.dot_dimension_numbers<[1], [0], [0], [1], [0, 0, 1, 1], [], []>} : vector<4x32xf32>, vector<32x96xf32>, vector<4x96xf32> -> vector<4x96xf32>
    %182 = vector.extract_strided_slice %179 {offsets = [0, 0], sizes = [4, 32], strides = [1, 1]} : vector<4x96xf32> to vector<4x32xf32>
    %183 = vector.extract_strided_slice %181 {offsets = [0, 0], sizes = [4, 32], strides = [1, 1]} : vector<4x96xf32> to vector<4x32xf32>
    %184 = arith.addf %182, %183 : vector<4x32xf32>
    %185 = arith.negf %184 : vector<4x32xf32>
    %186 = math.exp %185 : vector<4x32xf32>
    %cst_83 = arith.constant 1.000000e+00 : f32
    %187 = vector.broadcast %cst_83 : f32 to vector<4x32xf32>
    %188 = arith.addf %187, %186 : vector<4x32xf32>
    %189 = arith.divf %187, %188 : vector<4x32xf32>
    %190 = vector.extract_strided_slice %179 {offsets = [0, 32], sizes = [4, 32], strides = [1, 1]} : vector<4x96xf32> to vector<4x32xf32>
    %191 = vector.extract_strided_slice %181 {offsets = [0, 32], sizes = [4, 32], strides = [1, 1]} : vector<4x96xf32> to vector<4x32xf32>
    %192 = arith.addf %190, %191 : vector<4x32xf32>
    %193 = arith.negf %192 : vector<4x32xf32>
    %194 = math.exp %193 : vector<4x32xf32>
    %cst_84 = arith.constant 1.000000e+00 : f32
    %195 = vector.broadcast %cst_84 : f32 to vector<4x32xf32>
    %196 = arith.addf %195, %194 : vector<4x32xf32>
    %197 = arith.divf %195, %196 : vector<4x32xf32>
    %198 = vector.extract_strided_slice %179 {offsets = [0, 64], sizes = [4, 32], strides = [1, 1]} : vector<4x96xf32> to vector<4x32xf32>
    %199 = vector.extract_strided_slice %181 {offsets = [0, 64], sizes = [4, 32], strides = [1, 1]} : vector<4x96xf32> to vector<4x32xf32>
    %200 = vector.broadcast %22 : vector<1x32xf32> to vector<4x32xf32>
    %201 = arith.addf %199, %200 : vector<4x32xf32>
    %202 = arith.mulf %189, %201 : vector<4x32xf32>
    %203 = arith.addf %198, %202 : vector<4x32xf32>
    %204 = math.tanh %203 : vector<4x32xf32>
    %cst_85 = arith.constant 1.000000e+00 : f32
    %205 = vector.broadcast %cst_85 : f32 to vector<4x32xf32>
    %206 = arith.subf %205, %197 : vector<4x32xf32>
    %207 = arith.mulf %206, %204 : vector<4x32xf32>
    %208 = arith.mulf %197, %180 : vector<4x32xf32>
    %209 = arith.addf %207, %208 : vector<4x32xf32>
    %210 = arith.index_cast %176 : i32 to index
    %c0_86 = arith.constant 0 : index
    %c0_87 = arith.constant 0 : index
    %211 = vector.load %arg13[%210, %c0_86, %c0_87] : memref<8x4x1xf32, #tpu.memory_space<vmem>>, vector<1x4x1xf32>
    %212 = vector.shape_cast %211 : vector<1x4x1xf32> to vector<4x1xf32>
    %213 = vector.broadcast %212 : vector<4x1xf32> to vector<4x32xf32>
    %214 = arith.mulf %213, %209 : vector<4x32xf32>
    %cst_88 = arith.constant 1.000000e+00 : f32
    %215 = vector.broadcast %cst_88 : f32 to vector<4x1xf32>
    %216 = arith.subf %215, %212 : vector<4x1xf32>
    %217 = vector.broadcast %216 : vector<4x1xf32> to vector<4x32xf32>
    %218 = arith.mulf %217, %180 : vector<4x32xf32>
    %219 = arith.addf %214, %218 : vector<4x32xf32>
    %c0_89 = arith.constant 0 : index
    %c0_90 = arith.constant 0 : index
    %220 = vector.load %arg12[%c0_89, %c0_90] : memref<4x32xf32, #tpu.memory_space<vmem>>, vector<4x32xf32>
    tpu.vector_store %arg12[%c0_89, %c0_90], %219 {strides = array<i32>} : memref<4x32xf32, #tpu.memory_space<vmem>>, vector<4x32xf32>,
    %221 = arith.index_cast %176 : i32 to index
    %c0_91 = arith.constant 0 : index
    %c0_92 = arith.constant 0 : index
    %222 = vector.load %arg10[%221, %c0_91, %c0_92] : memref<8x4x32xf32, #tpu.memory_space<vmem>>, vector<1x4x32xf32>
    %223 = vector.shape_cast %222 : vector<1x4x32xf32> to vector<4x32xf32>
    %224 = vector.shape_cast %209 : vector<4x32xf32> to vector<1x4x32xf32>
    tpu.vector_store %arg10[%221, %c0_91, %c0_92], %224 {strides = array<i32>} : memref<8x4x32xf32, #tpu.memory_space<vmem>>, vector<1x4x32xf32>,
    %c4_i32 = arith.constant 4 : i32
    %c1_i32_93 = arith.constant 1 : i32
    %225 = arith.muli %c4_i32, %c1_i32_93 : i32
    %c0_i32_94 = arith.constant 0 : i32
    %226 = arith.addi %c0_i32_94, %225 : i32
    %227 = arith.index_cast %226 : i32 to index
    %c0_95 = arith.constant 0 : index
    %c0_96 = arith.constant 0 : index
    %228 = vector.load %arg11[%227, %c0_95, %c0_96] : memref<8x4x96xf32, #tpu.memory_space<vmem>>, vector<1x4x96xf32>
    %229 = vector.shape_cast %228 : vector<1x4x96xf32> to vector<4x96xf32>
    %c0_97 = arith.constant 0 : index
    %c0_98 = arith.constant 0 : index
    %230 = vector.load %arg12[%c0_97, %c0_98] : memref<4x32xf32, #tpu.memory_space<vmem>>, vector<4x32xf32>
    %cst_99 = arith.constant dense<0.000000e+00> : vector<4x96xf32>
    %231 = tpu.matmul %230, %20, %cst_99 {dimension_numbers = #tpu.dot_dimension_numbers<[1], [0], [0], [1], [0, 0, 1, 1], [], []>} : vector<4x32xf32>, vector<32x96xf32>, vector<4x96xf32> -> vector<4x96xf32>
    %232 = vector.extract_strided_slice %229 {offsets = [0, 0], sizes = [4, 32], strides = [1, 1]} : vector<4x96xf32> to vector<4x32xf32>
    %233 = vector.extract_strided_slice %231 {offsets = [0, 0], sizes = [4, 32], strides = [1, 1]} : vector<4x96xf32> to vector<4x32xf32>
    %234 = arith.addf %232, %233 : vector<4x32xf32>
    %235 = arith.negf %234 : vector<4x32xf32>
    %236 = math.exp %235 : vector<4x32xf32>
    %cst_100 = arith.constant 1.000000e+00 : f32
    %237 = vector.broadcast %cst_100 : f32 to vector<4x32xf32>
    %238 = arith.addf %237, %236 : vector<4x32xf32>
    %239 = arith.divf %237, %238 : vector<4x32xf32>
    %240 = vector.extract_strided_slice %229 {offsets = [0, 32], sizes = [4, 32], strides = [1, 1]} : vector<4x96xf32> to vector<4x32xf32>
    %241 = vector.extract_strided_slice %231 {offsets = [0, 32], sizes = [4, 32], strides = [1, 1]} : vector<4x96xf32> to vector<4x32xf32>
    %242 = arith.addf %240, %241 : vector<4x32xf32>
    %243 = arith.negf %242 : vector<4x32xf32>
    %244 = math.exp %243 : vector<4x32xf32>
    %cst_101 = arith.constant 1.000000e+00 : f32
    %245 = vector.broadcast %cst_101 : f32 to vector<4x32xf32>
    %246 = arith.addf %245, %244 : vector<4x32xf32>
    %247 = arith.divf %245, %246 : vector<4x32xf32>
    %248 = vector.extract_strided_slice %229 {offsets = [0, 64], sizes = [4, 32], strides = [1, 1]} : vector<4x96xf32> to vector<4x32xf32>
    %249 = vector.extract_strided_slice %231 {offsets = [0, 64], sizes = [4, 32], strides = [1, 1]} : vector<4x96xf32> to vector<4x32xf32>
    %250 = vector.broadcast %22 : vector<1x32xf32> to vector<4x32xf32>
    %251 = arith.addf %249, %250 : vector<4x32xf32>
    %252 = arith.mulf %239, %251 : vector<4x32xf32>
    %253 = arith.addf %248, %252 : vector<4x32xf32>
    %254 = math.tanh %253 : vector<4x32xf32>
    %cst_102 = arith.constant 1.000000e+00 : f32
    %255 = vector.broadcast %cst_102 : f32 to vector<4x32xf32>
    %256 = arith.subf %255, %247 : vector<4x32xf32>
    %257 = arith.mulf %256, %254 : vector<4x32xf32>
    %258 = arith.mulf %247, %230 : vector<4x32xf32>
    %259 = arith.addf %257, %258 : vector<4x32xf32>
    %260 = arith.index_cast %226 : i32 to index
    %c0_103 = arith.constant 0 : index
    %c0_104 = arith.constant 0 : index
    %261 = vector.load %arg13[%260, %c0_103, %c0_104] : memref<8x4x1xf32, #tpu.memory_space<vmem>>, vector<1x4x1xf32>
    %262 = vector.shape_cast %261 : vector<1x4x1xf32> to vector<4x1xf32>
    %263 = vector.broadcast %262 : vector<4x1xf32> to vector<4x32xf32>
    %264 = arith.mulf %263, %259 : vector<4x32xf32>
    %cst_105 = arith.constant 1.000000e+00 : f32
    %265 = vector.broadcast %cst_105 : f32 to vector<4x1xf32>
    %266 = arith.subf %265, %262 : vector<4x1xf32>
    %267 = vector.broadcast %266 : vector<4x1xf32> to vector<4x32xf32>
    %268 = arith.mulf %267, %230 : vector<4x32xf32>
    %269 = arith.addf %264, %268 : vector<4x32xf32>
    %c0_106 = arith.constant 0 : index
    %c0_107 = arith.constant 0 : index
    %270 = vector.load %arg12[%c0_106, %c0_107] : memref<4x32xf32, #tpu.memory_space<vmem>>, vector<4x32xf32>
    tpu.vector_store %arg12[%c0_106, %c0_107], %269 {strides = array<i32>} : memref<4x32xf32, #tpu.memory_space<vmem>>, vector<4x32xf32>,
    %271 = arith.index_cast %226 : i32 to index
    %c0_108 = arith.constant 0 : index
    %c0_109 = arith.constant 0 : index
    %272 = vector.load %arg10[%271, %c0_108, %c0_109] : memref<8x4x32xf32, #tpu.memory_space<vmem>>, vector<1x4x32xf32>
    %273 = vector.shape_cast %272 : vector<1x4x32xf32> to vector<4x32xf32>
    %274 = vector.shape_cast %259 : vector<4x32xf32> to vector<1x4x32xf32>
    tpu.vector_store %arg10[%271, %c0_108, %c0_109], %274 {strides = array<i32>} : memref<8x4x32xf32, #tpu.memory_space<vmem>>, vector<1x4x32xf32>,
    %c5_i32 = arith.constant 5 : i32
    %c1_i32_110 = arith.constant 1 : i32
    %275 = arith.muli %c5_i32, %c1_i32_110 : i32
    %c0_i32_111 = arith.constant 0 : i32
    %276 = arith.addi %c0_i32_111, %275 : i32
    %277 = arith.index_cast %276 : i32 to index
    %c0_112 = arith.constant 0 : index
    %c0_113 = arith.constant 0 : index
    %278 = vector.load %arg11[%277, %c0_112, %c0_113] : memref<8x4x96xf32, #tpu.memory_space<vmem>>, vector<1x4x96xf32>
    %279 = vector.shape_cast %278 : vector<1x4x96xf32> to vector<4x96xf32>
    %c0_114 = arith.constant 0 : index
    %c0_115 = arith.constant 0 : index
    %280 = vector.load %arg12[%c0_114, %c0_115] : memref<4x32xf32, #tpu.memory_space<vmem>>, vector<4x32xf32>
    %cst_116 = arith.constant dense<0.000000e+00> : vector<4x96xf32>
    %281 = tpu.matmul %280, %20, %cst_116 {dimension_numbers = #tpu.dot_dimension_numbers<[1], [0], [0], [1], [0, 0, 1, 1], [], []>} : vector<4x32xf32>, vector<32x96xf32>, vector<4x96xf32> -> vector<4x96xf32>
    %282 = vector.extract_strided_slice %279 {offsets = [0, 0], sizes = [4, 32], strides = [1, 1]} : vector<4x96xf32> to vector<4x32xf32>
    %283 = vector.extract_strided_slice %281 {offsets = [0, 0], sizes = [4, 32], strides = [1, 1]} : vector<4x96xf32> to vector<4x32xf32>
    %284 = arith.addf %282, %283 : vector<4x32xf32>
    %285 = arith.negf %284 : vector<4x32xf32>
    %286 = math.exp %285 : vector<4x32xf32>
    %cst_117 = arith.constant 1.000000e+00 : f32
    %287 = vector.broadcast %cst_117 : f32 to vector<4x32xf32>
    %288 = arith.addf %287, %286 : vector<4x32xf32>
    %289 = arith.divf %287, %288 : vector<4x32xf32>
    %290 = vector.extract_strided_slice %279 {offsets = [0, 32], sizes = [4, 32], strides = [1, 1]} : vector<4x96xf32> to vector<4x32xf32>
    %291 = vector.extract_strided_slice %281 {offsets = [0, 32], sizes = [4, 32], strides = [1, 1]} : vector<4x96xf32> to vector<4x32xf32>
    %292 = arith.addf %290, %291 : vector<4x32xf32>
    %293 = arith.negf %292 : vector<4x32xf32>
    %294 = math.exp %293 : vector<4x32xf32>
    %cst_118 = arith.constant 1.000000e+00 : f32
    %295 = vector.broadcast %cst_118 : f32 to vector<4x32xf32>
    %296 = arith.addf %295, %294 : vector<4x32xf32>
    %297 = arith.divf %295, %296 : vector<4x32xf32>
    %298 = vector.extract_strided_slice %279 {offsets = [0, 64], sizes = [4, 32], strides = [1, 1]} : vector<4x96xf32> to vector<4x32xf32>
    %299 = vector.extract_strided_slice %281 {offsets = [0, 64], sizes = [4, 32], strides = [1, 1]} : vector<4x96xf32> to vector<4x32xf32>
    %300 = vector.broadcast %22 : vector<1x32xf32> to vector<4x32xf32>
    %301 = arith.addf %299, %300 : vector<4x32xf32>
    %302 = arith.mulf %289, %301 : vector<4x32xf32>
    %303 = arith.addf %298, %302 : vector<4x32xf32>
    %304 = math.tanh %303 : vector<4x32xf32>
    %cst_119 = arith.constant 1.000000e+00 : f32
    %305 = vector.broadcast %cst_119 : f32 to vector<4x32xf32>
    %306 = arith.subf %305, %297 : vector<4x32xf32>
    %307 = arith.mulf %306, %304 : vector<4x32xf32>
    %308 = arith.mulf %297, %280 : vector<4x32xf32>
    %309 = arith.addf %307, %308 : vector<4x32xf32>
    %310 = arith.index_cast %276 : i32 to index
    %c0_120 = arith.constant 0 : index
    %c0_121 = arith.constant 0 : index
    %311 = vector.load %arg13[%310, %c0_120, %c0_121] : memref<8x4x1xf32, #tpu.memory_space<vmem>>, vector<1x4x1xf32>
    %312 = vector.shape_cast %311 : vector<1x4x1xf32> to vector<4x1xf32>
    %313 = vector.broadcast %312 : vector<4x1xf32> to vector<4x32xf32>
    %314 = arith.mulf %313, %309 : vector<4x32xf32>
    %cst_122 = arith.constant 1.000000e+00 : f32
    %315 = vector.broadcast %cst_122 : f32 to vector<4x1xf32>
    %316 = arith.subf %315, %312 : vector<4x1xf32>
    %317 = vector.broadcast %316 : vector<4x1xf32> to vector<4x32xf32>
    %318 = arith.mulf %317, %280 : vector<4x32xf32>
    %319 = arith.addf %314, %318 : vector<4x32xf32>
    %c0_123 = arith.constant 0 : index
    %c0_124 = arith.constant 0 : index
    %320 = vector.load %arg12[%c0_123, %c0_124] : memref<4x32xf32, #tpu.memory_space<vmem>>, vector<4x32xf32>
    tpu.vector_store %arg12[%c0_123, %c0_124], %319 {strides = array<i32>} : memref<4x32xf32, #tpu.memory_space<vmem>>, vector<4x32xf32>,
    %321 = arith.index_cast %276 : i32 to index
    %c0_125 = arith.constant 0 : index
    %c0_126 = arith.constant 0 : index
    %322 = vector.load %arg10[%321, %c0_125, %c0_126] : memref<8x4x32xf32, #tpu.memory_space<vmem>>, vector<1x4x32xf32>
    %323 = vector.shape_cast %322 : vector<1x4x32xf32> to vector<4x32xf32>
    %324 = vector.shape_cast %309 : vector<4x32xf32> to vector<1x4x32xf32>
    tpu.vector_store %arg10[%321, %c0_125, %c0_126], %324 {strides = array<i32>} : memref<8x4x32xf32, #tpu.memory_space<vmem>>, vector<1x4x32xf32>,
    %c6_i32 = arith.constant 6 : i32
    %c1_i32_127 = arith.constant 1 : i32
    %325 = arith.muli %c6_i32, %c1_i32_127 : i32
    %c0_i32_128 = arith.constant 0 : i32
    %326 = arith.addi %c0_i32_128, %325 : i32
    %327 = arith.index_cast %326 : i32 to index
    %c0_129 = arith.constant 0 : index
    %c0_130 = arith.constant 0 : index
    %328 = vector.load %arg11[%327, %c0_129, %c0_130] : memref<8x4x96xf32, #tpu.memory_space<vmem>>, vector<1x4x96xf32>
    %329 = vector.shape_cast %328 : vector<1x4x96xf32> to vector<4x96xf32>
    %c0_131 = arith.constant 0 : index
    %c0_132 = arith.constant 0 : index
    %330 = vector.load %arg12[%c0_131, %c0_132] : memref<4x32xf32, #tpu.memory_space<vmem>>, vector<4x32xf32>
    %cst_133 = arith.constant dense<0.000000e+00> : vector<4x96xf32>
    %331 = tpu.matmul %330, %20, %cst_133 {dimension_numbers = #tpu.dot_dimension_numbers<[1], [0], [0], [1], [0, 0, 1, 1], [], []>} : vector<4x32xf32>, vector<32x96xf32>, vector<4x96xf32> -> vector<4x96xf32>
    %332 = vector.extract_strided_slice %329 {offsets = [0, 0], sizes = [4, 32], strides = [1, 1]} : vector<4x96xf32> to vector<4x32xf32>
    %333 = vector.extract_strided_slice %331 {offsets = [0, 0], sizes = [4, 32], strides = [1, 1]} : vector<4x96xf32> to vector<4x32xf32>
    %334 = arith.addf %332, %333 : vector<4x32xf32>
    %335 = arith.negf %334 : vector<4x32xf32>
    %336 = math.exp %335 : vector<4x32xf32>
    %cst_134 = arith.constant 1.000000e+00 : f32
    %337 = vector.broadcast %cst_134 : f32 to vector<4x32xf32>
    %338 = arith.addf %337, %336 : vector<4x32xf32>
    %339 = arith.divf %337, %338 : vector<4x32xf32>
    %340 = vector.extract_strided_slice %329 {offsets = [0, 32], sizes = [4, 32], strides = [1, 1]} : vector<4x96xf32> to vector<4x32xf32>
    %341 = vector.extract_strided_slice %331 {offsets = [0, 32], sizes = [4, 32], strides = [1, 1]} : vector<4x96xf32> to vector<4x32xf32>
    %342 = arith.addf %340, %341 : vector<4x32xf32>
    %343 = arith.negf %342 : vector<4x32xf32>
    %344 = math.exp %343 : vector<4x32xf32>
    %cst_135 = arith.constant 1.000000e+00 : f32
    %345 = vector.broadcast %cst_135 : f32 to vector<4x32xf32>
    %346 = arith.addf %345, %344 : vector<4x32xf32>
    %347 = arith.divf %345, %346 : vector<4x32xf32>
    %348 = vector.extract_strided_slice %329 {offsets = [0, 64], sizes = [4, 32], strides = [1, 1]} : vector<4x96xf32> to vector<4x32xf32>
    %349 = vector.extract_strided_slice %331 {offsets = [0, 64], sizes = [4, 32], strides = [1, 1]} : vector<4x96xf32> to vector<4x32xf32>
    %350 = vector.broadcast %22 : vector<1x32xf32> to vector<4x32xf32>
    %351 = arith.addf %349, %350 : vector<4x32xf32>
    %352 = arith.mulf %339, %351 : vector<4x32xf32>
    %353 = arith.addf %348, %352 : vector<4x32xf32>
    %354 = math.tanh %353 : vector<4x32xf32>
    %cst_136 = arith.constant 1.000000e+00 : f32
    %355 = vector.broadcast %cst_136 : f32 to vector<4x32xf32>
    %356 = arith.subf %355, %347 : vector<4x32xf32>
    %357 = arith.mulf %356, %354 : vector<4x32xf32>
    %358 = arith.mulf %347, %330 : vector<4x32xf32>
    %359 = arith.addf %357, %358 : vector<4x32xf32>
    %360 = arith.index_cast %326 : i32 to index
    %c0_137 = arith.constant 0 : index
    %c0_138 = arith.constant 0 : index
    %361 = vector.load %arg13[%360, %c0_137, %c0_138] : memref<8x4x1xf32, #tpu.memory_space<vmem>>, vector<1x4x1xf32>
    %362 = vector.shape_cast %361 : vector<1x4x1xf32> to vector<4x1xf32>
    %363 = vector.broadcast %362 : vector<4x1xf32> to vector<4x32xf32>
    %364 = arith.mulf %363, %359 : vector<4x32xf32>
    %cst_139 = arith.constant 1.000000e+00 : f32
    %365 = vector.broadcast %cst_139 : f32 to vector<4x1xf32>
    %366 = arith.subf %365, %362 : vector<4x1xf32>
    %367 = vector.broadcast %366 : vector<4x1xf32> to vector<4x32xf32>
    %368 = arith.mulf %367, %330 : vector<4x32xf32>
    %369 = arith.addf %364, %368 : vector<4x32xf32>
    %c0_140 = arith.constant 0 : index
    %c0_141 = arith.constant 0 : index
    %370 = vector.load %arg12[%c0_140, %c0_141] : memref<4x32xf32, #tpu.memory_space<vmem>>, vector<4x32xf32>
    tpu.vector_store %arg12[%c0_140, %c0_141], %369 {strides = array<i32>} : memref<4x32xf32, #tpu.memory_space<vmem>>, vector<4x32xf32>,
    %371 = arith.index_cast %326 : i32 to index
    %c0_142 = arith.constant 0 : index
    %c0_143 = arith.constant 0 : index
    %372 = vector.load %arg10[%371, %c0_142, %c0_143] : memref<8x4x32xf32, #tpu.memory_space<vmem>>, vector<1x4x32xf32>
    %373 = vector.shape_cast %372 : vector<1x4x32xf32> to vector<4x32xf32>
    %374 = vector.shape_cast %359 : vector<4x32xf32> to vector<1x4x32xf32>
    tpu.vector_store %arg10[%371, %c0_142, %c0_143], %374 {strides = array<i32>} : memref<8x4x32xf32, #tpu.memory_space<vmem>>, vector<1x4x32xf32>,
    %c7_i32 = arith.constant 7 : i32
    %c1_i32_144 = arith.constant 1 : i32
    %375 = arith.muli %c7_i32, %c1_i32_144 : i32
    %c0_i32_145 = arith.constant 0 : i32
    %376 = arith.addi %c0_i32_145, %375 : i32
    %377 = arith.index_cast %376 : i32 to index
    %c0_146 = arith.constant 0 : index
    %c0_147 = arith.constant 0 : index
    %378 = vector.load %arg11[%377, %c0_146, %c0_147] : memref<8x4x96xf32, #tpu.memory_space<vmem>>, vector<1x4x96xf32>
    %379 = vector.shape_cast %378 : vector<1x4x96xf32> to vector<4x96xf32>
    %c0_148 = arith.constant 0 : index
    %c0_149 = arith.constant 0 : index
    %380 = vector.load %arg12[%c0_148, %c0_149] : memref<4x32xf32, #tpu.memory_space<vmem>>, vector<4x32xf32>
    %cst_150 = arith.constant dense<0.000000e+00> : vector<4x96xf32>
    %381 = tpu.matmul %380, %20, %cst_150 {dimension_numbers = #tpu.dot_dimension_numbers<[1], [0], [0], [1], [0, 0, 1, 1], [], []>} : vector<4x32xf32>, vector<32x96xf32>, vector<4x96xf32> -> vector<4x96xf32>
    %382 = vector.extract_strided_slice %379 {offsets = [0, 0], sizes = [4, 32], strides = [1, 1]} : vector<4x96xf32> to vector<4x32xf32>
    %383 = vector.extract_strided_slice %381 {offsets = [0, 0], sizes = [4, 32], strides = [1, 1]} : vector<4x96xf32> to vector<4x32xf32>
    %384 = arith.addf %382, %383 : vector<4x32xf32>
    %385 = arith.negf %384 : vector<4x32xf32>
    %386 = math.exp %385 : vector<4x32xf32>
    %cst_151 = arith.constant 1.000000e+00 : f32
    %387 = vector.broadcast %cst_151 : f32 to vector<4x32xf32>
    %388 = arith.addf %387, %386 : vector<4x32xf32>
    %389 = arith.divf %387, %388 : vector<4x32xf32>
    %390 = vector.extract_strided_slice %379 {offsets = [0, 32], sizes = [4, 32], strides = [1, 1]} : vector<4x96xf32> to vector<4x32xf32>
    %391 = vector.extract_strided_slice %381 {offsets = [0, 32], sizes = [4, 32], strides = [1, 1]} : vector<4x96xf32> to vector<4x32xf32>
    %392 = arith.addf %390, %391 : vector<4x32xf32>
    %393 = arith.negf %392 : vector<4x32xf32>
    %394 = math.exp %393 : vector<4x32xf32>
    %cst_152 = arith.constant 1.000000e+00 : f32
    %395 = vector.broadcast %cst_152 : f32 to vector<4x32xf32>
    %396 = arith.addf %395, %394 : vector<4x32xf32>
    %397 = arith.divf %395, %396 : vector<4x32xf32>
    %398 = vector.extract_strided_slice %379 {offsets = [0, 64], sizes = [4, 32], strides = [1, 1]} : vector<4x96xf32> to vector<4x32xf32>
    %399 = vector.extract_strided_slice %381 {offsets = [0, 64], sizes = [4, 32], strides = [1, 1]} : vector<4x96xf32> to vector<4x32xf32>
    %400 = vector.broadcast %22 : vector<1x32xf32> to vector<4x32xf32>
    %401 = arith.addf %399, %400 : vector<4x32xf32>
    %402 = arith.mulf %389, %401 : vector<4x32xf32>
    %403 = arith.addf %398, %402 : vector<4x32xf32>
    %404 = math.tanh %403 : vector<4x32xf32>
    %cst_153 = arith.constant 1.000000e+00 : f32
    %405 = vector.broadcast %cst_153 : f32 to vector<4x32xf32>
    %406 = arith.subf %405, %397 : vector<4x32xf32>
    %407 = arith.mulf %406, %404 : vector<4x32xf32>
    %408 = arith.mulf %397, %380 : vector<4x32xf32>
    %409 = arith.addf %407, %408 : vector<4x32xf32>
    %410 = arith.index_cast %376 : i32 to index
    %c0_154 = arith.constant 0 : index
    %c0_155 = arith.constant 0 : index
    %411 = vector.load %arg13[%410, %c0_154, %c0_155] : memref<8x4x1xf32, #tpu.memory_space<vmem>>, vector<1x4x1xf32>
    %412 = vector.shape_cast %411 : vector<1x4x1xf32> to vector<4x1xf32>
    %413 = vector.broadcast %412 : vector<4x1xf32> to vector<4x32xf32>
    %414 = arith.mulf %413, %409 : vector<4x32xf32>
    %cst_156 = arith.constant 1.000000e+00 : f32
    %415 = vector.broadcast %cst_156 : f32 to vector<4x1xf32>
    %416 = arith.subf %415, %412 : vector<4x1xf32>
    %417 = vector.broadcast %416 : vector<4x1xf32> to vector<4x32xf32>
    %418 = arith.mulf %417, %380 : vector<4x32xf32>
    %419 = arith.addf %414, %418 : vector<4x32xf32>
    %c0_157 = arith.constant 0 : index
    %c0_158 = arith.constant 0 : index
    %420 = vector.load %arg12[%c0_157, %c0_158] : memref<4x32xf32, #tpu.memory_space<vmem>>, vector<4x32xf32>
    tpu.vector_store %arg12[%c0_157, %c0_158], %419 {strides = array<i32>} : memref<4x32xf32, #tpu.memory_space<vmem>>, vector<4x32xf32>,
    %421 = arith.index_cast %376 : i32 to index
    %c0_159 = arith.constant 0 : index
    %c0_160 = arith.constant 0 : index
    %422 = vector.load %arg10[%421, %c0_159, %c0_160] : memref<8x4x32xf32, #tpu.memory_space<vmem>>, vector<1x4x32xf32>
    %423 = vector.shape_cast %422 : vector<1x4x32xf32> to vector<4x32xf32>
    %424 = vector.shape_cast %409 : vector<4x32xf32> to vector<1x4x32xf32>
    tpu.vector_store %arg10[%421, %c0_159, %c0_160], %424 {strides = array<i32>} : memref<8x4x32xf32, #tpu.memory_space<vmem>>, vector<1x4x32xf32>,
    %c8_i32 = arith.constant 8 : i32
    %c0_161 = arith.constant 0 : index
    %c0_162 = arith.constant 0 : index
    %c0_163 = arith.constant 0 : index
    %425 = vector.load %arg10[%c0_161, %c0_162, %c0_163] : memref<8x4x32xf32, #tpu.memory_space<vmem>>, vector<8x4x32xf32>
    %426 = vector.shape_cast %425 : vector<8x4x32xf32> to vector<32x32xf32>
    %c1 = arith.constant 1 : index
    %c0_164 = arith.constant 0 : index
    %c0_165 = arith.constant 0 : index
    %427 = vector.load %arg3[%c1, %c0_164, %c0_165] : memref<2x32x96xf32, #tpu.memory_space<vmem>>, vector<1x32x96xf32>
    %428 = vector.shape_cast %427 : vector<1x32x96xf32> to vector<32x96xf32>
    %cst_166 = arith.constant dense<0.000000e+00> : vector<32x96xf32>
    %429 = tpu.matmul %426, %428, %cst_166 {dimension_numbers = #tpu.dot_dimension_numbers<[1], [0], [0], [1], [0, 0, 1, 1], [], []>} : vector<32x32xf32>, vector<32x96xf32>, vector<32x96xf32> -> vector<32x96xf32>
    %c1_167 = arith.constant 1 : index
    %c0_168 = arith.constant 0 : index
    %c0_169 = arith.constant 0 : index
    %430 = vector.load %arg5[%c1_167, %c0_168, %c0_169] : memref<2x1x96xf32, #tpu.memory_space<vmem>>, vector<1x1x96xf32>
    %431 = vector.shape_cast %430 : vector<1x1x96xf32> to vector<1x96xf32>
    %432 = vector.broadcast %431 : vector<1x96xf32> to vector<32x96xf32>
    %433 = arith.addf %429, %432 : vector<32x96xf32>
    %434 = vector.shape_cast %433 : vector<32x96xf32> to vector<8x4x96xf32>
    %c0_170 = arith.constant 0 : index
    %c0_171 = arith.constant 0 : index
    %c0_172 = arith.constant 0 : index
    %435 = vector.load %arg11[%c0_170, %c0_171, %c0_172] : memref<8x4x96xf32, #tpu.memory_space<vmem>>, vector<8x4x96xf32>
    tpu.vector_store %arg11[%c0_170, %c0_171, %c0_172], %434 {strides = array<i32>} : memref<8x4x96xf32, #tpu.memory_space<vmem>>, vector<8x4x96xf32>,
    %c1_173 = arith.constant 1 : index
    %c0_174 = arith.constant 0 : index
    %c0_175 = arith.constant 0 : index
    %436 = vector.load %arg4[%c1_173, %c0_174, %c0_175] : memref<2x32x96xf32, #tpu.memory_space<vmem>>, vector<1x32x96xf32>
    %437 = vector.shape_cast %436 : vector<1x32x96xf32> to vector<32x96xf32>
    %c1_176 = arith.constant 1 : index
    %c0_177 = arith.constant 0 : index
    %c0_178 = arith.constant 0 : index
    %438 = vector.load %arg6[%c1_176, %c0_177, %c0_178] : memref<2x1x32xf32, #tpu.memory_space<vmem>>, vector<1x1x32xf32>
    %439 = vector.shape_cast %438 : vector<1x1x32xf32> to vector<1x32xf32>
    %cst_179 = arith.constant 0.000000e+00 : f32
    %440 = vector.broadcast %cst_179 : f32 to vector<4x32xf32>
    %c0_180 = arith.constant 0 : index
    %c0_181 = arith.constant 0 : index
    %441 = vector.load %arg12[%c0_180, %c0_181] : memref<4x32xf32, #tpu.memory_space<vmem>>, vector<4x32xf32>
    tpu.vector_store %arg12[%c0_180, %c0_181], %440 {strides = array<i32>} : memref<4x32xf32, #tpu.memory_space<vmem>>, vector<4x32xf32>,
    %c0_i32_182 = arith.constant 0 : i32
    %c1_i32_183 = arith.constant 1 : i32
    %442 = arith.muli %c0_i32_182, %c1_i32_183 : i32
    %c0_i32_184 = arith.constant 0 : i32
    %443 = arith.addi %c0_i32_184, %442 : i32
    %444 = arith.index_cast %443 : i32 to index
    %c0_185 = arith.constant 0 : index
    %c0_186 = arith.constant 0 : index
    %445 = vector.load %arg11[%444, %c0_185, %c0_186] : memref<8x4x96xf32, #tpu.memory_space<vmem>>, vector<1x4x96xf32>
    %446 = vector.shape_cast %445 : vector<1x4x96xf32> to vector<4x96xf32>
    %c0_187 = arith.constant 0 : index
    %c0_188 = arith.constant 0 : index
    %447 = vector.load %arg12[%c0_187, %c0_188] : memref<4x32xf32, #tpu.memory_space<vmem>>, vector<4x32xf32>
    %cst_189 = arith.constant dense<0.000000e+00> : vector<4x96xf32>
    %448 = tpu.matmul %447, %437, %cst_189 {dimension_numbers = #tpu.dot_dimension_numbers<[1], [0], [0], [1], [0, 0, 1, 1], [], []>} : vector<4x32xf32>, vector<32x96xf32>, vector<4x96xf32> -> vector<4x96xf32>
    %449 = vector.extract_strided_slice %446 {offsets = [0, 0], sizes = [4, 32], strides = [1, 1]} : vector<4x96xf32> to vector<4x32xf32>
    %450 = vector.extract_strided_slice %448 {offsets = [0, 0], sizes = [4, 32], strides = [1, 1]} : vector<4x96xf32> to vector<4x32xf32>
    %451 = arith.addf %449, %450 : vector<4x32xf32>
    %452 = arith.negf %451 : vector<4x32xf32>
    %453 = math.exp %452 : vector<4x32xf32>
    %cst_190 = arith.constant 1.000000e+00 : f32
    %454 = vector.broadcast %cst_190 : f32 to vector<4x32xf32>
    %455 = arith.addf %454, %453 : vector<4x32xf32>
    %456 = arith.divf %454, %455 : vector<4x32xf32>
    %457 = vector.extract_strided_slice %446 {offsets = [0, 32], sizes = [4, 32], strides = [1, 1]} : vector<4x96xf32> to vector<4x32xf32>
    %458 = vector.extract_strided_slice %448 {offsets = [0, 32], sizes = [4, 32], strides = [1, 1]} : vector<4x96xf32> to vector<4x32xf32>
    %459 = arith.addf %457, %458 : vector<4x32xf32>
    %460 = arith.negf %459 : vector<4x32xf32>
    %461 = math.exp %460 : vector<4x32xf32>
    %cst_191 = arith.constant 1.000000e+00 : f32
    %462 = vector.broadcast %cst_191 : f32 to vector<4x32xf32>
    %463 = arith.addf %462, %461 : vector<4x32xf32>
    %464 = arith.divf %462, %463 : vector<4x32xf32>
    %465 = vector.extract_strided_slice %446 {offsets = [0, 64], sizes = [4, 32], strides = [1, 1]} : vector<4x96xf32> to vector<4x32xf32>
    %466 = vector.extract_strided_slice %448 {offsets = [0, 64], sizes = [4, 32], strides = [1, 1]} : vector<4x96xf32> to vector<4x32xf32>
    %467 = vector.broadcast %439 : vector<1x32xf32> to vector<4x32xf32>
    %468 = arith.addf %466, %467 : vector<4x32xf32>
    %469 = arith.mulf %456, %468 : vector<4x32xf32>
    %470 = arith.addf %465, %469 : vector<4x32xf32>
    %471 = math.tanh %470 : vector<4x32xf32>
    %cst_192 = arith.constant 1.000000e+00 : f32
    %472 = vector.broadcast %cst_192 : f32 to vector<4x32xf32>
    %473 = arith.subf %472, %464 : vector<4x32xf32>
    %474 = arith.mulf %473, %471 : vector<4x32xf32>
    %475 = arith.mulf %464, %447 : vector<4x32xf32>
    %476 = arith.addf %474, %475 : vector<4x32xf32>
    %477 = arith.index_cast %443 : i32 to index
    %c0_193 = arith.constant 0 : index
    %c0_194 = arith.constant 0 : index
    %478 = vector.load %arg13[%477, %c0_193, %c0_194] : memref<8x4x1xf32, #tpu.memory_space<vmem>>, vector<1x4x1xf32>
    %479 = vector.shape_cast %478 : vector<1x4x1xf32> to vector<4x1xf32>
    %480 = vector.broadcast %479 : vector<4x1xf32> to vector<4x32xf32>
    %481 = arith.mulf %480, %476 : vector<4x32xf32>
    %cst_195 = arith.constant 1.000000e+00 : f32
    %482 = vector.broadcast %cst_195 : f32 to vector<4x1xf32>
    %483 = arith.subf %482, %479 : vector<4x1xf32>
    %484 = vector.broadcast %483 : vector<4x1xf32> to vector<4x32xf32>
    %485 = arith.mulf %484, %447 : vector<4x32xf32>
    %486 = arith.addf %481, %485 : vector<4x32xf32>
    %c0_196 = arith.constant 0 : index
    %c0_197 = arith.constant 0 : index
    %487 = vector.load %arg12[%c0_196, %c0_197] : memref<4x32xf32, #tpu.memory_space<vmem>>, vector<4x32xf32>
    tpu.vector_store %arg12[%c0_196, %c0_197], %486 {strides = array<i32>} : memref<4x32xf32, #tpu.memory_space<vmem>>, vector<4x32xf32>,
    %488 = arith.index_cast %443 : i32 to index
    %c0_198 = arith.constant 0 : index
    %c0_199 = arith.constant 0 : index
    %489 = vector.load %arg10[%488, %c0_198, %c0_199] : memref<8x4x32xf32, #tpu.memory_space<vmem>>, vector<1x4x32xf32>
    %490 = vector.shape_cast %489 : vector<1x4x32xf32> to vector<4x32xf32>
    %491 = vector.shape_cast %476 : vector<4x32xf32> to vector<1x4x32xf32>
    tpu.vector_store %arg10[%488, %c0_198, %c0_199], %491 {strides = array<i32>} : memref<8x4x32xf32, #tpu.memory_space<vmem>>, vector<1x4x32xf32>,
    %c1_i32_200 = arith.constant 1 : i32
    %c1_i32_201 = arith.constant 1 : i32
    %492 = arith.muli %c1_i32_200, %c1_i32_201 : i32
    %c0_i32_202 = arith.constant 0 : i32
    %493 = arith.addi %c0_i32_202, %492 : i32
    %494 = arith.index_cast %493 : i32 to index
    %c0_203 = arith.constant 0 : index
    %c0_204 = arith.constant 0 : index
    %495 = vector.load %arg11[%494, %c0_203, %c0_204] : memref<8x4x96xf32, #tpu.memory_space<vmem>>, vector<1x4x96xf32>
    %496 = vector.shape_cast %495 : vector<1x4x96xf32> to vector<4x96xf32>
    %c0_205 = arith.constant 0 : index
    %c0_206 = arith.constant 0 : index
    %497 = vector.load %arg12[%c0_205, %c0_206] : memref<4x32xf32, #tpu.memory_space<vmem>>, vector<4x32xf32>
    %cst_207 = arith.constant dense<0.000000e+00> : vector<4x96xf32>
    %498 = tpu.matmul %497, %437, %cst_207 {dimension_numbers = #tpu.dot_dimension_numbers<[1], [0], [0], [1], [0, 0, 1, 1], [], []>} : vector<4x32xf32>, vector<32x96xf32>, vector<4x96xf32> -> vector<4x96xf32>
    %499 = vector.extract_strided_slice %496 {offsets = [0, 0], sizes = [4, 32], strides = [1, 1]} : vector<4x96xf32> to vector<4x32xf32>
    %500 = vector.extract_strided_slice %498 {offsets = [0, 0], sizes = [4, 32], strides = [1, 1]} : vector<4x96xf32> to vector<4x32xf32>
    %501 = arith.addf %499, %500 : vector<4x32xf32>
    %502 = arith.negf %501 : vector<4x32xf32>
    %503 = math.exp %502 : vector<4x32xf32>
    %cst_208 = arith.constant 1.000000e+00 : f32
    %504 = vector.broadcast %cst_208 : f32 to vector<4x32xf32>
    %505 = arith.addf %504, %503 : vector<4x32xf32>
    %506 = arith.divf %504, %505 : vector<4x32xf32>
    %507 = vector.extract_strided_slice %496 {offsets = [0, 32], sizes = [4, 32], strides = [1, 1]} : vector<4x96xf32> to vector<4x32xf32>
    %508 = vector.extract_strided_slice %498 {offsets = [0, 32], sizes = [4, 32], strides = [1, 1]} : vector<4x96xf32> to vector<4x32xf32>
    %509 = arith.addf %507, %508 : vector<4x32xf32>
    %510 = arith.negf %509 : vector<4x32xf32>
    %511 = math.exp %510 : vector<4x32xf32>
    %cst_209 = arith.constant 1.000000e+00 : f32
    %512 = vector.broadcast %cst_209 : f32 to vector<4x32xf32>
    %513 = arith.addf %512, %511 : vector<4x32xf32>
    %514 = arith.divf %512, %513 : vector<4x32xf32>
    %515 = vector.extract_strided_slice %496 {offsets = [0, 64], sizes = [4, 32], strides = [1, 1]} : vector<4x96xf32> to vector<4x32xf32>
    %516 = vector.extract_strided_slice %498 {offsets = [0, 64], sizes = [4, 32], strides = [1, 1]} : vector<4x96xf32> to vector<4x32xf32>
    %517 = vector.broadcast %439 : vector<1x32xf32> to vector<4x32xf32>
    %518 = arith.addf %516, %517 : vector<4x32xf32>
    %519 = arith.mulf %506, %518 : vector<4x32xf32>
    %520 = arith.addf %515, %519 : vector<4x32xf32>
    %521 = math.tanh %520 : vector<4x32xf32>
    %cst_210 = arith.constant 1.000000e+00 : f32
    %522 = vector.broadcast %cst_210 : f32 to vector<4x32xf32>
    %523 = arith.subf %522, %514 : vector<4x32xf32>
    %524 = arith.mulf %523, %521 : vector<4x32xf32>
    %525 = arith.mulf %514, %497 : vector<4x32xf32>
    %526 = arith.addf %524, %525 : vector<4x32xf32>
    %527 = arith.index_cast %493 : i32 to index
    %c0_211 = arith.constant 0 : index
    %c0_212 = arith.constant 0 : index
    %528 = vector.load %arg13[%527, %c0_211, %c0_212] : memref<8x4x1xf32, #tpu.memory_space<vmem>>, vector<1x4x1xf32>
    %529 = vector.shape_cast %528 : vector<1x4x1xf32> to vector<4x1xf32>
    %530 = vector.broadcast %529 : vector<4x1xf32> to vector<4x32xf32>
    %531 = arith.mulf %530, %526 : vector<4x32xf32>
    %cst_213 = arith.constant 1.000000e+00 : f32
    %532 = vector.broadcast %cst_213 : f32 to vector<4x1xf32>
    %533 = arith.subf %532, %529 : vector<4x1xf32>
    %534 = vector.broadcast %533 : vector<4x1xf32> to vector<4x32xf32>
    %535 = arith.mulf %534, %497 : vector<4x32xf32>
    %536 = arith.addf %531, %535 : vector<4x32xf32>
    %c0_214 = arith.constant 0 : index
    %c0_215 = arith.constant 0 : index
    %537 = vector.load %arg12[%c0_214, %c0_215] : memref<4x32xf32, #tpu.memory_space<vmem>>, vector<4x32xf32>
    tpu.vector_store %arg12[%c0_214, %c0_215], %536 {strides = array<i32>} : memref<4x32xf32, #tpu.memory_space<vmem>>, vector<4x32xf32>,
    %538 = arith.index_cast %493 : i32 to index
    %c0_216 = arith.constant 0 : index
    %c0_217 = arith.constant 0 : index
    %539 = vector.load %arg10[%538, %c0_216, %c0_217] : memref<8x4x32xf32, #tpu.memory_space<vmem>>, vector<1x4x32xf32>
    %540 = vector.shape_cast %539 : vector<1x4x32xf32> to vector<4x32xf32>
    %541 = vector.shape_cast %526 : vector<4x32xf32> to vector<1x4x32xf32>
    tpu.vector_store %arg10[%538, %c0_216, %c0_217], %541 {strides = array<i32>} : memref<8x4x32xf32, #tpu.memory_space<vmem>>, vector<1x4x32xf32>,
    %c2_i32_218 = arith.constant 2 : i32
    %c1_i32_219 = arith.constant 1 : i32
    %542 = arith.muli %c2_i32_218, %c1_i32_219 : i32
    %c0_i32_220 = arith.constant 0 : i32
    %543 = arith.addi %c0_i32_220, %542 : i32
    %544 = arith.index_cast %543 : i32 to index
    %c0_221 = arith.constant 0 : index
    %c0_222 = arith.constant 0 : index
    %545 = vector.load %arg11[%544, %c0_221, %c0_222] : memref<8x4x96xf32, #tpu.memory_space<vmem>>, vector<1x4x96xf32>
    %546 = vector.shape_cast %545 : vector<1x4x96xf32> to vector<4x96xf32>
    %c0_223 = arith.constant 0 : index
    %c0_224 = arith.constant 0 : index
    %547 = vector.load %arg12[%c0_223, %c0_224] : memref<4x32xf32, #tpu.memory_space<vmem>>, vector<4x32xf32>
    %cst_225 = arith.constant dense<0.000000e+00> : vector<4x96xf32>
    %548 = tpu.matmul %547, %437, %cst_225 {dimension_numbers = #tpu.dot_dimension_numbers<[1], [0], [0], [1], [0, 0, 1, 1], [], []>} : vector<4x32xf32>, vector<32x96xf32>, vector<4x96xf32> -> vector<4x96xf32>
    %549 = vector.extract_strided_slice %546 {offsets = [0, 0], sizes = [4, 32], strides = [1, 1]} : vector<4x96xf32> to vector<4x32xf32>
    %550 = vector.extract_strided_slice %548 {offsets = [0, 0], sizes = [4, 32], strides = [1, 1]} : vector<4x96xf32> to vector<4x32xf32>
    %551 = arith.addf %549, %550 : vector<4x32xf32>
    %552 = arith.negf %551 : vector<4x32xf32>
    %553 = math.exp %552 : vector<4x32xf32>
    %cst_226 = arith.constant 1.000000e+00 : f32
    %554 = vector.broadcast %cst_226 : f32 to vector<4x32xf32>
    %555 = arith.addf %554, %553 : vector<4x32xf32>
    %556 = arith.divf %554, %555 : vector<4x32xf32>
    %557 = vector.extract_strided_slice %546 {offsets = [0, 32], sizes = [4, 32], strides = [1, 1]} : vector<4x96xf32> to vector<4x32xf32>
    %558 = vector.extract_strided_slice %548 {offsets = [0, 32], sizes = [4, 32], strides = [1, 1]} : vector<4x96xf32> to vector<4x32xf32>
    %559 = arith.addf %557, %558 : vector<4x32xf32>
    %560 = arith.negf %559 : vector<4x32xf32>
    %561 = math.exp %560 : vector<4x32xf32>
    %cst_227 = arith.constant 1.000000e+00 : f32
    %562 = vector.broadcast %cst_227 : f32 to vector<4x32xf32>
    %563 = arith.addf %562, %561 : vector<4x32xf32>
    %564 = arith.divf %562, %563 : vector<4x32xf32>
    %565 = vector.extract_strided_slice %546 {offsets = [0, 64], sizes = [4, 32], strides = [1, 1]} : vector<4x96xf32> to vector<4x32xf32>
    %566 = vector.extract_strided_slice %548 {offsets = [0, 64], sizes = [4, 32], strides = [1, 1]} : vector<4x96xf32> to vector<4x32xf32>
    %567 = vector.broadcast %439 : vector<1x32xf32> to vector<4x32xf32>
    %568 = arith.addf %566, %567 : vector<4x32xf32>
    %569 = arith.mulf %556, %568 : vector<4x32xf32>
    %570 = arith.addf %565, %569 : vector<4x32xf32>
    %571 = math.tanh %570 : vector<4x32xf32>
    %cst_228 = arith.constant 1.000000e+00 : f32
    %572 = vector.broadcast %cst_228 : f32 to vector<4x32xf32>
    %573 = arith.subf %572, %564 : vector<4x32xf32>
    %574 = arith.mulf %573, %571 : vector<4x32xf32>
    %575 = arith.mulf %564, %547 : vector<4x32xf32>
    %576 = arith.addf %574, %575 : vector<4x32xf32>
    %577 = arith.index_cast %543 : i32 to index
    %c0_229 = arith.constant 0 : index
    %c0_230 = arith.constant 0 : index
    %578 = vector.load %arg13[%577, %c0_229, %c0_230] : memref<8x4x1xf32, #tpu.memory_space<vmem>>, vector<1x4x1xf32>
    %579 = vector.shape_cast %578 : vector<1x4x1xf32> to vector<4x1xf32>
    %580 = vector.broadcast %579 : vector<4x1xf32> to vector<4x32xf32>
    %581 = arith.mulf %580, %576 : vector<4x32xf32>
    %cst_231 = arith.constant 1.000000e+00 : f32
    %582 = vector.broadcast %cst_231 : f32 to vector<4x1xf32>
    %583 = arith.subf %582, %579 : vector<4x1xf32>
    %584 = vector.broadcast %583 : vector<4x1xf32> to vector<4x32xf32>
    %585 = arith.mulf %584, %547 : vector<4x32xf32>
    %586 = arith.addf %581, %585 : vector<4x32xf32>
    %c0_232 = arith.constant 0 : index
    %c0_233 = arith.constant 0 : index
    %587 = vector.load %arg12[%c0_232, %c0_233] : memref<4x32xf32, #tpu.memory_space<vmem>>, vector<4x32xf32>
    tpu.vector_store %arg12[%c0_232, %c0_233], %586 {strides = array<i32>} : memref<4x32xf32, #tpu.memory_space<vmem>>, vector<4x32xf32>,
    %588 = arith.index_cast %543 : i32 to index
    %c0_234 = arith.constant 0 : index
    %c0_235 = arith.constant 0 : index
    %589 = vector.load %arg10[%588, %c0_234, %c0_235] : memref<8x4x32xf32, #tpu.memory_space<vmem>>, vector<1x4x32xf32>
    %590 = vector.shape_cast %589 : vector<1x4x32xf32> to vector<4x32xf32>
    %591 = vector.shape_cast %576 : vector<4x32xf32> to vector<1x4x32xf32>
    tpu.vector_store %arg10[%588, %c0_234, %c0_235], %591 {strides = array<i32>} : memref<8x4x32xf32, #tpu.memory_space<vmem>>, vector<1x4x32xf32>,
    %c3_i32_236 = arith.constant 3 : i32
    %c1_i32_237 = arith.constant 1 : i32
    %592 = arith.muli %c3_i32_236, %c1_i32_237 : i32
    %c0_i32_238 = arith.constant 0 : i32
    %593 = arith.addi %c0_i32_238, %592 : i32
    %594 = arith.index_cast %593 : i32 to index
    %c0_239 = arith.constant 0 : index
    %c0_240 = arith.constant 0 : index
    %595 = vector.load %arg11[%594, %c0_239, %c0_240] : memref<8x4x96xf32, #tpu.memory_space<vmem>>, vector<1x4x96xf32>
    %596 = vector.shape_cast %595 : vector<1x4x96xf32> to vector<4x96xf32>
    %c0_241 = arith.constant 0 : index
    %c0_242 = arith.constant 0 : index
    %597 = vector.load %arg12[%c0_241, %c0_242] : memref<4x32xf32, #tpu.memory_space<vmem>>, vector<4x32xf32>
    %cst_243 = arith.constant dense<0.000000e+00> : vector<4x96xf32>
    %598 = tpu.matmul %597, %437, %cst_243 {dimension_numbers = #tpu.dot_dimension_numbers<[1], [0], [0], [1], [0, 0, 1, 1], [], []>} : vector<4x32xf32>, vector<32x96xf32>, vector<4x96xf32> -> vector<4x96xf32>
    %599 = vector.extract_strided_slice %596 {offsets = [0, 0], sizes = [4, 32], strides = [1, 1]} : vector<4x96xf32> to vector<4x32xf32>
    %600 = vector.extract_strided_slice %598 {offsets = [0, 0], sizes = [4, 32], strides = [1, 1]} : vector<4x96xf32> to vector<4x32xf32>
    %601 = arith.addf %599, %600 : vector<4x32xf32>
    %602 = arith.negf %601 : vector<4x32xf32>
    %603 = math.exp %602 : vector<4x32xf32>
    %cst_244 = arith.constant 1.000000e+00 : f32
    %604 = vector.broadcast %cst_244 : f32 to vector<4x32xf32>
    %605 = arith.addf %604, %603 : vector<4x32xf32>
    %606 = arith.divf %604, %605 : vector<4x32xf32>
    %607 = vector.extract_strided_slice %596 {offsets = [0, 32], sizes = [4, 32], strides = [1, 1]} : vector<4x96xf32> to vector<4x32xf32>
    %608 = vector.extract_strided_slice %598 {offsets = [0, 32], sizes = [4, 32], strides = [1, 1]} : vector<4x96xf32> to vector<4x32xf32>
    %609 = arith.addf %607, %608 : vector<4x32xf32>
    %610 = arith.negf %609 : vector<4x32xf32>
    %611 = math.exp %610 : vector<4x32xf32>
    %cst_245 = arith.constant 1.000000e+00 : f32
    %612 = vector.broadcast %cst_245 : f32 to vector<4x32xf32>
    %613 = arith.addf %612, %611 : vector<4x32xf32>
    %614 = arith.divf %612, %613 : vector<4x32xf32>
    %615 = vector.extract_strided_slice %596 {offsets = [0, 64], sizes = [4, 32], strides = [1, 1]} : vector<4x96xf32> to vector<4x32xf32>
    %616 = vector.extract_strided_slice %598 {offsets = [0, 64], sizes = [4, 32], strides = [1, 1]} : vector<4x96xf32> to vector<4x32xf32>
    %617 = vector.broadcast %439 : vector<1x32xf32> to vector<4x32xf32>
    %618 = arith.addf %616, %617 : vector<4x32xf32>
    %619 = arith.mulf %606, %618 : vector<4x32xf32>
    %620 = arith.addf %615, %619 : vector<4x32xf32>
    %621 = math.tanh %620 : vector<4x32xf32>
    %cst_246 = arith.constant 1.000000e+00 : f32
    %622 = vector.broadcast %cst_246 : f32 to vector<4x32xf32>
    %623 = arith.subf %622, %614 : vector<4x32xf32>
    %624 = arith.mulf %623, %621 : vector<4x32xf32>
    %625 = arith.mulf %614, %597 : vector<4x32xf32>
    %626 = arith.addf %624, %625 : vector<4x32xf32>
    %627 = arith.index_cast %593 : i32 to index
    %c0_247 = arith.constant 0 : index
    %c0_248 = arith.constant 0 : index
    %628 = vector.load %arg13[%627, %c0_247, %c0_248] : memref<8x4x1xf32, #tpu.memory_space<vmem>>, vector<1x4x1xf32>
    %629 = vector.shape_cast %628 : vector<1x4x1xf32> to vector<4x1xf32>
    %630 = vector.broadcast %629 : vector<4x1xf32> to vector<4x32xf32>
    %631 = arith.mulf %630, %626 : vector<4x32xf32>
    %cst_249 = arith.constant 1.000000e+00 : f32
    %632 = vector.broadcast %cst_249 : f32 to vector<4x1xf32>
    %633 = arith.subf %632, %629 : vector<4x1xf32>
    %634 = vector.broadcast %633 : vector<4x1xf32> to vector<4x32xf32>
    %635 = arith.mulf %634, %597 : vector<4x32xf32>
    %636 = arith.addf %631, %635 : vector<4x32xf32>
    %c0_250 = arith.constant 0 : index
    %c0_251 = arith.constant 0 : index
    %637 = vector.load %arg12[%c0_250, %c0_251] : memref<4x32xf32, #tpu.memory_space<vmem>>, vector<4x32xf32>
    tpu.vector_store %arg12[%c0_250, %c0_251], %636 {strides = array<i32>} : memref<4x32xf32, #tpu.memory_space<vmem>>, vector<4x32xf32>,
    %638 = arith.index_cast %593 : i32 to index
    %c0_252 = arith.constant 0 : index
    %c0_253 = arith.constant 0 : index
    %639 = vector.load %arg10[%638, %c0_252, %c0_253] : memref<8x4x32xf32, #tpu.memory_space<vmem>>, vector<1x4x32xf32>
    %640 = vector.shape_cast %639 : vector<1x4x32xf32> to vector<4x32xf32>
    %641 = vector.shape_cast %626 : vector<4x32xf32> to vector<1x4x32xf32>
    tpu.vector_store %arg10[%638, %c0_252, %c0_253], %641 {strides = array<i32>} : memref<8x4x32xf32, #tpu.memory_space<vmem>>, vector<1x4x32xf32>,
    %c4_i32_254 = arith.constant 4 : i32
    %c1_i32_255 = arith.constant 1 : i32
    %642 = arith.muli %c4_i32_254, %c1_i32_255 : i32
    %c0_i32_256 = arith.constant 0 : i32
    %643 = arith.addi %c0_i32_256, %642 : i32
    %644 = arith.index_cast %643 : i32 to index
    %c0_257 = arith.constant 0 : index
    %c0_258 = arith.constant 0 : index
    %645 = vector.load %arg11[%644, %c0_257, %c0_258] : memref<8x4x96xf32, #tpu.memory_space<vmem>>, vector<1x4x96xf32>
    %646 = vector.shape_cast %645 : vector<1x4x96xf32> to vector<4x96xf32>
    %c0_259 = arith.constant 0 : index
    %c0_260 = arith.constant 0 : index
    %647 = vector.load %arg12[%c0_259, %c0_260] : memref<4x32xf32, #tpu.memory_space<vmem>>, vector<4x32xf32>
    %cst_261 = arith.constant dense<0.000000e+00> : vector<4x96xf32>
    %648 = tpu.matmul %647, %437, %cst_261 {dimension_numbers = #tpu.dot_dimension_numbers<[1], [0], [0], [1], [0, 0, 1, 1], [], []>} : vector<4x32xf32>, vector<32x96xf32>, vector<4x96xf32> -> vector<4x96xf32>
    %649 = vector.extract_strided_slice %646 {offsets = [0, 0], sizes = [4, 32], strides = [1, 1]} : vector<4x96xf32> to vector<4x32xf32>
    %650 = vector.extract_strided_slice %648 {offsets = [0, 0], sizes = [4, 32], strides = [1, 1]} : vector<4x96xf32> to vector<4x32xf32>
    %651 = arith.addf %649, %650 : vector<4x32xf32>
    %652 = arith.negf %651 : vector<4x32xf32>
    %653 = math.exp %652 : vector<4x32xf32>
    %cst_262 = arith.constant 1.000000e+00 : f32
    %654 = vector.broadcast %cst_262 : f32 to vector<4x32xf32>
    %655 = arith.addf %654, %653 : vector<4x32xf32>
    %656 = arith.divf %654, %655 : vector<4x32xf32>
    %657 = vector.extract_strided_slice %646 {offsets = [0, 32], sizes = [4, 32], strides = [1, 1]} : vector<4x96xf32> to vector<4x32xf32>
    %658 = vector.extract_strided_slice %648 {offsets = [0, 32], sizes = [4, 32], strides = [1, 1]} : vector<4x96xf32> to vector<4x32xf32>
    %659 = arith.addf %657, %658 : vector<4x32xf32>
    %660 = arith.negf %659 : vector<4x32xf32>
    %661 = math.exp %660 : vector<4x32xf32>
    %cst_263 = arith.constant 1.000000e+00 : f32
    %662 = vector.broadcast %cst_263 : f32 to vector<4x32xf32>
    %663 = arith.addf %662, %661 : vector<4x32xf32>
    %664 = arith.divf %662, %663 : vector<4x32xf32>
    %665 = vector.extract_strided_slice %646 {offsets = [0, 64], sizes = [4, 32], strides = [1, 1]} : vector<4x96xf32> to vector<4x32xf32>
    %666 = vector.extract_strided_slice %648 {offsets = [0, 64], sizes = [4, 32], strides = [1, 1]} : vector<4x96xf32> to vector<4x32xf32>
    %667 = vector.broadcast %439 : vector<1x32xf32> to vector<4x32xf32>
    %668 = arith.addf %666, %667 : vector<4x32xf32>
    %669 = arith.mulf %656, %668 : vector<4x32xf32>
    %670 = arith.addf %665, %669 : vector<4x32xf32>
    %671 = math.tanh %670 : vector<4x32xf32>
    %cst_264 = arith.constant 1.000000e+00 : f32
    %672 = vector.broadcast %cst_264 : f32 to vector<4x32xf32>
    %673 = arith.subf %672, %664 : vector<4x32xf32>
    %674 = arith.mulf %673, %671 : vector<4x32xf32>
    %675 = arith.mulf %664, %647 : vector<4x32xf32>
    %676 = arith.addf %674, %675 : vector<4x32xf32>
    %677 = arith.index_cast %643 : i32 to index
    %c0_265 = arith.constant 0 : index
    %c0_266 = arith.constant 0 : index
    %678 = vector.load %arg13[%677, %c0_265, %c0_266] : memref<8x4x1xf32, #tpu.memory_space<vmem>>, vector<1x4x1xf32>
    %679 = vector.shape_cast %678 : vector<1x4x1xf32> to vector<4x1xf32>
    %680 = vector.broadcast %679 : vector<4x1xf32> to vector<4x32xf32>
    %681 = arith.mulf %680, %676 : vector<4x32xf32>
    %cst_267 = arith.constant 1.000000e+00 : f32
    %682 = vector.broadcast %cst_267 : f32 to vector<4x1xf32>
    %683 = arith.subf %682, %679 : vector<4x1xf32>
    %684 = vector.broadcast %683 : vector<4x1xf32> to vector<4x32xf32>
    %685 = arith.mulf %684, %647 : vector<4x32xf32>
    %686 = arith.addf %681, %685 : vector<4x32xf32>
    %c0_268 = arith.constant 0 : index
    %c0_269 = arith.constant 0 : index
    %687 = vector.load %arg12[%c0_268, %c0_269] : memref<4x32xf32, #tpu.memory_space<vmem>>, vector<4x32xf32>
    tpu.vector_store %arg12[%c0_268, %c0_269], %686 {strides = array<i32>} : memref<4x32xf32, #tpu.memory_space<vmem>>, vector<4x32xf32>,
    %688 = arith.index_cast %643 : i32 to index
    %c0_270 = arith.constant 0 : index
    %c0_271 = arith.constant 0 : index
    %689 = vector.load %arg10[%688, %c0_270, %c0_271] : memref<8x4x32xf32, #tpu.memory_space<vmem>>, vector<1x4x32xf32>
    %690 = vector.shape_cast %689 : vector<1x4x32xf32> to vector<4x32xf32>
    %691 = vector.shape_cast %676 : vector<4x32xf32> to vector<1x4x32xf32>
    tpu.vector_store %arg10[%688, %c0_270, %c0_271], %691 {strides = array<i32>} : memref<8x4x32xf32, #tpu.memory_space<vmem>>, vector<1x4x32xf32>,
    %c5_i32_272 = arith.constant 5 : i32
    %c1_i32_273 = arith.constant 1 : i32
    %692 = arith.muli %c5_i32_272, %c1_i32_273 : i32
    %c0_i32_274 = arith.constant 0 : i32
    %693 = arith.addi %c0_i32_274, %692 : i32
    %694 = arith.index_cast %693 : i32 to index
    %c0_275 = arith.constant 0 : index
    %c0_276 = arith.constant 0 : index
    %695 = vector.load %arg11[%694, %c0_275, %c0_276] : memref<8x4x96xf32, #tpu.memory_space<vmem>>, vector<1x4x96xf32>
    %696 = vector.shape_cast %695 : vector<1x4x96xf32> to vector<4x96xf32>
    %c0_277 = arith.constant 0 : index
    %c0_278 = arith.constant 0 : index
    %697 = vector.load %arg12[%c0_277, %c0_278] : memref<4x32xf32, #tpu.memory_space<vmem>>, vector<4x32xf32>
    %cst_279 = arith.constant dense<0.000000e+00> : vector<4x96xf32>
    %698 = tpu.matmul %697, %437, %cst_279 {dimension_numbers = #tpu.dot_dimension_numbers<[1], [0], [0], [1], [0, 0, 1, 1], [], []>} : vector<4x32xf32>, vector<32x96xf32>, vector<4x96xf32> -> vector<4x96xf32>
    %699 = vector.extract_strided_slice %696 {offsets = [0, 0], sizes = [4, 32], strides = [1, 1]} : vector<4x96xf32> to vector<4x32xf32>
    %700 = vector.extract_strided_slice %698 {offsets = [0, 0], sizes = [4, 32], strides = [1, 1]} : vector<4x96xf32> to vector<4x32xf32>
    %701 = arith.addf %699, %700 : vector<4x32xf32>
    %702 = arith.negf %701 : vector<4x32xf32>
    %703 = math.exp %702 : vector<4x32xf32>
    %cst_280 = arith.constant 1.000000e+00 : f32
    %704 = vector.broadcast %cst_280 : f32 to vector<4x32xf32>
    %705 = arith.addf %704, %703 : vector<4x32xf32>
    %706 = arith.divf %704, %705 : vector<4x32xf32>
    %707 = vector.extract_strided_slice %696 {offsets = [0, 32], sizes = [4, 32], strides = [1, 1]} : vector<4x96xf32> to vector<4x32xf32>
    %708 = vector.extract_strided_slice %698 {offsets = [0, 32], sizes = [4, 32], strides = [1, 1]} : vector<4x96xf32> to vector<4x32xf32>
    %709 = arith.addf %707, %708 : vector<4x32xf32>
    %710 = arith.negf %709 : vector<4x32xf32>
    %711 = math.exp %710 : vector<4x32xf32>
    %cst_281 = arith.constant 1.000000e+00 : f32
    %712 = vector.broadcast %cst_281 : f32 to vector<4x32xf32>
    %713 = arith.addf %712, %711 : vector<4x32xf32>
    %714 = arith.divf %712, %713 : vector<4x32xf32>
    %715 = vector.extract_strided_slice %696 {offsets = [0, 64], sizes = [4, 32], strides = [1, 1]} : vector<4x96xf32> to vector<4x32xf32>
    %716 = vector.extract_strided_slice %698 {offsets = [0, 64], sizes = [4, 32], strides = [1, 1]} : vector<4x96xf32> to vector<4x32xf32>
    %717 = vector.broadcast %439 : vector<1x32xf32> to vector<4x32xf32>
    %718 = arith.addf %716, %717 : vector<4x32xf32>
    %719 = arith.mulf %706, %718 : vector<4x32xf32>
    %720 = arith.addf %715, %719 : vector<4x32xf32>
    %721 = math.tanh %720 : vector<4x32xf32>
    %cst_282 = arith.constant 1.000000e+00 : f32
    %722 = vector.broadcast %cst_282 : f32 to vector<4x32xf32>
    %723 = arith.subf %722, %714 : vector<4x32xf32>
    %724 = arith.mulf %723, %721 : vector<4x32xf32>
    %725 = arith.mulf %714, %697 : vector<4x32xf32>
    %726 = arith.addf %724, %725 : vector<4x32xf32>
    %727 = arith.index_cast %693 : i32 to index
    %c0_283 = arith.constant 0 : index
    %c0_284 = arith.constant 0 : index
    %728 = vector.load %arg13[%727, %c0_283, %c0_284] : memref<8x4x1xf32, #tpu.memory_space<vmem>>, vector<1x4x1xf32>
    %729 = vector.shape_cast %728 : vector<1x4x1xf32> to vector<4x1xf32>
    %730 = vector.broadcast %729 : vector<4x1xf32> to vector<4x32xf32>
    %731 = arith.mulf %730, %726 : vector<4x32xf32>
    %cst_285 = arith.constant 1.000000e+00 : f32
    %732 = vector.broadcast %cst_285 : f32 to vector<4x1xf32>
    %733 = arith.subf %732, %729 : vector<4x1xf32>
    %734 = vector.broadcast %733 : vector<4x1xf32> to vector<4x32xf32>
    %735 = arith.mulf %734, %697 : vector<4x32xf32>
    %736 = arith.addf %731, %735 : vector<4x32xf32>
    %c0_286 = arith.constant 0 : index
    %c0_287 = arith.constant 0 : index
    %737 = vector.load %arg12[%c0_286, %c0_287] : memref<4x32xf32, #tpu.memory_space<vmem>>, vector<4x32xf32>
    tpu.vector_store %arg12[%c0_286, %c0_287], %736 {strides = array<i32>} : memref<4x32xf32, #tpu.memory_space<vmem>>, vector<4x32xf32>,
    %738 = arith.index_cast %693 : i32 to index
    %c0_288 = arith.constant 0 : index
    %c0_289 = arith.constant 0 : index
    %739 = vector.load %arg10[%738, %c0_288, %c0_289] : memref<8x4x32xf32, #tpu.memory_space<vmem>>, vector<1x4x32xf32>
    %740 = vector.shape_cast %739 : vector<1x4x32xf32> to vector<4x32xf32>
    %741 = vector.shape_cast %726 : vector<4x32xf32> to vector<1x4x32xf32>
    tpu.vector_store %arg10[%738, %c0_288, %c0_289], %741 {strides = array<i32>} : memref<8x4x32xf32, #tpu.memory_space<vmem>>, vector<1x4x32xf32>,
    %c6_i32_290 = arith.constant 6 : i32
    %c1_i32_291 = arith.constant 1 : i32
    %742 = arith.muli %c6_i32_290, %c1_i32_291 : i32
    %c0_i32_292 = arith.constant 0 : i32
    %743 = arith.addi %c0_i32_292, %742 : i32
    %744 = arith.index_cast %743 : i32 to index
    %c0_293 = arith.constant 0 : index
    %c0_294 = arith.constant 0 : index
    %745 = vector.load %arg11[%744, %c0_293, %c0_294] : memref<8x4x96xf32, #tpu.memory_space<vmem>>, vector<1x4x96xf32>
    %746 = vector.shape_cast %745 : vector<1x4x96xf32> to vector<4x96xf32>
    %c0_295 = arith.constant 0 : index
    %c0_296 = arith.constant 0 : index
    %747 = vector.load %arg12[%c0_295, %c0_296] : memref<4x32xf32, #tpu.memory_space<vmem>>, vector<4x32xf32>
    %cst_297 = arith.constant dense<0.000000e+00> : vector<4x96xf32>
    %748 = tpu.matmul %747, %437, %cst_297 {dimension_numbers = #tpu.dot_dimension_numbers<[1], [0], [0], [1], [0, 0, 1, 1], [], []>} : vector<4x32xf32>, vector<32x96xf32>, vector<4x96xf32> -> vector<4x96xf32>
    %749 = vector.extract_strided_slice %746 {offsets = [0, 0], sizes = [4, 32], strides = [1, 1]} : vector<4x96xf32> to vector<4x32xf32>
    %750 = vector.extract_strided_slice %748 {offsets = [0, 0], sizes = [4, 32], strides = [1, 1]} : vector<4x96xf32> to vector<4x32xf32>
    %751 = arith.addf %749, %750 : vector<4x32xf32>
    %752 = arith.negf %751 : vector<4x32xf32>
    %753 = math.exp %752 : vector<4x32xf32>
    %cst_298 = arith.constant 1.000000e+00 : f32
    %754 = vector.broadcast %cst_298 : f32 to vector<4x32xf32>
    %755 = arith.addf %754, %753 : vector<4x32xf32>
    %756 = arith.divf %754, %755 : vector<4x32xf32>
    %757 = vector.extract_strided_slice %746 {offsets = [0, 32], sizes = [4, 32], strides = [1, 1]} : vector<4x96xf32> to vector<4x32xf32>
    %758 = vector.extract_strided_slice %748 {offsets = [0, 32], sizes = [4, 32], strides = [1, 1]} : vector<4x96xf32> to vector<4x32xf32>
    %759 = arith.addf %757, %758 : vector<4x32xf32>
    %760 = arith.negf %759 : vector<4x32xf32>
    %761 = math.exp %760 : vector<4x32xf32>
    %cst_299 = arith.constant 1.000000e+00 : f32
    %762 = vector.broadcast %cst_299 : f32 to vector<4x32xf32>
    %763 = arith.addf %762, %761 : vector<4x32xf32>
    %764 = arith.divf %762, %763 : vector<4x32xf32>
    %765 = vector.extract_strided_slice %746 {offsets = [0, 64], sizes = [4, 32], strides = [1, 1]} : vector<4x96xf32> to vector<4x32xf32>
    %766 = vector.extract_strided_slice %748 {offsets = [0, 64], sizes = [4, 32], strides = [1, 1]} : vector<4x96xf32> to vector<4x32xf32>
    %767 = vector.broadcast %439 : vector<1x32xf32> to vector<4x32xf32>
    %768 = arith.addf %766, %767 : vector<4x32xf32>
    %769 = arith.mulf %756, %768 : vector<4x32xf32>
    %770 = arith.addf %765, %769 : vector<4x32xf32>
    %771 = math.tanh %770 : vector<4x32xf32>
    %cst_300 = arith.constant 1.000000e+00 : f32
    %772 = vector.broadcast %cst_300 : f32 to vector<4x32xf32>
    %773 = arith.subf %772, %764 : vector<4x32xf32>
    %774 = arith.mulf %773, %771 : vector<4x32xf32>
    %775 = arith.mulf %764, %747 : vector<4x32xf32>
    %776 = arith.addf %774, %775 : vector<4x32xf32>
    %777 = arith.index_cast %743 : i32 to index
    %c0_301 = arith.constant 0 : index
    %c0_302 = arith.constant 0 : index
    %778 = vector.load %arg13[%777, %c0_301, %c0_302] : memref<8x4x1xf32, #tpu.memory_space<vmem>>, vector<1x4x1xf32>
    %779 = vector.shape_cast %778 : vector<1x4x1xf32> to vector<4x1xf32>
    %780 = vector.broadcast %779 : vector<4x1xf32> to vector<4x32xf32>
    %781 = arith.mulf %780, %776 : vector<4x32xf32>
    %cst_303 = arith.constant 1.000000e+00 : f32
    %782 = vector.broadcast %cst_303 : f32 to vector<4x1xf32>
    %783 = arith.subf %782, %779 : vector<4x1xf32>
    %784 = vector.broadcast %783 : vector<4x1xf32> to vector<4x32xf32>
    %785 = arith.mulf %784, %747 : vector<4x32xf32>
    %786 = arith.addf %781, %785 : vector<4x32xf32>
    %c0_304 = arith.constant 0 : index
    %c0_305 = arith.constant 0 : index
    %787 = vector.load %arg12[%c0_304, %c0_305] : memref<4x32xf32, #tpu.memory_space<vmem>>, vector<4x32xf32>
    tpu.vector_store %arg12[%c0_304, %c0_305], %786 {strides = array<i32>} : memref<4x32xf32, #tpu.memory_space<vmem>>, vector<4x32xf32>,
    %788 = arith.index_cast %743 : i32 to index
    %c0_306 = arith.constant 0 : index
    %c0_307 = arith.constant 0 : index
    %789 = vector.load %arg10[%788, %c0_306, %c0_307] : memref<8x4x32xf32, #tpu.memory_space<vmem>>, vector<1x4x32xf32>
    %790 = vector.shape_cast %789 : vector<1x4x32xf32> to vector<4x32xf32>
    %791 = vector.shape_cast %776 : vector<4x32xf32> to vector<1x4x32xf32>
    tpu.vector_store %arg10[%788, %c0_306, %c0_307], %791 {strides = array<i32>} : memref<8x4x32xf32, #tpu.memory_space<vmem>>, vector<1x4x32xf32>,
    %c7_i32_308 = arith.constant 7 : i32
    %c1_i32_309 = arith.constant 1 : i32
    %792 = arith.muli %c7_i32_308, %c1_i32_309 : i32
    %c0_i32_310 = arith.constant 0 : i32
    %793 = arith.addi %c0_i32_310, %792 : i32
    %794 = arith.index_cast %793 : i32 to index
    %c0_311 = arith.constant 0 : index
    %c0_312 = arith.constant 0 : index
    %795 = vector.load %arg11[%794, %c0_311, %c0_312] : memref<8x4x96xf32, #tpu.memory_space<vmem>>, vector<1x4x96xf32>
    %796 = vector.shape_cast %795 : vector<1x4x96xf32> to vector<4x96xf32>
    %c0_313 = arith.constant 0 : index
    %c0_314 = arith.constant 0 : index
    %797 = vector.load %arg12[%c0_313, %c0_314] : memref<4x32xf32, #tpu.memory_space<vmem>>, vector<4x32xf32>
    %cst_315 = arith.constant dense<0.000000e+00> : vector<4x96xf32>
    %798 = tpu.matmul %797, %437, %cst_315 {dimension_numbers = #tpu.dot_dimension_numbers<[1], [0], [0], [1], [0, 0, 1, 1], [], []>} : vector<4x32xf32>, vector<32x96xf32>, vector<4x96xf32> -> vector<4x96xf32>
    %799 = vector.extract_strided_slice %796 {offsets = [0, 0], sizes = [4, 32], strides = [1, 1]} : vector<4x96xf32> to vector<4x32xf32>
    %800 = vector.extract_strided_slice %798 {offsets = [0, 0], sizes = [4, 32], strides = [1, 1]} : vector<4x96xf32> to vector<4x32xf32>
    %801 = arith.addf %799, %800 : vector<4x32xf32>
    %802 = arith.negf %801 : vector<4x32xf32>
    %803 = math.exp %802 : vector<4x32xf32>
    %cst_316 = arith.constant 1.000000e+00 : f32
    %804 = vector.broadcast %cst_316 : f32 to vector<4x32xf32>
    %805 = arith.addf %804, %803 : vector<4x32xf32>
    %806 = arith.divf %804, %805 : vector<4x32xf32>
    %807 = vector.extract_strided_slice %796 {offsets = [0, 32], sizes = [4, 32], strides = [1, 1]} : vector<4x96xf32> to vector<4x32xf32>
    %808 = vector.extract_strided_slice %798 {offsets = [0, 32], sizes = [4, 32], strides = [1, 1]} : vector<4x96xf32> to vector<4x32xf32>
    %809 = arith.addf %807, %808 : vector<4x32xf32>
    %810 = arith.negf %809 : vector<4x32xf32>
    %811 = math.exp %810 : vector<4x32xf32>
    %cst_317 = arith.constant 1.000000e+00 : f32
    %812 = vector.broadcast %cst_317 : f32 to vector<4x32xf32>
    %813 = arith.addf %812, %811 : vector<4x32xf32>
    %814 = arith.divf %812, %813 : vector<4x32xf32>
    %815 = vector.extract_strided_slice %796 {offsets = [0, 64], sizes = [4, 32], strides = [1, 1]} : vector<4x96xf32> to vector<4x32xf32>
    %816 = vector.extract_strided_slice %798 {offsets = [0, 64], sizes = [4, 32], strides = [1, 1]} : vector<4x96xf32> to vector<4x32xf32>
    %817 = vector.broadcast %439 : vector<1x32xf32> to vector<4x32xf32>
    %818 = arith.addf %816, %817 : vector<4x32xf32>
    %819 = arith.mulf %806, %818 : vector<4x32xf32>
    %820 = arith.addf %815, %819 : vector<4x32xf32>
    %821 = math.tanh %820 : vector<4x32xf32>
    %cst_318 = arith.constant 1.000000e+00 : f32
    %822 = vector.broadcast %cst_318 : f32 to vector<4x32xf32>
    %823 = arith.subf %822, %814 : vector<4x32xf32>
    %824 = arith.mulf %823, %821 : vector<4x32xf32>
    %825 = arith.mulf %814, %797 : vector<4x32xf32>
    %826 = arith.addf %824, %825 : vector<4x32xf32>
    %827 = arith.index_cast %793 : i32 to index
    %c0_319 = arith.constant 0 : index
    %c0_320 = arith.constant 0 : index
    %828 = vector.load %arg13[%827, %c0_319, %c0_320] : memref<8x4x1xf32, #tpu.memory_space<vmem>>, vector<1x4x1xf32>
    %829 = vector.shape_cast %828 : vector<1x4x1xf32> to vector<4x1xf32>
    %830 = vector.broadcast %829 : vector<4x1xf32> to vector<4x32xf32>
    %831 = arith.mulf %830, %826 : vector<4x32xf32>
    %cst_321 = arith.constant 1.000000e+00 : f32
    %832 = vector.broadcast %cst_321 : f32 to vector<4x1xf32>
    %833 = arith.subf %832, %829 : vector<4x1xf32>
    %834 = vector.broadcast %833 : vector<4x1xf32> to vector<4x32xf32>
    %835 = arith.mulf %834, %797 : vector<4x32xf32>
    %836 = arith.addf %831, %835 : vector<4x32xf32>
    %c0_322 = arith.constant 0 : index
    %c0_323 = arith.constant 0 : index
    %837 = vector.load %arg12[%c0_322, %c0_323] : memref<4x32xf32, #tpu.memory_space<vmem>>, vector<4x32xf32>
    tpu.vector_store %arg12[%c0_322, %c0_323], %836 {strides = array<i32>} : memref<4x32xf32, #tpu.memory_space<vmem>>, vector<4x32xf32>,
    %838 = arith.index_cast %793 : i32 to index
    %c0_324 = arith.constant 0 : index
    %c0_325 = arith.constant 0 : index
    %839 = vector.load %arg10[%838, %c0_324, %c0_325] : memref<8x4x32xf32, #tpu.memory_space<vmem>>, vector<1x4x32xf32>
    %840 = vector.shape_cast %839 : vector<1x4x32xf32> to vector<4x32xf32>
    %841 = vector.shape_cast %826 : vector<4x32xf32> to vector<1x4x32xf32>
    tpu.vector_store %arg10[%838, %c0_324, %c0_325], %841 {strides = array<i32>} : memref<8x4x32xf32, #tpu.memory_space<vmem>>, vector<1x4x32xf32>,
    %c8_i32_326 = arith.constant 8 : i32
    %c0_327 = arith.constant 0 : index
    %c0_328 = arith.constant 0 : index
    %c0_329 = arith.constant 0 : index
    %842 = vector.load %arg13[%c0_327, %c0_328, %c0_329] : memref<8x4x1xf32, #tpu.memory_space<vmem>>, vector<8x4x1xf32>
    %c0_330 = arith.constant 0 : index
    %c0_331 = arith.constant 0 : index
    %c0_332 = arith.constant 0 : index
    %843 = vector.load %arg10[%c0_330, %c0_331, %c0_332] : memref<8x4x32xf32, #tpu.memory_space<vmem>>, vector<8x4x32xf32>
    %844 = vector.broadcast %842 : vector<8x4x1xf32> to vector<8x4x32xf32>
    %845 = arith.mulf %844, %843 : vector<8x4x32xf32>
    %cst_333 = arith.constant 1.000000e+00 : f32
    %846 = vector.broadcast %cst_333 : f32 to vector<8x4x1xf32>
    %847 = arith.subf %846, %842 : vector<8x4x1xf32>
    %cst_334 = arith.constant -1.000000e+00 : f32
    %848 = vector.broadcast %cst_334 : f32 to vector<8x4x1xf32>
    %849 = arith.mulf %847, %848 : vector<8x4x1xf32>
    %850 = vector.broadcast %849 : vector<8x4x1xf32> to vector<8x4x32xf32>
    %851 = arith.addf %845, %850 : vector<8x4x32xf32>
    %852 = vector.shape_cast %851 : vector<8x4x32xf32> to vector<32x32xf32>
    %c0_335 = arith.constant 0 : index
    %c0_336 = arith.constant 0 : index
    %853 = vector.load %arg7[%c0_335, %c0_336] : memref<32x128xf32, #tpu.memory_space<vmem>>, vector<32x128xf32>
    %cst_337 = arith.constant dense<0.000000e+00> : vector<32x128xf32>
    %854 = tpu.matmul %852, %853, %cst_337 {dimension_numbers = #tpu.dot_dimension_numbers<[1], [0], [0], [1], [0, 0, 1, 1], [], []>} : vector<32x32xf32>, vector<32x128xf32>, vector<32x128xf32> -> vector<32x128xf32>
    %c0_338 = arith.constant 0 : index
    %c0_339 = arith.constant 0 : index
    %855 = vector.load %arg8[%c0_338, %c0_339] : memref<1x128xf32, #tpu.memory_space<vmem>>, vector<1x128xf32>
    %856 = vector.broadcast %855 : vector<1x128xf32> to vector<32x128xf32>
    %857 = arith.addf %854, %856 : vector<32x128xf32>
    %858 = vector.shape_cast %857 : vector<32x128xf32> to vector<8x4x128xf32>
    %c0_340 = arith.constant 0 : index
    %c0_341 = arith.constant 0 : index
    %c0_342 = arith.constant 0 : index
    %859 = vector.load %arg9[%c0_340, %c0_341, %c0_342] : memref<8x4x128xf32, #tpu.memory_space<vmem>>, vector<8x4x128xf32>
    tpu.vector_store %arg9[%c0_340, %c0_341, %c0_342], %858 {strides = array<i32>} : memref<8x4x128xf32, #tpu.memory_space<vmem>>, vector<8x4x128xf32>,
    return
  }
  func.func @transform_0(%arg0: i32) -> (i32, i32, i32) {
    %c0_i32 = arith.constant 0 : i32
    %c0_i32_0 = arith.constant 0 : i32
    %c0_i32_1 = arith.constant 0 : i32
    return %c0_i32, %arg0, %c0_i32_0 : i32, i32, i32
  }
  func.func @transform_1(%arg0: i32) -> (i32, i32) {
    %c0_i32 = arith.constant 0 : i32
    %c0_i32_0 = arith.constant 0 : i32
    return %arg0, %c0_i32 : i32, i32
  }
  func.func @transform_2(%arg0: i32) -> (i32, i32, i32) {
    %c0_i32 = arith.constant 0 : i32
    %c0_i32_0 = arith.constant 0 : i32
    %c0_i32_1 = arith.constant 0 : i32
    %c0_i32_2 = arith.constant 0 : i32
    return %c0_i32, %c0_i32_0, %c0_i32_1 : i32, i32, i32
  }
  func.func @transform_3(%arg0: i32) -> (i32, i32, i32) {
    %c0_i32 = arith.constant 0 : i32
    %c0_i32_0 = arith.constant 0 : i32
    %c0_i32_1 = arith.constant 0 : i32
    %c0_i32_2 = arith.constant 0 : i32
    return %c0_i32, %c0_i32_0, %c0_i32_1 : i32, i32, i32
  }
  func.func @transform_4(%arg0: i32) -> (i32, i32, i32) {
    %c0_i32 = arith.constant 0 : i32
    %c0_i32_0 = arith.constant 0 : i32
    %c0_i32_1 = arith.constant 0 : i32
    %c0_i32_2 = arith.constant 0 : i32
    return %c0_i32, %c0_i32_0, %c0_i32_1 : i32, i32, i32
  }
  func.func @transform_5(%arg0: i32) -> (i32, i32, i32) {
    %c0_i32 = arith.constant 0 : i32
    %c0_i32_0 = arith.constant 0 : i32
    %c0_i32_1 = arith.constant 0 : i32
    %c0_i32_2 = arith.constant 0 : i32
    return %c0_i32, %c0_i32_0, %c0_i32_1 : i32, i32, i32
  }
  func.func @transform_6(%arg0: i32) -> (i32, i32) {
    %c0_i32 = arith.constant 0 : i32
    %c0_i32_0 = arith.constant 0 : i32
    %c0_i32_1 = arith.constant 0 : i32
    return %c0_i32, %c0_i32_0 : i32, i32
  }
  func.func @transform_7(%arg0: i32) -> (i32, i32) {
    %c0_i32 = arith.constant 0 : i32
    %c0_i32_0 = arith.constant 0 : i32
    %c0_i32_1 = arith.constant 0 : i32
    return %c0_i32, %c0_i32_0 : i32, i32
  }
  func.func @transform_8(%arg0: i32) -> (i32, i32, i32) {
    %c0_i32 = arith.constant 0 : i32
    %c0_i32_0 = arith.constant 0 : i32
    %c0_i32_1 = arith.constant 0 : i32
    return %c0_i32, %arg0, %c0_i32_0 : i32, i32, i32
  }
}

</mosaic_0001>

<bundles_post_ra>
// kernel: tpu_custom_call.1
= control target key start
LH: loop header
LB: loop body
LE: loop exit
PB: predicated region body
PF: predicated region fallthrough
CT: control target
= control target key end

     0   :  { %13 = vsyncpa [#allocation7], 0  ;;  %s4222_s0 = inlined_call_operand.hbm [shape: f32[8,4,32], index: 0, kind: input, shape index: {}]   ;;  %s4223_s1 = inlined_call_operand.vmem [shape: s32[4,1], index: 1, kind: input, shape index: {}]   ;;  %s4224_s2 = inlined_call_operand.hbm [shape: f32[2,32,96], index: 2, kind: input, shape index: {}]   ;;  %s4225_s3 = inlined_call_operand.hbm [shape: f32[2,32,96], index: 3, kind: input, shape index: {}]   ;;  %s4226_s4 = inlined_call_operand.vmem [shape: f32[2,1,96], index: 4, kind: input, shape index: {}]   ;;  %s4227_s5 = inlined_call_operand.vmem [shape: f32[2,1,32], index: 5, kind: input, shape index: {}]   ;;  %s4228_s6 = inlined_call_operand.hbm [shape: f32[32,128], index: 6, kind: input, shape index: {}]   ;;  %s4229_s7 = inlined_call_operand.vmem [shape: f32[1,128], index: 7, kind: input, shape index: {}]   ;;  %s4230_s8 = inlined_call_operand.hbm [shape: f32[8,4,128], index: 8, kind: output, shape index: {}]  }
   0x1   :  { %14 = vsyncpa [#allocation10], 0 }
   0x2   :  { %15 = vsyncpa [#allocation13], 0 }
   0x3   :  { %16 = vsyncpa [#allocation8], 0  ;;  %s3630_s27 = smov [#allocation9]   ;;  %s3512_s9 = scalar_lea.hbm %s4224_s2, 1024 }
   0x4   :  { %s36_s28 = sshll.u32 %s3630_s27, 4  ;;  %p3513_p0 = scmp.ne.s32.totalorder %s4224_s2, %s3512_s9  ;;  %s37_s28 = int_to_ptr.vmem [resolvable:$true] %s36_s28 }
   0x5   :  { %p3516_p1 = scmp.lt.u32.totalorder %s3512_s9, %s4224_s2 }
   0x7   :  { %p3518_p2 = pnand %p3516_p1, %p3513_p0 }
   0x9   :  { %3521 = shalt.err (!%p3518_p2)
}
   0xa   :  { %s3522_s14 = scalar_lea.vmem %s37_s28, 1024  ;;  %p3527_p4 = scmp.lt.s32.totalorder %s37_s28, %s37_s28 }
   0xb   :  { %p3523_p3 = scmp.ne.s32.totalorder %s37_s28, %s3522_s14  ;;  %p3528_p5 = scmp.lt.s32.totalorder %s3522_s14, %s3522_s14 }
   0xd   :  { %p3529_p6 = por %p3528_p5, %p3527_p4 }
   0xf   :  { %p3530_p7 = pnand %p3529_p6, %p3523_p3 }
  0x11   :  { %3533 = shalt.err (!%p3530_p7)
}
  0x12   :  { %s3631_s15 = smov 128   ;;  %s3632_s16 = smov 8  }
  0x13   :  { %42 = dma.hbm_to_vmem [thread:$0]  %s4224_s2, 1024, %s37_s28, [#allocation10], %s3631_s15, %s3631_s15, %s3632_s16  }
  0x14   :  { %s3633_s19 = smov [#allocation6]   ;;  %s3534_s23 = scalar_lea.hbm %s4222_s0, 512 }
  0x15   :  { %s22_s20 = sshll.u32 %s3633_s19, 4  ;;  %p3535_p8 = scmp.ne.s32.totalorder %s4222_s0, %s3534_s23  ;;  %s23_s20 = int_to_ptr.vmem [resolvable:$true] %s22_s20 }
  0x16   :  { %p3538_p9 = scmp.lt.u32.totalorder %s3534_s23, %s4222_s0 }
  0x18   :  { %p3540_p10 = pnand %p3538_p9, %p3535_p8 }
  0x1a   :  { %3543 = shalt.err (!%p3540_p10)
}
  0x1b   :  { %s3544_s29 = scalar_lea.vmem %s23_s20, 512  ;;  %p3549_p12 = scmp.lt.s32.totalorder %s23_s20, %s23_s20 }
  0x1c   :  { %p3545_p11 = scmp.ne.s32.totalorder %s23_s20, %s3544_s29  ;;  %p3550_p13 = scmp.lt.s32.totalorder %s3544_s29, %s3544_s29 }
  0x1e   :  { %p3551_p0 = por %p3550_p13, %p3549_p12 }
  0x20   :  { %p3552_p1 = pnand %p3551_p0, %p3545_p11 }
  0x22   :  { %3555 = shalt.err (!%p3552_p1)
}
  0x23   :  { %s3634_s2 = smov 64   ;;  %s3635_s28 = smov 4  }
  0x24   :  { %28 = dma.hbm_to_vmem [thread:$0]  %s4222_s0, 512, %s23_s20, [#allocation7], %s3634_s2, %s3634_s2, %s3635_s28  }
  0x25   :  { %s3636_s10 = smov [#allocation11]   ;;  %s3637_s12 = smov [#allocation12]  }
  0x26   :  { %s48_s11 = sshll.u32 %s3636_s10, 4  ;;  %s64_s13 = sshll.u32 %s3637_s12, 4  ;;  %s49_s11 = int_to_ptr.vmem [resolvable:$true] %s48_s11  ;;  %s3720_s13 = int_to_ptr.vmem [resolvable:$true] %s64_s13 }
  0x27   :  { %s3556_s18 = scalar_lea.hbm %s4225_s3, 1024 }
  0x28   :  { %p3557_p2 = scmp.ne.s32.totalorder %s4225_s3, %s3556_s18  ;;  %p3560_p3 = scmp.lt.u32.totalorder %s3556_s18, %s4225_s3 }
  0x2a   :  { %p3562_p4 = pnand %p3560_p3, %p3557_p2 }
  0x2c   :  { %3565 = shalt.err (!%p3562_p4)
}
  0x2d   :  { %s3566_s0 = scalar_lea.vmem %s49_s11, 1024  ;;  %p3571_p6 = scmp.lt.s32.totalorder %s49_s11, %s49_s11 }
  0x2e   :  { %p3567_p5 = scmp.ne.s32.totalorder %s49_s11, %s3566_s0  ;;  %p3572_p7 = scmp.lt.s32.totalorder %s3566_s0, %s3566_s0 }
  0x30   :  { %p3573_p8 = por %p3572_p7, %p3571_p6 }
  0x32   :  { %p3574_p9 = pnand %p3573_p8, %p3567_p5 }
  0x34   :  { %3577 = shalt.err (!%p3574_p9)
}
  0x35   :  { %54 = dma.hbm_to_vmem [thread:$0]  %s4225_s3, 1024, %s49_s11, [#allocation10], %s3631_s15, %s3631_s15, %s3632_s16  }
  0x36   :  { %s3578_s27 = scalar_lea.hbm %s4228_s6, 512 }
  0x37   :  { %p3579_p10 = scmp.ne.s32.totalorder %s4228_s6, %s3578_s27  ;;  %p3582_p11 = scmp.lt.u32.totalorder %s3578_s27, %s4228_s6 }
  0x39   :  { %p3584_p12 = pnand %p3582_p11, %p3579_p10 }
  0x3b   :  { %3587 = shalt.err (!%p3584_p12)
}
  0x3c   :  { %s3588_s12 = scalar_lea.vmem %s3720_s13, 512  ;;  %p3593_p0 = scmp.lt.s32.totalorder %s3720_s13, %s3720_s13 }
  0x3d   :  { %p3589_p13 = scmp.ne.s32.totalorder %s3720_s13, %s3588_s12  ;;  %p3594_p1 = scmp.lt.s32.totalorder %s3588_s12, %s3588_s12 }
  0x3f   :  { %p3595_p2 = por %p3594_p1, %p3593_p0 }
  0x41   :  { %p3596_p3 = pnand %p3595_p2, %p3589_p13 }
  0x43   :  { %3599 = shalt.err (!%p3596_p3)
}
  0x44   :  { %70 = dma.hbm_to_vmem [thread:$0]  %s4228_s6, 512, %s3720_s13, [#allocation13], %s3631_s15, %s3631_s15, %s3632_s16  }
  0x45   :  { %3622 = dma.done.wait [#allocation7], 512  }
  0x46   :  { %3623 = vsyncadd [#allocation7], 4294966784 }
  0x47   :  { %3624 = dma.done.wait [#allocation10], 2048  }
  0x48   :  { %3625 = vsyncadd [#allocation10], 4294965248 }
  0x49   :  { %3626 = dma.done.wait [#allocation13], 512  }
  0x4a   :  { %3627 = vsyncadd [#allocation13], 4294966784  ;;  %vm270_vm0 = vcmask 257024   ;;  %v3638_v0 = vmov 0.0|0.0   ;;  %vm3639_vm1 = vmmov 0   ;;  %v3640_v1 = vmov 0.0  }
  0x4b   :  { %3285 = vmatprep.subr.bf16.mxu0 %v3638_v0  ;;  %3086 = vmatprep.mubr.msk.f32.mxu0 %vm3639_vm1, %v3640_v1  ;;  %271 = vst.msk [vmem:[#allocation4] sm:$0xf] %vm270_vm0, %v3640_v1  ;;  %v127_v2 = vld [vmem:[#allocation9] sm:$0xff]  ;;  %v128_v3 = vld [vmem:[#allocation9 + $0x8] sm:$0xff]  ;;  %v129_v4 = vld [vmem:[#allocation9 + $0x10] sm:$0xff]  ;;  %vm150_vm2 = vcmask 261120  }
  0x4c   :  { %v3271_v5 = vpack.c.bf16 %v128_v3, %v127_v2  ;;  %v130_v6 = vld [vmem:[#allocation9 + $0x18] sm:$0xff]  ;;  %v3408_v8 = vld [vmem:[#allocation6] sm:$0xff]   ;;  %v266_v10 = vld [vmem:[#allocation11 + $0x8] sm:$0xff]  ;;  %vm110_vm4 = vcmask 3072   ;;  %vm256_vm5 = vcmask 781312   ;;  %v3641_v26 = vmov 0  }
  0x4d   :  { %v3275_v7 = vpack.c.bf16 %v130_v6, %v129_v4  ;;  %v265_v9 = vld [vmem:[#allocation11] sm:$0xff]  ;;  %3061 = vmatprep.mubr.msk.f32.mxu1 %vm150_vm2, %v3408_v8  ;;  %v267_v12 = vld [vmem:[#allocation11 + $0x10] sm:$0xff]  ;;  %v268_v13 = vld [vmem:[#allocation11 + $0x18] sm:$0xff]  ;;  %3406 = vset.pattern.permute.xlu1 %v3641_v26  ;;  %s3643_s18 = smov 32   ;;  %s3644_s0 = smov [#allocation14]  }
  0x4e   :  { %3272 = vmatprep.subr.bf16.mxu1 %v3271_v5  ;;  %v3763_v11 = vpack.c.bf16 %v266_v10, %v265_v9  ;;  %v3409_v14 = vld [vmem:[#allocation6 + $0x8] sm:$0xff]   ;;  %v2905_v15 = vld [vmem:[%s4227_s5] ss:$0 sm:$0xff]  ;;  %v3410_v16 = vld [vmem:[#allocation6 + $0x10] sm:$0xff]   ;;  %v3770_v17 = vpack.c.bf16 %v268_v13, %v267_v12  ;;  %3407 = vset.pattern.permute.xlu0 %v3641_v26  ;;  %s2876_s20 = sshll.u32 %s3644_s0, 4  ;;  %s2877_s20 = int_to_ptr.vmem [resolvable:$true] %s2876_s20 }
  0x4f   :  { %3274 = vmatpush3.bf16.msra.mxu1 %v3271_v5  ;;  %359 = vrot.lane.b32.xlu0 %v2905_v15, %s3634_s2  ;;  %v3411_v18 = vld [vmem:[#allocation6 + $0x18] sm:$0xff]   ;;  %p3605_p5 = scmp.lt.s32.totalorder %s2877_s20, %s2877_s20 }
  0x50   :  { %3276 = vmatprep.subr.bf16.mxu1 %v3275_v7  ;;  %3287 = vmatpush3.bf16.msra.mxu0 %v3763_v11  ;;  %v3798_v20 = vld [vmem:[%s4223_s1] sm:$0xf]  ;;  %s3642_s1 = smov 96  }
  0x51   :  { %3288 = vmatprep.subr.bf16.mxu0 %v3638_v0  ;;  %vm86_vm3 = vcmp.gt.s32.totalorder %v3798_v20, 0  ;;  %v2898_v22 = vld [vmem:[%s4226_s4] ss:$0 sm:$0xff]  ;;  %vm87_vm6 = vcmp.gt.s32.totalorder %v3798_v20, 1  ;;  %vm88_vm7 = vcmp.gt.s32.totalorder %v3798_v20, 2  ;;  %vm89_vm8 = vcmp.gt.s32.totalorder %v3798_v20, 3 }
  0x52   :  { %v3784_v19 = vld [vmem:[#allocation4] sm:$0xf]  ;;  %v2890_v21 = vsel %vm86_vm3, 1.0, %v3640_v1  ;;  %v2891_v5 = vsel %vm87_vm6, 1.0, %v3640_v1  ;;  %vm90_vm9 = vcmp.gt.s32.totalorder %v3798_v20, 4  ;;  %vm91_vm10 = vcmp.gt.s32.totalorder %v3798_v20, 5 }
  0x53   :  { %3278 = vmatpush3.bf16.msra.mxu1 %v3275_v7  ;;  %111 = vst.msk [vmem:[#allocation5] sm:$0xf] %vm110_vm4, %v2890_v21  ;;  %112 = vst.msk [vmem:[#allocation5 + $0x4] sm:$0xf] %vm110_vm4, %v2891_v5  ;;  %vm92_vm11 = vcmp.gt.s32.totalorder %v3798_v20, 6  ;;  %vm93_vm12 = vcmp.gt.s32.totalorder %v3798_v20, 7 }
  0x54   :  { %3279 = vmatprep.subr.bf16.mxu1 %v3638_v0  ;;  %3290 = vmatpush3.bf16.msra.mxu0 %v3770_v17 }
  0x55   :  { %3297 = vmatprep.subr.bf16.mxu0 %v3638_v0 }
  0x56   :  { %3062 = vmatmul.mubr.msk.f32.vlgmr.msra.gmra.mrb[0].mxu1 %vm150_vm2, %v3409_v14 }
  0x57   :  { %3281 = vmatpush3.bf16.msra.mxu1 %v3763_v11  ;;  %3064 = vmatprep.mubr.msk.f32.mxu1 %vm150_vm2, %v3410_v16 }
  0x58   :  { %3282 = vmatprep.subr.bf16.mxu1 %v3638_v0 }
  0x5a   :  { %3065 = vmatmul.mubr.msk.f32.gmra.mrb[2].mxu1 %vm150_vm2, %v3411_v18  ;;  %v385_v40 = vld [vmem:[#allocation5] sm:$0xf]  ;;  %v521_v7 = vld [vmem:[#allocation5 + $0x4] sm:$0xf] }
  0x5b   :  { %3284 = vmatpush3.bf16.msra.mxu1 %v3770_v17  ;;  %3075 = vmatprep.mubr.msk.f32.mxu1 %vm3639_vm1, %v3640_v1  ;;  %v392_v49 = vsub.f32 1.0, %v385_v40  ;;  %v528_v10 = vsub.f32 1.0, %v521_v7 }
  0x5c   :  { %3291 = vmatprep.subr.bf16.mxu1 %v3638_v0 }
  0x5e   :  { %3076 = vmatmul.mubr.msk.f32.vlgmr.msra.gmra.mrb[4].mxu1 %vm150_vm2, %v3784_v19 }
  0x5f   :  { %3293 = vmatpush3.bf16.msra.mxu1 %v3763_v11  ;;  %3097 = vmatprep.mubr.msk.f32.mxu1 %vm3639_vm1, %v3640_v1 }
  0x60   :  { %3294 = vmatprep.subr.bf16.mxu1 %v3638_v0 }
  0x63   :  { %3296 = vmatpush3.bf16.msra.mxu1 %v3770_v17 }
  0x64   :  { %3303 = vmatprep.subr.bf16.mxu1 %v3638_v0 }
  0xc1   :  { %v3810_v34 = vpop.permute.xlu0 %359 }
 0x129   :  { %v3063_v23 = vpop.f32.mrb[0].mxu1 }
 0x12a   :  { %v231_v24 = vadd.f32 %v3063_v23, %v2898_v22  ;;  %v225_v25 = vpop.f32.mrb[1].mxu1 }
 0x12b   :  { %v226_v27 = vadd.f32 %v2898_v22, %v225_v25 }
 0x12c   :  { %v249_v28 = vcombine.high %v231_v24, %v231_v24  ;;  %259 = vst.msk [vmem:[#allocation3 + $0x8] sm:$0xf] %vm256_vm5, %v231_v24 }
 0x12d   :  { %v248_v29 = vcombine.high %v226_v27, %v226_v27  ;;  %257 = vst.msk [vmem:[#allocation3] sm:$0xf] %vm256_vm5, %v226_v27  ;;  %v3066_v30 = vpop.f32.mrb[2].mxu1 }
 0x12e   :  { %260 = vst.msk [vmem:[#allocation3 + $0xc] sm:$0xf] %vm256_vm5, %v249_v28  ;;  %v241_v31 = vadd.f32 %v3066_v30, %v2898_v22  ;;  %v235_v32 = vpop.f32.mrb[3].mxu1 }
 0x12f   :  { %258 = vst.msk [vmem:[#allocation3 + $0x4] sm:$0xf] %vm256_vm5, %v248_v29  ;;  %v236_v33 = vadd.f32 %v2898_v22, %v235_v32 }
 0x130   :  { %v251_v35 = vcombine.high %v241_v31, %v241_v31  ;;  %263 = vst.msk [vmem:[#allocation3 + $0x18] sm:$0xf] %vm256_vm5, %v241_v31 }
 0x131   :  { %v250_v36 = vcombine.high %v236_v33, %v236_v33  ;;  %261 = vst.msk [vmem:[#allocation3 + $0x10] sm:$0xf] %vm256_vm5, %v236_v33  ;;  %v343_v37 = vpop.f32.mrb[4].mxu1 }
 0x132   :  { %264 = vst.msk [vmem:[#allocation3 + $0x1c] sm:$0xf] %vm256_vm5, %v251_v35  ;;  %v3077_v38 = vpop.f32.mrb[5].mxu1  ;;  %v362_v39 = vadd.f32 %v3810_v34, %v343_v37 }
 0x133   :  { %262 = vst.msk [vmem:[#allocation3 + $0x14] sm:$0xf] %vm256_vm5, %v250_v36 }
 0x134   :  { %364 = vrot.lane.b32.xlu0 %v362_v39, %s3634_s2  ;;  %v272_v41 = vld [vmem:[#allocation3] sm:$0xf] }
 0x135   :  { %v347_v42 = vadd.f32 %v343_v37, %v272_v41 }
 0x136   :  { %v415_v12 = vld [vmem:[#allocation3 + $0x4] sm:$0xf] }
 0x137   :  { %v2904_v43 = vmul.f32 -1.442695, %v347_v42 }
 0x138   :  { %388 = vperm.xlu0 %3407, %v385_v40   ;;  %v2892_v40 = vsel %vm88_vm7, 1.0, %v3640_v1 }
 0x139   :  { %3416 = vpow2.f32 %v2904_v43  ;;  %113 = vst.msk [vmem:[#allocation5 + $0x8] sm:$0xf] %vm110_vm4, %v2892_v40 }
 0x140   :  { %v658_v42 = vld [vmem:[#allocation5 + $0x8] sm:$0xf] }
 0x143   :  { %v3417_v44 = vpop.eup %3416 }
 0x144   :  { %v351_v45 = vadd.f32 1.0, %v3417_v44 }
 0x146   :  { %3418 = vrcp.f32 %v351_v45  ;;  %v665_v45 = vsub.f32 1.0, %v658_v42 }
 0x150   :  { %v3419_v46 = vpop.eup %3418 }
 0x151   :  { %v374_v57 = vsub.f32 1.0, %v3419_v46 }
 0x1a6   :  { %v365_v47 = vpop.permute.xlu0 %364 }
 0x1a7   :  { %v367_v48 = vmul.f32 %v3419_v46, %v365_v47 }
 0x1a9   :  { %369 = vrot.lane.b32.xlu1 %v367_v48, %s3634_s2 }
 0x1ad   :  { %395 = vperm.xlu1 %3406, %v392_v49  }
 0x1b7   :  { %v389_v56 = vpop.permute.xlu0 %388 }
 0x21b   :  { %v370_v50 = vpop.permute.xlu1 %369 }
 0x21c   :  { %v372_v51 = vadd.f32 %v370_v50, %v272_v41 }
 0x21e   :  { %3420 = vtanh.f32 %v372_v51 }
 0x228   :  { %v3421_v52 = vpop.eup %3420 }
 0x229   :  { %376 = vrot.lane.b32.xlu1 %v3421_v52, %s3642_s1 }
 0x22c   :  { %v396_v53 = vpop.permute.xlu1 %395 }
 0x22d   :  { %380 = vrot.lane.b32.xlu1 %v3784_v19, %s3643_s18  ;;  %v398_v54 = vmul.f32 %v396_v53, %v3784_v19 }
 0x22f   :  { %400 = vrot.lane.b32.xlu0 %v398_v54, %s3643_s18 }
 0x29b   :  { %v377_v55 = vpop.permute.xlu1 %376 }
 0x29c   :  { %v379_v59 = vmul.f32 %v377_v55, %v374_v57 }
 0x29f   :  { %v381_v58 = vpop.permute.xlu1 %380 }
 0x2a0   :  { %v383_v60 = vmul.f32 %v3419_v46, %v381_v58  ;;  %v552_v46 = vld [vmem:[#allocation3 + $0x8] sm:$0xf] }
 0x2a1   :  { %v401_v62 = vpop.permute.xlu0 %400 }
 0x2a2   :  { %v3824_v61 = vadd.f32 %v383_v60, %v379_v59 }
 0x2a4   :  { %v391_v63 = vmul.f32 %v389_v56, %v3824_v61 }
 0x2a6   :  { %v403_v2 = vadd.f32 %v401_v62, %v391_v63 }
 0x2a8   :  { %405 = vrot.lane.b32.xlu1 %v403_v2, %s3642_s1 }
 0x31a   :  { %v406_v3 = vpop.permute.xlu1 %405 }
 0x31b   :  { %408 = vst.msk [vmem:[#allocation4] sm:$0xf] %vm270_vm0, %v406_v3 }
 0x322   :  { %v416_v4 = vld [vmem:[#allocation4] sm:$0xf] }
 0x323   :  { %3087 = vmatmul.mubr.msk.f32.vlgmr.msra.gmra.mrb[0].mxu0 %vm150_vm2, %v416_v4 }
 0x324   :  { %3299 = vmatpush3.bf16.msra.mxu0 %v3763_v11  ;;  %3108 = vmatprep.mubr.msk.f32.mxu0 %vm3639_vm1, %v3640_v1 }
 0x325   :  { %3300 = vmatprep.subr.bf16.mxu0 %v3638_v0 }
 0x328   :  { %3302 = vmatpush3.bf16.msra.mxu0 %v3770_v17 }
 0x329   :  { %3309 = vmatprep.subr.bf16.mxu0 %v3638_v0 }
 0x3f6   :  { %v486_v6 = vpop.f32.mrb[0].mxu0 }
 0x3f7   :  { %v3088_v8 = vpop.f32.mrb[1].mxu0  ;;  %v497_v9 = vadd.f32 %v486_v6, %v3810_v34  ;;  %v490_v13 = vadd.f32 %v486_v6, %v415_v12 }
 0x3f9   :  { %499 = vrot.lane.b32.xlu0 %v497_v9, %s3634_s2  ;;  %v2907_v14 = vmul.f32 -1.442695, %v490_v13 }
 0x3fb   :  { %3422 = vpow2.f32 %v2907_v14 }
 0x3fd   :  { %531 = vperm.xlu0 %3407, %v528_v10   ;;  %v2893_v10 = vsel %vm89_vm8, 1.0, %v3640_v1 }
 0x3fe   :  { %114 = vst.msk [vmem:[#allocation5 + $0xc] sm:$0xf] %vm110_vm4, %v2893_v10 }
 0x405   :  { %v3423_v15 = vpop.eup %3422  ;;  %v795_v13 = vld [vmem:[#allocation5 + $0xc] sm:$0xf] }
 0x406   :  { %v494_v16 = vadd.f32 1.0, %v3423_v15 }
 0x408   :  { %3424 = vrcp.f32 %v494_v16  ;;  %v802_v16 = vsub.f32 1.0, %v795_v13 }
 0x412   :  { %v3425_v18 = vpop.eup %3424 }
 0x413   :  { %v509_v29 = vsub.f32 1.0, %v3425_v18 }
 0x46b   :  { %v500_v19 = vpop.permute.xlu0 %499 }
 0x46c   :  { %v502_v21 = vmul.f32 %v3425_v18, %v500_v19 }
 0x46e   :  { %504 = vrot.lane.b32.xlu1 %v502_v21, %s3634_s2 }
 0x472   :  { %524 = vperm.xlu1 %3406, %v521_v7  }
 0x476   :  { %515 = vrot.lane.b32.xlu1 %v416_v4, %s3643_s18 }
 0x47c   :  { %v532_v25 = vpop.permute.xlu0 %531 }
 0x47d   :  { %v534_v26 = vmul.f32 %v532_v25, %v416_v4 }
 0x4e0   :  { %v505_v22 = vpop.permute.xlu1 %504 }
 0x4e1   :  { %v507_v23 = vadd.f32 %v505_v22, %v415_v12 }
 0x4e3   :  { %3426 = vtanh.f32 %v507_v23 }
 0x4ed   :  { %v3427_v24 = vpop.eup %3426 }
 0x4ee   :  { %511 = vrot.lane.b32.xlu0 %v3427_v24, %s3642_s1 }
 0x4f1   :  { %v525_v27 = vpop.permute.xlu1 %524 }
 0x4f2   :  { %536 = vrot.lane.b32.xlu0 %v534_v26, %s3643_s18 }
 0x4f5   :  { %v516_v28 = vpop.permute.xlu1 %515 }
 0x4f6   :  { %v518_v31 = vmul.f32 %v3425_v18, %v516_v28  ;;  %v689_v18 = vld [vmem:[#allocation3 + $0xc] sm:$0xf] }
 0x560   :  { %v512_v30 = vpop.permute.xlu0 %511 }
 0x561   :  { %v514_v32 = vmul.f32 %v512_v30, %v509_v29 }
 0x563   :  { %v3845_v33 = vadd.f32 %v518_v31, %v514_v32 }
 0x564   :  { %v537_v36 = vpop.permute.xlu0 %536 }
 0x565   :  { %v527_v35 = vmul.f32 %v525_v27, %v3845_v33 }
 0x567   :  { %v539_v37 = vadd.f32 %v537_v36, %v527_v35 }
 0x569   :  { %541 = vrot.lane.b32.xlu1 %v539_v37, %s3642_s1 }
 0x5db   :  { %v542_v38 = vpop.permute.xlu1 %541 }
 0x5dc   :  { %544 = vst.msk [vmem:[#allocation4] sm:$0xf] %vm270_vm0, %v542_v38 }
 0x5e3   :  { %v553_v39 = vld [vmem:[#allocation4] sm:$0xf] }
 0x5e4   :  { %3098 = vmatmul.mubr.msk.f32.vlgmr.msra.gmra.mrb[6].mxu1 %vm150_vm2, %v553_v39 }
 0x5e5   :  { %3305 = vmatpush3.bf16.msra.mxu1 %v3763_v11  ;;  %3119 = vmatprep.mubr.msk.f32.mxu1 %vm3639_vm1, %v3640_v1 }
 0x5e6   :  { %3306 = vmatprep.subr.bf16.mxu1 %v3638_v0 }
 0x5e9   :  { %3308 = vmatpush3.bf16.msra.mxu1 %v3770_v17 }
 0x5ea   :  { %3315 = vmatprep.subr.bf16.mxu1 %v3638_v0 }
 0x6b7   :  { %v623_v41 = vpop.f32.mrb[6].mxu1 }
 0x6b8   :  { %v3099_v43 = vpop.f32.mrb[7].mxu1  ;;  %v634_v44 = vadd.f32 %v623_v41, %v3810_v34  ;;  %v627_v47 = vadd.f32 %v623_v41, %v552_v46 }
 0x6ba   :  { %636 = vrot.lane.b32.xlu0 %v634_v44, %s3634_s2  ;;  %v2909_v48 = vmul.f32 -1.442695, %v627_v47 }
 0x6bc   :  { %3428 = vpow2.f32 %v2909_v48 }
 0x6be   :  { %668 = vperm.xlu0 %3407, %v665_v45  }
 0x6c6   :  { %v3429_v49 = vpop.eup %3428 }
 0x6c7   :  { %v631_v50 = vadd.f32 1.0, %v3429_v49 }
 0x6c9   :  { %3430 = vrcp.f32 %v631_v50 }
 0x6d3   :  { %v3431_v51 = vpop.eup %3430 }
 0x6d4   :  { %v646_v62 = vsub.f32 1.0, %v3431_v51 }
 0x72c   :  { %v637_v52 = vpop.permute.xlu0 %636 }
 0x72d   :  { %v639_v53 = vmul.f32 %v3431_v51, %v637_v52  ;;  %v826_v52 = vld [vmem:[#allocation3 + $0x10] sm:$0xf] }
 0x72f   :  { %641 = vrot.lane.b32.xlu1 %v639_v53, %s3634_s2 }
 0x733   :  { %661 = vperm.xlu1 %3406, %v658_v42  }
 0x737   :  { %652 = vrot.lane.b32.xlu1 %v553_v39, %s3643_s18 }
 0x73d   :  { %v669_v57 = vpop.permute.xlu0 %668 }
 0x73e   :  { %v671_v58 = vmul.f32 %v669_v57, %v553_v39 }
 0x7a1   :  { %v642_v54 = vpop.permute.xlu1 %641 }
 0x7a2   :  { %v644_v55 = vadd.f32 %v642_v54, %v552_v46  ;;  %v2894_v46 = vsel %vm90_vm9, 1.0, %v3640_v1 }
 0x7a3   :  { %115 = vst.msk [vmem:[#allocation5 + $0x10] sm:$0xf] %vm110_vm4, %v2894_v46 }
 0x7a4   :  { %3432 = vtanh.f32 %v644_v55 }
 0x7aa   :  { %v932_v48 = vld [vmem:[#allocation5 + $0x10] sm:$0xf] }
 0x7ae   :  { %v3433_v56 = vpop.eup %3432 }
 0x7af   :  { %648 = vrot.lane.b32.xlu0 %v3433_v56, %s3642_s1 }
 0x7b2   :  { %v662_v59 = vpop.permute.xlu1 %661 }
 0x7b3   :  { %673 = vrot.lane.b32.xlu0 %v671_v58, %s3643_s18 }
 0x7b6   :  { %v653_v60 = vpop.permute.xlu1 %652 }
 0x7b7   :  { %v655_v2 = vmul.f32 %v3431_v51, %v653_v60  ;;  %v939_v51 = vsub.f32 1.0, %v932_v48 }
 0x821   :  { %v649_v63 = vpop.permute.xlu0 %648 }
 0x822   :  { %v651_v3 = vmul.f32 %v649_v63, %v646_v62 }
 0x824   :  { %v3866_v4 = vadd.f32 %v655_v2, %v651_v3 }
 0x825   :  { %v674_v6 = vpop.permute.xlu0 %673 }
 0x826   :  { %v664_v5 = vmul.f32 %v662_v59, %v3866_v4 }
 0x828   :  { %v676_v7 = vadd.f32 %v674_v6, %v664_v5 }
 0x82a   :  { %678 = vrot.lane.b32.xlu1 %v676_v7, %s3642_s1 }
 0x89c   :  { %v679_v8 = vpop.permute.xlu1 %678 }
 0x89d   :  { %681 = vst.msk [vmem:[#allocation4] sm:$0xf] %vm270_vm0, %v679_v8 }
 0x8a4   :  { %v690_v9 = vld [vmem:[#allocation4] sm:$0xf] }
 0x8a5   :  { %3109 = vmatmul.mubr.msk.f32.vlgmr.msra.gmra.mrb[2].mxu0 %vm150_vm2, %v690_v9 }
 0x8a6   :  { %3311 = vmatpush3.bf16.msra.mxu0 %v3763_v11  ;;  %3130 = vmatprep.mubr.msk.f32.mxu0 %vm3639_vm1, %v3640_v1 }
 0x8a7   :  { %3312 = vmatprep.subr.bf16.mxu0 %v3638_v0 }
 0x8aa   :  { %3314 = vmatpush3.bf16.msra.mxu0 %v3770_v17 }
 0x8ab   :  { %3321 = vmatprep.subr.bf16.mxu0 %v3638_v0 }
 0x978   :  { %v760_v12 = vpop.f32.mrb[2].mxu0 }
 0x979   :  { %v3110_v14 = vpop.f32.mrb[3].mxu0  ;;  %v771_v15 = vadd.f32 %v760_v12, %v3810_v34  ;;  %v764_v19 = vadd.f32 %v760_v12, %v689_v18 }
 0x97b   :  { %773 = vrot.lane.b32.xlu0 %v771_v15, %s3634_s2  ;;  %v2911_v21 = vmul.f32 -1.442695, %v764_v19  ;;  %v2895_v19 = vsel %vm91_vm10, 1.0, %v3640_v1 }
 0x97c   :  { %116 = vst.msk [vmem:[#allocation5 + $0x14] sm:$0xf] %vm110_vm4, %v2895_v19 }
 0x97d   :  { %3434 = vpow2.f32 %v2911_v21 }
 0x97f   :  { %805 = vperm.xlu0 %3407, %v802_v16  }
 0x987   :  { %v3435_v22 = vpop.eup %3434 }
 0x988   :  { %v768_v23 = vadd.f32 1.0, %v3435_v22  ;;  %v1069_v22 = vld [vmem:[#allocation5 + $0x14] sm:$0xf] }
 0x98a   :  { %3436 = vrcp.f32 %v768_v23 }
 0x994   :  { %v3437_v24 = vpop.eup %3436 }
 0x995   :  { %v783_v36 = vsub.f32 1.0, %v3437_v24 }
 0x9ed   :  { %v774_v25 = vpop.permute.xlu0 %773 }
 0x9ee   :  { %v776_v26 = vmul.f32 %v3437_v24, %v774_v25  ;;  %v963_v25 = vld [vmem:[#allocation3 + $0x14] sm:$0xf] }
 0x9f0   :  { %778 = vrot.lane.b32.xlu1 %v776_v26, %s3634_s2 }
 0x9f4   :  { %798 = vperm.xlu1 %3406, %v795_v13  }
 0x9f8   :  { %789 = vrot.lane.b32.xlu1 %v690_v9, %s3643_s18 }
 0x9fe   :  { %v806_v30 = vpop.permute.xlu0 %805 }
 0x9ff   :  { %v808_v31 = vmul.f32 %v806_v30, %v690_v9 }
 0xa62   :  { %v779_v27 = vpop.permute.xlu1 %778 }
 0xa63   :  { %v781_v28 = vadd.f32 %v779_v27, %v689_v18 }
 0xa65   :  { %3438 = vtanh.f32 %v781_v28 }
 0xa6f   :  { %v3439_v29 = vpop.eup %3438 }
 0xa70   :  { %785 = vrot.lane.b32.xlu0 %v3439_v29, %s3642_s1 }
 0xa73   :  { %v799_v32 = vpop.permute.xlu1 %798 }
 0xa74   :  { %810 = vrot.lane.b32.xlu0 %v808_v31, %s3643_s18 }
 0xa77   :  { %v790_v35 = vpop.permute.xlu1 %789 }
 0xa78   :  { %v792_v38 = vmul.f32 %v3437_v24, %v790_v35  ;;  %v1076_v24 = vsub.f32 1.0, %v1069_v22 }
 0xae2   :  { %v786_v37 = vpop.permute.xlu0 %785 }
 0xae3   :  { %v788_v39 = vmul.f32 %v786_v37, %v783_v36 }
 0xae5   :  { %v3887_v40 = vadd.f32 %v792_v38, %v788_v39 }
 0xae6   :  { %v811_v42 = vpop.permute.xlu0 %810 }
 0xae7   :  { %v801_v41 = vmul.f32 %v799_v32, %v3887_v40 }
 0xae9   :  { %v813_v43 = vadd.f32 %v811_v42, %v801_v41 }
 0xaeb   :  { %815 = vrot.lane.b32.xlu1 %v813_v43, %s3642_s1 }
 0xb5d   :  { %v816_v44 = vpop.permute.xlu1 %815 }
 0xb5e   :  { %818 = vst.msk [vmem:[#allocation4] sm:$0xf] %vm270_vm0, %v816_v44 }
 0xb65   :  { %v827_v45 = vld [vmem:[#allocation4] sm:$0xf] }
 0xb66   :  { %3120 = vmatmul.mubr.msk.f32.vlgmr.msra.gmra.mrb[8].mxu1 %vm150_vm2, %v827_v45 }
 0xb67   :  { %3317 = vmatpush3.bf16.msra.mxu1 %v3763_v11  ;;  %3141 = vmatprep.mubr.msk.f32.mxu1 %vm3639_vm1, %v3640_v1 }
 0xb68   :  { %3318 = vmatprep.subr.bf16.mxu1 %v3638_v0 }
 0xb6b   :  { %3320 = vmatpush3.bf16.msra.mxu1 %v3770_v17 }
 0xc39   :  { %v897_v47 = vpop.f32.mrb[8].mxu1 }
 0xc3a   :  { %v3121_v49 = vpop.f32.mrb[9].mxu1  ;;  %v908_v50 = vadd.f32 %v897_v47, %v3810_v34  ;;  %v901_v53 = vadd.f32 %v897_v47, %v826_v52 }
 0xc3c   :  { %910 = vrot.lane.b32.xlu0 %v908_v50, %s3634_s2  ;;  %v2913_v54 = vmul.f32 -1.442695, %v901_v53 }
 0xc3e   :  { %3440 = vpow2.f32 %v2913_v54 }
 0xc40   :  { %942 = vperm.xlu0 %3407, %v939_v51  }
 0xc48   :  { %v3441_v55 = vpop.eup %3440 }
 0xc49   :  { %v905_v56 = vadd.f32 1.0, %v3441_v55 }
 0xc4b   :  { %3442 = vrcp.f32 %v905_v56 }
 0xc55   :  { %v3443_v57 = vpop.eup %3442 }
 0xc56   :  { %v920_v7 = vsub.f32 1.0, %v3443_v57 }
 0xcae   :  { %v911_v58 = vpop.permute.xlu0 %910 }
 0xcaf   :  { %v913_v59 = vmul.f32 %v3443_v57, %v911_v58  ;;  %v1100_v58 = vld [vmem:[#allocation3 + $0x18] sm:$0xf] }
 0xcb1   :  { %915 = vrot.lane.b32.xlu1 %v913_v59, %s3634_s2 }
 0xcb5   :  { %935 = vperm.xlu1 %3406, %v932_v48  }
 0xcb9   :  { %926 = vrot.lane.b32.xlu1 %v827_v45, %s3643_s18 }
 0xcbf   :  { %v943_v2 = vpop.permute.xlu0 %942 }
 0xcc0   :  { %v945_v3 = vmul.f32 %v943_v2, %v827_v45 }
 0xd23   :  { %v916_v60 = vpop.permute.xlu1 %915 }
 0xd24   :  { %v918_v62 = vadd.f32 %v916_v60, %v826_v52  ;;  %v2896_v52 = vsel %vm92_vm11, 1.0, %v3640_v1 }
 0xd25   :  { %117 = vst.msk [vmem:[#allocation5 + $0x18] sm:$0xf] %vm110_vm4, %v2896_v52  ;;  %v1522_v52 = vld [vmem:[#allocation11 + $0x30] sm:$0xff] }
 0xd26   :  { %3444 = vtanh.f32 %v918_v62 }
 0xd2c   :  { %v1206_v54 = vld [vmem:[#allocation5 + $0x18] sm:$0xf] }
 0xd30   :  { %v3445_v63 = vpop.eup %3444 }
 0xd31   :  { %922 = vrot.lane.b32.xlu0 %v3445_v63, %s3642_s1 }
 0xd34   :  { %v936_v5 = vpop.permute.xlu1 %935 }
 0xd35   :  { %947 = vrot.lane.b32.xlu0 %v945_v3, %s3643_s18 }
 0xd38   :  { %v927_v6 = vpop.permute.xlu1 %926 }
 0xd39   :  { %v929_v9 = vmul.f32 %v3443_v57, %v927_v6  ;;  %v1213_v57 = vsub.f32 1.0, %v1206_v54 }
 0xda3   :  { %v923_v8 = vpop.permute.xlu0 %922 }
 0xda4   :  { %v925_v10 = vmul.f32 %v923_v8, %v920_v7 }
 0xda6   :  { %v3907_v12 = vadd.f32 %v929_v9, %v925_v10 }
 0xda7   :  { %v948_v14 = vpop.permute.xlu0 %947 }
 0xda8   :  { %v938_v13 = vmul.f32 %v936_v5, %v3907_v12 }
 0xdaa   :  { %v950_v15 = vadd.f32 %v948_v14, %v938_v13 }
 0xdac   :  { %952 = vrot.lane.b32.xlu1 %v950_v15, %s3642_s1 }
 0xe1e   :  { %v953_v16 = vpop.permute.xlu1 %952 }
 0xe1f   :  { %955 = vst.msk [vmem:[#allocation4] sm:$0xf] %vm270_vm0, %v953_v16 }
 0xe26   :  { %v964_v18 = vld [vmem:[#allocation4] sm:$0xf] }
 0xe27   :  { %3131 = vmatmul.mubr.msk.f32.vlgmr.msra.gmra.mrb[4].mxu0 %vm150_vm2, %v964_v18 }
 0xe28   :  { %3323 = vmatpush3.bf16.msra.mxu0 %v3763_v11  ;;  %3152 = vmatprep.mubr.msk.f32.mxu0 %vm3639_vm1, %v3640_v1 }
 0xe29   :  { %3324 = vmatprep.subr.bf16.mxu0 %v3638_v0 }
 0xe2c   :  { %3326 = vmatpush3.bf16.msra.mxu0 %v3770_v17 }
 0xe2d   :  { %3335 = vmatprep.subr.bf16.mxu0 %v3638_v0 }
 0xefa   :  { %v1034_v21 = vpop.f32.mrb[4].mxu0 }
 0xefb   :  { %v3132_v23 = vpop.f32.mrb[5].mxu0  ;;  %v1045_v11 = vadd.f32 %v1034_v21, %v3810_v34  ;;  %v1038_v26 = vadd.f32 %v1034_v21, %v963_v25 }
 0xefd   :  { %1047 = vrot.lane.b32.xlu0 %v1045_v11, %s3634_s2  ;;  %v2915_v17 = vmul.f32 -1.442695, %v1038_v26  ;;  %v2897_v26 = vsel %vm93_vm12, 1.0, %v3640_v1 }
 0xefe   :  { %118 = vst.msk [vmem:[#allocation5 + $0x1c] sm:$0xf] %vm110_vm4, %v2897_v26 }
 0xeff   :  { %3446 = vpow2.f32 %v2915_v17 }
 0xf01   :  { %1079 = vperm.xlu0 %3407, %v1076_v24  }
 0xf09   :  { %v3447_v27 = vpop.eup %3446 }
 0xf0a   :  { %v1042_v28 = vadd.f32 1.0, %v3447_v27  ;;  %v1343_v27 = vld [vmem:[#allocation5 + $0x1c] sm:$0xf] }
 0xf0c   :  { %3448 = vrcp.f32 %v1042_v28 }
 0xf16   :  { %v3449_v29 = vpop.eup %3448 }
 0xf17   :  { %v1057_v42 = vsub.f32 1.0, %v3449_v29 }
 0xf6f   :  { %v1048_v30 = vpop.permute.xlu0 %1047 }
 0xf70   :  { %v1050_v31 = vmul.f32 %v3449_v29, %v1048_v30  ;;  %v1350_v30 = vsub.f32 1.0, %v1343_v27 }
 0xf72   :  { %1052 = vrot.lane.b32.xlu1 %v1050_v31, %s3634_s2  ;;  %v1237_v31 = vld [vmem:[#allocation3 + $0x1c] sm:$0xf] }
 0xf76   :  { %1072 = vperm.xlu1 %3406, %v1069_v22  }
 0xf7a   :  { %1063 = vrot.lane.b32.xlu1 %v964_v18, %s3643_s18 }
 0xf80   :  { %v1080_v37 = vpop.permute.xlu0 %1079 }
 0xf81   :  { %v1082_v38 = vmul.f32 %v1080_v37, %v964_v18 }
 0xfe4   :  { %v1053_v32 = vpop.permute.xlu1 %1052 }
 0xfe5   :  { %v1055_v35 = vadd.f32 %v1053_v32, %v963_v25 }
 0xfe7   :  { %3450 = vtanh.f32 %v1055_v35 }
 0xff1   :  { %v3451_v36 = vpop.eup %3450 }
 0xff2   :  { %1059 = vrot.lane.b32.xlu0 %v3451_v36, %s3642_s1 }
 0xff5   :  { %v1073_v39 = vpop.permute.xlu1 %1072 }
 0xff6   :  { %1084 = vrot.lane.b32.xlu0 %v1082_v38, %s3643_s18 }
 0xff9   :  { %v1064_v41 = vpop.permute.xlu1 %1063 }
 0xffa   :  { %v1066_v44 = vmul.f32 %v3449_v29, %v1064_v41 }
0x1064   :  { %v1060_v43 = vpop.permute.xlu0 %1059 }
0x1065   :  { %v1062_v45 = vmul.f32 %v1060_v43, %v1057_v42 }
0x1067   :  { %v3928_v46 = vadd.f32 %v1066_v44, %v1062_v45 }
0x1068   :  { %v1085_v48 = vpop.permute.xlu0 %1084 }
0x1069   :  { %v1075_v47 = vmul.f32 %v1073_v39, %v3928_v46 }
0x106b   :  { %v1087_v49 = vadd.f32 %v1085_v48, %v1075_v47  ;;  %v1520_v47 = vld [vmem:[#allocation11 + $0x20] sm:$0xff]  ;;  %v1521_v48 = vld [vmem:[#allocation11 + $0x28] sm:$0xff] }
0x106d   :  { %1089 = vrot.lane.b32.xlu1 %v1087_v49, %s3642_s1  ;;  %v3964_v49 = vpack.c.bf16 %v1521_v48, %v1520_v47 }
0x10df   :  { %v1090_v50 = vpop.permute.xlu1 %1089 }
0x10e0   :  { %1092 = vst.msk [vmem:[#allocation4] sm:$0xf] %vm270_vm0, %v1090_v50 }
0x10e7   :  { %v1101_v51 = vld [vmem:[#allocation4] sm:$0xf] }
0x10e8   :  { %3142 = vmatmul.mubr.msk.f32.vlgmr.msra.gmra.mrb[10].mxu1 %vm150_vm2, %v1101_v51 }
0x11bb   :  { %v1171_v53 = vpop.f32.mrb[10].mxu1 }
0x11bc   :  { %v3143_v55 = vpop.f32.mrb[11].mxu1  ;;  %v1182_v56 = vadd.f32 %v1171_v53, %v3810_v34  ;;  %v1175_v59 = vadd.f32 %v1171_v53, %v1100_v58  ;;  %v1523_v53 = vld [vmem:[#allocation11 + $0x38] sm:$0xff] }
0x11bd   :  { %v3968_v55 = vpack.c.bf16 %v1523_v53, %v1522_v52 }
0x11be   :  { %1184 = vrot.lane.b32.xlu0 %v1182_v56, %s3634_s2  ;;  %v2917_v60 = vmul.f32 -1.442695, %v1175_v59 }
0x11c0   :  { %3452 = vpow2.f32 %v2917_v60 }
0x11c2   :  { %1216 = vperm.xlu0 %3407, %v1213_v57   ;;  %v1383_v57 = vld [vmem:[#allocation9 + $0x28] sm:$0xff] }
0x11ca   :  { %v3453_v62 = vpop.eup %3452 }
0x11cb   :  { %v1179_v63 = vadd.f32 1.0, %v3453_v62 }
0x11cd   :  { %3454 = vrcp.f32 %v1179_v63  ;;  %v1384_v63 = vld [vmem:[#allocation9 + $0x30] sm:$0xff] }
0x11d7   :  { %v3455_v2 = vpop.eup %3454 }
0x11d8   :  { %v1194_v15 = vsub.f32 1.0, %v3455_v2 }
0x1230   :  { %v1185_v3 = vpop.permute.xlu0 %1184 }
0x1231   :  { %v1187_v5 = vmul.f32 %v3455_v2, %v1185_v3 }
0x1233   :  { %1189 = vrot.lane.b32.xlu1 %v1187_v5, %s3634_s2 }
0x1237   :  { %1209 = vperm.xlu1 %3406, %v1206_v54  }
0x123b   :  { %1200 = vrot.lane.b32.xlu1 %v1101_v51, %s3643_s18 }
0x1241   :  { %v1217_v9 = vpop.permute.xlu0 %1216 }
0x1242   :  { %v1219_v10 = vmul.f32 %v1217_v9, %v1101_v51 }
0x12a5   :  { %v1190_v6 = vpop.permute.xlu1 %1189 }
0x12a6   :  { %v1192_v7 = vadd.f32 %v1190_v6, %v1100_v58 }
0x12a8   :  { %3456 = vtanh.f32 %v1192_v7 }
0x12b2   :  { %v3457_v8 = vpop.eup %3456 }
0x12b3   :  { %1196 = vrot.lane.b32.xlu0 %v3457_v8, %s3642_s1  ;;  %v2929_v8 = vld [vmem:[%s4227_s5 + $0x1] ss:$0 sm:$0xff] }
0x12b6   :  { %v1210_v13 = vpop.permute.xlu1 %1209 }
0x12b7   :  { %1221 = vrot.lane.b32.xlu0 %v1219_v10, %s3643_s18 }
0x12ba   :  { %v1201_v14 = vpop.permute.xlu1 %1200 }
0x12bb   :  { %v1203_v18 = vmul.f32 %v3455_v2, %v1201_v14  ;;  %v1385_v2 = vld [vmem:[#allocation9 + $0x38] sm:$0xff] }
0x12bc   :  { %v3331_v3 = vpack.c.bf16 %v1385_v2, %v1384_v63 }
0x1325   :  { %v1197_v16 = vpop.permute.xlu0 %1196 }
0x1326   :  { %v1199_v19 = vmul.f32 %v1197_v16, %v1194_v15 }
0x1328   :  { %v3943_v21 = vadd.f32 %v1203_v18, %v1199_v19  ;;  %v1640_v18 = vld [vmem:[#allocation5] sm:$0xf] }
0x1329   :  { %v1222_v23 = vpop.permute.xlu0 %1221 }
0x132a   :  { %v1212_v22 = vmul.f32 %v1210_v13, %v3943_v21 }
0x132c   :  { %v1224_v11 = vadd.f32 %v1222_v23, %v1212_v22  ;;  %v1647_v23 = vsub.f32 1.0, %v1640_v18 }
0x132e   :  { %1226 = vrot.lane.b32.xlu1 %v1224_v11, %s3642_s1  ;;  %v4012_v11 = vld [vmem:[%s4226_s4 + $0x1] ss:$0 sm:$0xff] }
0x13a0   :  { %v1227_v24 = vpop.permute.xlu1 %1226 }
0x13a1   :  { %1229 = vst.msk [vmem:[#allocation4] sm:$0xf] %vm270_vm0, %v1227_v24 }
0x13a8   :  { %v1238_v25 = vld [vmem:[#allocation4] sm:$0xf] }
0x13a9   :  { %3153 = vmatmul.mubr.msk.f32.vlgmr.msra.gmra.mrb[6].mxu0 %vm150_vm2, %v1238_v25 }
0x13aa   :  { %3177 = vmatprep.mubr.msk.f32.mxu0 %vm3639_vm1, %v3640_v1  ;;  %3337 = vmatpush3.bf16.msra.mxu0 %v3964_v49 }
0x13ab   :  { %3338 = vmatprep.subr.bf16.mxu0 %v3638_v0 }
0x13ae   :  { %3340 = vmatpush3.bf16.msra.mxu0 %v3968_v55 }
0x13af   :  { %3347 = vmatprep.subr.bf16.mxu0 %v3638_v0 }
0x147c   :  { %v1308_v17 = vpop.f32.mrb[6].mxu0 }
0x147d   :  { %v3154_v28 = vpop.f32.mrb[7].mxu0  ;;  %v1319_v29 = vadd.f32 %v1308_v17, %v3810_v34  ;;  %v1312_v32 = vadd.f32 %v1308_v17, %v1237_v31 }
0x147f   :  { %1321 = vrot.lane.b32.xlu0 %v1319_v29, %s3634_s2  ;;  %v2919_v35 = vmul.f32 -1.442695, %v1312_v32 }
0x1481   :  { %3458 = vpow2.f32 %v2919_v35 }
0x1483   :  { %1353 = vperm.xlu0 %3407, %v1350_v30  }
0x148b   :  { %v3459_v36 = vpop.eup %3458 }
0x148c   :  { %v1316_v37 = vadd.f32 1.0, %v3459_v36 }
0x148e   :  { %3460 = vrcp.f32 %v1316_v37 }
0x1498   :  { %v3461_v20 = vpop.eup %3460 }
0x1499   :  { %v1331_v51 = vsub.f32 1.0, %v3461_v20 }
0x14f1   :  { %v1322_v38 = vpop.permute.xlu0 %1321 }
0x14f2   :  { %v1324_v39 = vmul.f32 %v3461_v20, %v1322_v38 }
0x14f4   :  { %1326 = vrot.lane.b32.xlu1 %v1324_v39, %s3634_s2 }
0x14f8   :  { %1346 = vperm.xlu1 %3406, %v1343_v27  }
0x14fc   :  { %1337 = vrot.lane.b32.xlu1 %v1238_v25, %s3643_s18 }
0x1502   :  { %v1354_v43 = vpop.permute.xlu0 %1353 }
0x1503   :  { %v1356_v44 = vmul.f32 %v1354_v43, %v1238_v25 }
0x1566   :  { %v1327_v34 = vpop.permute.xlu1 %1326 }
0x1567   :  { %v1329_v41 = vadd.f32 %v1327_v34, %v1237_v31 }
0x1569   :  { %3462 = vtanh.f32 %v1329_v41 }
0x1573   :  { %v3463_v42 = vpop.eup %3462 }
0x1574   :  { %1333 = vrot.lane.b32.xlu0 %v3463_v42, %s3642_s1 }
0x1577   :  { %v1347_v45 = vpop.permute.xlu1 %1346 }
0x1578   :  { %1358 = vrot.lane.b32.xlu0 %v1356_v44, %s3643_s18 }
0x157b   :  { %v1338_v50 = vpop.permute.xlu1 %1337 }
0x157c   :  { %410 = vrot.lane.b32.xlu0 %v3824_v61, %s3642_s1  ;;  %v1340_v61 = vmul.f32 %v3461_v20, %v1338_v50 }
0x1580   :  { %683 = vrot.lane.b32.xlu0 %v3866_v4, %s3642_s1  ;;  %v1382_v4 = vld [vmem:[#allocation9 + $0x20] sm:$0xff] }
0x1581   :  { %v3327_v59 = vpack.c.bf16 %v1383_v57, %v1382_v4 }
0x1583   :  { %3328 = vmatprep.subr.bf16.mxu1 %v3327_v59 }
0x1584   :  { %3330 = vmatpush3.bf16.msra.mxu1 %v3327_v59  ;;  %1614 = vrot.lane.b32.xlu0 %v2929_v8, %s3634_s2 }
0x1585   :  { %3332 = vmatprep.subr.bf16.mxu1 %v3331_v3 }
0x1588   :  { %3334 = vmatpush3.bf16.msra.mxu1 %v3331_v3 }
0x1589   :  { %3341 = vmatprep.subr.bf16.mxu1 %v3638_v0 }
0x15e6   :  { %v1334_v54 = vpop.permute.xlu0 %1333 }
0x15e7   :  { %v1336_v56 = vmul.f32 %v1334_v54, %v1331_v51 }
0x15e9   :  { %v3971_v58 = vadd.f32 %v1340_v61, %v1336_v56 }
0x15ea   :  { %v1359_v60 = vpop.permute.xlu0 %1358 }
0x15eb   :  { %v1349_v62 = vmul.f32 %v1347_v45, %v3971_v58 }
0x15ed   :  { %v1361_v5 = vadd.f32 %v1359_v60, %v1349_v62 }
0x15ee   :  { %v411_v6 = vpop.permute.xlu0 %410 }
0x15ef   :  { %413 = vst.msk [vmem:[#allocation2] sm:$0xf] %vm270_vm0, %v411_v6  ;;  %1363 = vrot.lane.b32.xlu1 %v1361_v5, %s3642_s1  ;;  %v1774_v6 = vld [vmem:[#allocation5 + $0x4] sm:$0xf] }
0x15f2   :  { %v684_v7 = vpop.permute.xlu0 %683 }
0x15f3   :  { %687 = vst.msk [vmem:[#allocation2 + $0x8] sm:$0xf] %vm270_vm0, %v684_v7  ;;  %546 = vrot.lane.b32.xlu1 %v3845_v33, %s3642_s1 }
0x15f6   :  { %v4005_v15 = vpop.permute.xlu0 %1614 }
0x15f7   :  { %820 = vrot.lane.b32.xlu1 %v3887_v40, %s3642_s1 }
0x1661   :  { %v1364_v9 = vpop.permute.xlu1 %1363 }
0x1662   :  { %1366 = vst.msk [vmem:[#allocation4] sm:$0xf] %vm270_vm0, %v1364_v9  ;;  %v1781_v9 = vsub.f32 1.0, %v1774_v6 }
0x1663   :  { %1526 = vst.msk [vmem:[#allocation4] sm:$0xf] %vm270_vm0, %v3640_v1 }
0x1665   :  { %v547_v10 = vpop.permute.xlu1 %546 }
0x1666   :  { %550 = vst.msk [vmem:[#allocation2 + $0x4] sm:$0xf] %vm270_vm0, %v547_v10 }
0x1669   :  { %v821_v13 = vpop.permute.xlu1 %820 }
0x166a   :  { %824 = vst.msk [vmem:[#allocation2 + $0xc] sm:$0xf] %vm270_vm0, %v821_v13  ;;  %v1528_v33 = vld [vmem:[#allocation4] sm:$0xf] }
0x166b   :  { %3178 = vmatmul.mubr.msk.f32.vlgmr.msra.gmra.mrb[8].mxu0 %vm150_vm2, %v1528_v33 }
0x166c   :  { %3349 = vmatpush3.bf16.msra.mxu0 %v3964_v49  ;;  %3199 = vmatprep.mubr.msk.f32.mxu0 %vm3639_vm1, %v3640_v1 }
0x166d   :  { %v3412_v40 = vld [vmem:[#allocation2] sm:$0xff]   ;;  %3350 = vmatprep.subr.bf16.mxu0 %v3638_v0 }
0x166e   :  { %3163 = vmatprep.mubr.msk.f32.mxu1 %vm150_vm2, %v3412_v40 }
0x1670   :  { %3352 = vmatpush3.bf16.msra.mxu0 %v3968_v55 }
0x1671   :  { %v3413_v14 = vld [vmem:[#allocation2 + $0x8] sm:$0xff]   ;;  %3359 = vmatprep.subr.bf16.mxu0 %v3638_v0 }
0x1672   :  { %3164 = vmatmul.mubr.msk.f32.vlgmr.msra.gmra.mrb[12].mxu1 %vm150_vm2, %v3413_v14 }
0x1673   :  { %3343 = vmatpush3.bf16.msra.mxu1 %v3964_v49 }
0x1674   :  { %3344 = vmatprep.subr.bf16.mxu1 %v3638_v0 }
0x1677   :  { %3346 = vmatpush3.bf16.msra.mxu1 %v3968_v55 }
0x1678   :  { %3353 = vmatprep.subr.bf16.mxu1 %v3638_v0 }
0x173e   :  { %v1598_v16 = vpop.f32.mrb[8].mxu0 }
0x173f   :  { %v3179_v19 = vpop.f32.mrb[9].mxu0  ;;  %v1617_v22 = vadd.f32 %v4005_v15, %v1598_v16 }
0x1741   :  { %1619 = vrot.lane.b32.xlu1 %v1617_v22, %s3634_s2 }
0x1745   :  { %1650 = vperm.xlu1 %3406, %v1647_v23   ;;  %v3165_v24 = vpop.f32.mrb[12].mxu1 }
0x1746   :  { %v1486_v25 = vadd.f32 %v3165_v24, %v4012_v11  ;;  %v1480_v26 = vpop.f32.mrb[13].mxu1 }
0x1747   :  { %v1481_v17 = vadd.f32 %v4012_v11, %v1480_v26 }
0x1748   :  { %v1504_v27 = vcombine.high %v1486_v25, %v1486_v25  ;;  %1513 = vst.msk [vmem:[#allocation3 + $0x8] sm:$0xf] %vm256_vm5, %v1486_v25 }
0x1749   :  { %v1503_v28 = vcombine.high %v1481_v17, %v1481_v17  ;;  %1511 = vst.msk [vmem:[#allocation3] sm:$0xf] %vm256_vm5, %v1481_v17 }
0x174a   :  { %1514 = vst.msk [vmem:[#allocation3 + $0xc] sm:$0xf] %vm256_vm5, %v1504_v27 }
0x174b   :  { %1512 = vst.msk [vmem:[#allocation3 + $0x4] sm:$0xf] %vm256_vm5, %v1503_v28 }
0x1750   :  { %v1527_v29 = vld [vmem:[#allocation3] sm:$0xf] }
0x1751   :  { %v1602_v30 = vadd.f32 %v1598_v16, %v1527_v29 }
0x1752   :  { %v1669_v10 = vld [vmem:[#allocation3 + $0x4] sm:$0xf] }
0x1753   :  { %v2928_v31 = vmul.f32 -1.442695, %v1602_v30 }
0x1755   :  { %3464 = vpow2.f32 %v2928_v31 }
0x175f   :  { %v3465_v32 = vpop.eup %3464 }
0x1760   :  { %v1606_v35 = vadd.f32 1.0, %v3465_v32 }
0x1762   :  { %3466 = vrcp.f32 %v1606_v35 }
0x176c   :  { %v3467_v36 = vpop.eup %3466 }
0x17b3   :  { %v1620_v37 = vpop.permute.xlu1 %1619 }
0x17b4   :  { %v1622_v20 = vmul.f32 %v3467_v36, %v1620_v37 }
0x17b6   :  { %1624 = vrot.lane.b32.xlu0 %v1622_v20, %s3634_s2 }
0x17ba   :  { %1643 = vperm.xlu0 %3407, %v1640_v18  }
0x17be   :  { %1635 = vrot.lane.b32.xlu0 %v1528_v33, %s3643_s18 }
0x17c2   :  { %957 = vrot.lane.b32.xlu0 %v3907_v12, %s3642_s1 }
0x17c4   :  { %v1651_v41 = vpop.permute.xlu1 %1650 }
0x17c5   :  { %v1653_v42 = vmul.f32 %v1651_v41, %v1528_v33 }
0x17c6   :  { %1231 = vrot.lane.b32.xlu0 %v3943_v21, %s3642_s1  ;;  %v1629_v21 = vsub.f32 1.0, %v3467_v36 }
0x1828   :  { %v1625_v38 = vpop.permute.xlu0 %1624 }
0x1829   :  { %v1627_v39 = vadd.f32 %v1625_v38, %v1527_v29 }
0x182b   :  { %3468 = vtanh.f32 %v1627_v39  ;;  %v1908_v39 = vld [vmem:[#allocation5 + $0x8] sm:$0xf] }
0x1835   :  { %v3469_v34 = vpop.eup %3468 }
0x1836   :  { %1631 = vrot.lane.b32.xlu1 %v3469_v34, %s3642_s1 }
0x1839   :  { %v1644_v43 = vpop.permute.xlu0 %1643 }
0x183a   :  { %1655 = vrot.lane.b32.xlu1 %v1653_v42, %s3643_s18  ;;  %v1915_v42 = vsub.f32 1.0, %v1908_v39 }
0x183d   :  { %v1636_v44 = vpop.permute.xlu0 %1635 }
0x183e   :  { %1094 = vrot.lane.b32.xlu1 %v3928_v46, %s3642_s1  ;;  %v1638_v48 = vmul.f32 %v3467_v36, %v1636_v44 }
0x1841   :  { %v958_v45 = vpop.permute.xlu0 %957 }
0x1842   :  { %961 = vst.msk [vmem:[#allocation2 + $0x10] sm:$0xf] %vm270_vm0, %v958_v45  ;;  %1368 = vrot.lane.b32.xlu1 %v3971_v58, %s3642_s1 }
0x1845   :  { %v1232_v12 = vpop.permute.xlu0 %1231 }
0x1846   :  { %1235 = vst.msk [vmem:[#allocation2 + $0x18] sm:$0xf] %vm270_vm0, %v1232_v12 }
0x18a8   :  { %v1632_v47 = vpop.permute.xlu1 %1631 }
0x18a9   :  { %v1634_v50 = vmul.f32 %v1632_v47, %v1629_v21 }
0x18ab   :  { %v4034_v51 = vadd.f32 %v1638_v48, %v1634_v50 }
0x18ac   :  { %v1656_v52 = vpop.permute.xlu1 %1655 }
0x18ad   :  { %v1646_v53 = vmul.f32 %v1644_v43, %v4034_v51  ;;  %v1803_v43 = vld [vmem:[#allocation3 + $0x8] sm:$0xf] }
0x18af   :  { %v1658_v54 = vadd.f32 %v1656_v52, %v1646_v53 }
0x18b0   :  { %v1095_v46 = vpop.permute.xlu1 %1094 }
0x18b1   :  { %1098 = vst.msk [vmem:[#allocation2 + $0x14] sm:$0xf] %vm270_vm0, %v1095_v46  ;;  %1660 = vrot.lane.b32.xlu0 %v1658_v54, %s3642_s1 }
0x18b4   :  { %v1369_v61 = vpop.permute.xlu1 %1368 }
0x18b5   :  { %1372 = vst.msk [vmem:[#allocation2 + $0x1c] sm:$0xf] %vm270_vm0, %v1369_v61 }
0x18b8   :  { %v3414_v56 = vld [vmem:[#allocation2 + $0x10] sm:$0xff]  }
0x18b9   :  { %3166 = vmatprep.mubr.msk.f32.mxu1 %vm150_vm2, %v3414_v56 }
0x18bc   :  { %v3415_v4 = vld [vmem:[#allocation2 + $0x18] sm:$0xff]  }
0x18bd   :  { %3167 = vmatmul.mubr.msk.f32.gmra.mrb[14].mxu1 %vm150_vm2, %v3415_v4 }
0x18be   :  { %3188 = vmatprep.mubr.msk.f32.mxu1 %vm3639_vm1, %v3640_v1 }
0x1923   :  { %v1661_v57 = vpop.permute.xlu0 %1660 }
0x1924   :  { %1663 = vst.msk [vmem:[#allocation4] sm:$0xf] %vm270_vm0, %v1661_v57 }
0x192b   :  { %v1670_v58 = vld [vmem:[#allocation4] sm:$0xf] }
0x192c   :  { %3189 = vmatmul.mubr.msk.f32.vlgmr.msra.gmra.mrb[16].mxu1 %vm150_vm2, %v1670_v58 }
0x192d   :  { %3355 = vmatpush3.bf16.msra.mxu1 %v3964_v49  ;;  %3210 = vmatprep.mubr.msk.f32.mxu1 %vm3639_vm1, %v3640_v1 }
0x192e   :  { %3356 = vmatprep.subr.bf16.mxu1 %v3638_v0 }
0x1931   :  { %3358 = vmatpush3.bf16.msra.mxu1 %v3968_v55 }
0x1932   :  { %3365 = vmatprep.subr.bf16.mxu1 %v3638_v0 }
0x1990   :  { %v3168_v59 = vpop.f32.mrb[14].mxu1 }
0x1991   :  { %v1496_v60 = vadd.f32 %v3168_v59, %v4012_v11  ;;  %v1490_v62 = vpop.f32.mrb[15].mxu1 }
0x1992   :  { %v1491_v63 = vadd.f32 %v4012_v11, %v1490_v62 }
0x1993   :  { %v1506_v2 = vcombine.high %v1496_v60, %v1496_v60  ;;  %1517 = vst.msk [vmem:[#allocation3 + $0x18] sm:$0xf] %vm256_vm5, %v1496_v60 }
0x1994   :  { %v1505_v3 = vcombine.high %v1491_v63, %v1491_v63  ;;  %1515 = vst.msk [vmem:[#allocation3 + $0x10] sm:$0xf] %vm256_vm5, %v1491_v63 }
0x1995   :  { %1518 = vst.msk [vmem:[#allocation3 + $0x1c] sm:$0xf] %vm256_vm5, %v1506_v2 }
0x1996   :  { %1516 = vst.msk [vmem:[#allocation3 + $0x14] sm:$0xf] %vm256_vm5, %v1505_v3 }
0x19ff   :  { %v1740_v5 = vpop.f32.mrb[16].mxu1 }
0x1a00   :  { %v3190_v7 = vpop.f32.mrb[17].mxu1  ;;  %v1751_v8 = vadd.f32 %v1740_v5, %v4005_v15  ;;  %v1744_v13 = vadd.f32 %v1740_v5, %v1669_v10 }
0x1a02   :  { %1753 = vrot.lane.b32.xlu1 %v1751_v8, %s3634_s2  ;;  %v2931_v33 = vmul.f32 -1.442695, %v1744_v13  ;;  %v2042_v8 = vld [vmem:[#allocation5 + $0xc] sm:$0xf] }
0x1a03   :  { %v2049_v13 = vsub.f32 1.0, %v2042_v8 }
0x1a04   :  { %3470 = vpow2.f32 %v2931_v33  ;;  %v1937_v33 = vld [vmem:[#allocation3 + $0xc] sm:$0xf] }
0x1a06   :  { %1784 = vperm.xlu1 %3406, %v1781_v9  }
0x1a0e   :  { %v3471_v40 = vpop.eup %3470 }
0x1a0f   :  { %v1748_v14 = vadd.f32 1.0, %v3471_v40 }
0x1a11   :  { %3472 = vrcp.f32 %v1748_v14 }
0x1a1b   :  { %v3473_v16 = vpop.eup %3472 }
0x1a1c   :  { %v1763_v27 = vsub.f32 1.0, %v3473_v16 }
0x1a74   :  { %v1754_v18 = vpop.permute.xlu1 %1753 }
0x1a75   :  { %v1756_v19 = vmul.f32 %v3473_v16, %v1754_v18 }
0x1a77   :  { %1758 = vrot.lane.b32.xlu0 %v1756_v19, %s3634_s2 }
0x1a7b   :  { %1777 = vperm.xlu0 %3407, %v1774_v6  }
0x1a7f   :  { %1769 = vrot.lane.b32.xlu0 %v1670_v58, %s3643_s18 }
0x1a85   :  { %v1785_v24 = vpop.permute.xlu1 %1784 }
0x1a86   :  { %v1787_v25 = vmul.f32 %v1785_v24, %v1670_v58 }
0x1ae9   :  { %v1759_v22 = vpop.permute.xlu0 %1758 }
0x1aea   :  { %v1761_v23 = vadd.f32 %v1759_v22, %v1669_v10 }
0x1aec   :  { %3474 = vtanh.f32 %v1761_v23 }
0x1af6   :  { %v3475_v11 = vpop.eup %3474 }
0x1af7   :  { %1765 = vrot.lane.b32.xlu1 %v3475_v11, %s3642_s1 }
0x1afa   :  { %v1778_v26 = vpop.permute.xlu0 %1777 }
0x1afb   :  { %1789 = vrot.lane.b32.xlu1 %v1787_v25, %s3643_s18 }
0x1afe   :  { %v1770_v17 = vpop.permute.xlu0 %1769 }
0x1aff   :  { %v1772_v29 = vmul.f32 %v3473_v16, %v1770_v17 }
0x1b69   :  { %v1766_v28 = vpop.permute.xlu1 %1765 }
0x1b6a   :  { %v1768_v30 = vmul.f32 %v1766_v28, %v1763_v27 }
0x1b6c   :  { %v4064_v31 = vadd.f32 %v1772_v29, %v1768_v30 }
0x1b6d   :  { %v1790_v35 = vpop.permute.xlu1 %1789 }
0x1b6e   :  { %v1780_v32 = vmul.f32 %v1778_v26, %v4064_v31 }
0x1b70   :  { %v1792_v36 = vadd.f32 %v1790_v35, %v1780_v32 }
0x1b72   :  { %1794 = vrot.lane.b32.xlu0 %v1792_v36, %s3642_s1 }
0x1be4   :  { %v1795_v37 = vpop.permute.xlu0 %1794 }
0x1be5   :  { %1797 = vst.msk [vmem:[#allocation4] sm:$0xf] %vm270_vm0, %v1795_v37 }
0x1bec   :  { %v1804_v20 = vld [vmem:[#allocation4] sm:$0xf] }
0x1bed   :  { %3200 = vmatmul.mubr.msk.f32.vlgmr.msra.gmra.mrb[10].mxu0 %vm150_vm2, %v1804_v20 }
0x1bee   :  { %3361 = vmatpush3.bf16.msra.mxu0 %v3964_v49  ;;  %3221 = vmatprep.mubr.msk.f32.mxu0 %vm3639_vm1, %v3640_v1 }
0x1bef   :  { %3362 = vmatprep.subr.bf16.mxu0 %v3638_v0 }
0x1bf2   :  { %3364 = vmatpush3.bf16.msra.mxu0 %v3968_v55 }
0x1bf3   :  { %3371 = vmatprep.subr.bf16.mxu0 %v3638_v0 }
0x1cc0   :  { %v1874_v38 = vpop.f32.mrb[10].mxu0 }
0x1cc1   :  { %v3201_v34 = vpop.f32.mrb[11].mxu0  ;;  %v1885_v41 = vadd.f32 %v1874_v38, %v4005_v15  ;;  %v1878_v44 = vadd.f32 %v1874_v38, %v1803_v43 }
0x1cc3   :  { %1887 = vrot.lane.b32.xlu1 %v1885_v41, %s3634_s2  ;;  %v2933_v45 = vmul.f32 -1.442695, %v1878_v44 }
0x1cc5   :  { %3476 = vpow2.f32 %v2933_v45 }
0x1cc7   :  { %1918 = vperm.xlu1 %3406, %v1915_v42   ;;  %v2176_v42 = vld [vmem:[#allocation5 + $0x10] sm:$0xf] }
0x1cc8   :  { %v2183_v45 = vsub.f32 1.0, %v2176_v42 }
0x1ccf   :  { %v3477_v12 = vpop.eup %3476 }
0x1cd0   :  { %v1882_v21 = vadd.f32 1.0, %v3477_v12  ;;  %v2071_v12 = vld [vmem:[#allocation3 + $0x10] sm:$0xf] }
0x1cd2   :  { %3478 = vrcp.f32 %v1882_v21 }
0x1cdc   :  { %v3479_v47 = vpop.eup %3478 }
0x1cdd   :  { %v1897_v57 = vsub.f32 1.0, %v3479_v47 }
0x1d35   :  { %v1888_v48 = vpop.permute.xlu1 %1887 }
0x1d36   :  { %v1890_v50 = vmul.f32 %v3479_v47, %v1888_v48 }
0x1d38   :  { %1892 = vrot.lane.b32.xlu0 %v1890_v50, %s3634_s2 }
0x1d3c   :  { %1911 = vperm.xlu0 %3407, %v1908_v39  }
0x1d40   :  { %1903 = vrot.lane.b32.xlu0 %v1804_v20, %s3643_s18 }
0x1d46   :  { %v1919_v46 = vpop.permute.xlu1 %1918 }
0x1d47   :  { %v1921_v61 = vmul.f32 %v1919_v46, %v1804_v20 }
0x1daa   :  { %v1893_v52 = vpop.permute.xlu0 %1892 }
0x1dab   :  { %v1895_v53 = vadd.f32 %v1893_v52, %v1803_v43 }
0x1dad   :  { %3480 = vtanh.f32 %v1895_v53 }
0x1db7   :  { %v3481_v54 = vpop.eup %3480 }
0x1db8   :  { %1899 = vrot.lane.b32.xlu1 %v3481_v54, %s3642_s1 }
0x1dbb   :  { %v1912_v56 = vpop.permute.xlu0 %1911 }
0x1dbc   :  { %1923 = vrot.lane.b32.xlu1 %v1921_v61, %s3643_s18 }
0x1dbf   :  { %v1904_v4 = vpop.permute.xlu0 %1903 }
0x1dc0   :  { %v1906_v59 = vmul.f32 %v3479_v47, %v1904_v4 }
0x1e2a   :  { %v1900_v58 = vpop.permute.xlu1 %1899 }
0x1e2b   :  { %v1902_v60 = vmul.f32 %v1900_v58, %v1897_v57 }
0x1e2d   :  { %v4082_v62 = vadd.f32 %v1906_v59, %v1902_v60 }
0x1e2e   :  { %v1924_v2 = vpop.permute.xlu1 %1923 }
0x1e2f   :  { %v1914_v63 = vmul.f32 %v1912_v56, %v4082_v62 }
0x1e31   :  { %v1926_v3 = vadd.f32 %v1924_v2, %v1914_v63 }
0x1e33   :  { %1928 = vrot.lane.b32.xlu0 %v1926_v3, %s3642_s1 }
0x1ea5   :  { %v1929_v5 = vpop.permute.xlu0 %1928 }
0x1ea6   :  { %1931 = vst.msk [vmem:[#allocation4] sm:$0xf] %vm270_vm0, %v1929_v5 }
0x1ead   :  { %v1938_v6 = vld [vmem:[#allocation4] sm:$0xf] }
0x1eae   :  { %3211 = vmatmul.mubr.msk.f32.vlgmr.msra.gmra.mrb[18].mxu1 %vm150_vm2, %v1938_v6 }
0x1eaf   :  { %3367 = vmatpush3.bf16.msra.mxu1 %v3964_v49  ;;  %3232 = vmatprep.mubr.msk.f32.mxu1 %vm3639_vm1, %v3640_v1 }
0x1eb0   :  { %3368 = vmatprep.subr.bf16.mxu1 %v3638_v0 }
0x1eb3   :  { %3370 = vmatpush3.bf16.msra.mxu1 %v3968_v55 }
0x1eb4   :  { %3377 = vmatprep.subr.bf16.mxu1 %v3638_v0 }
0x1f81   :  { %v2008_v7 = vpop.f32.mrb[18].mxu1 }
0x1f82   :  { %v2019_v9 = vadd.f32 %v2008_v7, %v4005_v15  ;;  %v3212_v10 = vpop.f32.mrb[19].mxu1  ;;  %v2012_v40 = vadd.f32 %v2008_v7, %v1937_v33 }
0x1f84   :  { %2021 = vrot.lane.b32.xlu1 %v2019_v9, %s3634_s2  ;;  %v2935_v14 = vmul.f32 -1.442695, %v2012_v40 }
0x1f86   :  { %3482 = vpow2.f32 %v2935_v14 }
0x1f88   :  { %2052 = vperm.xlu1 %3406, %v2049_v13  }
0x1f90   :  { %v3483_v16 = vpop.eup %3482 }
0x1f91   :  { %v2016_v18 = vadd.f32 1.0, %v3483_v16 }
0x1f93   :  { %3484 = vrcp.f32 %v2016_v18  ;;  %v2205_v18 = vld [vmem:[#allocation3 + $0x14] sm:$0xf] }
0x1f9d   :  { %v3485_v19 = vpop.eup %3484 }
0x1f9e   :  { %v2031_v29 = vsub.f32 1.0, %v3485_v19 }
0x1ff6   :  { %v2022_v22 = vpop.permute.xlu1 %2021 }
0x1ff7   :  { %v2024_v23 = vmul.f32 %v3485_v19, %v2022_v22 }
0x1ff9   :  { %2026 = vrot.lane.b32.xlu0 %v2024_v23, %s3634_s2 }
0x1ffd   :  { %2045 = vperm.xlu0 %3407, %v2042_v8  }
0x2001   :  { %2037 = vrot.lane.b32.xlu0 %v1938_v6, %s3643_s18 }
0x2007   :  { %v2053_v26 = vpop.permute.xlu1 %2052 }
0x2008   :  { %v2055_v17 = vmul.f32 %v2053_v26, %v1938_v6 }
0x206b   :  { %v2027_v11 = vpop.permute.xlu0 %2026 }
0x206c   :  { %v2029_v24 = vadd.f32 %v2027_v11, %v1937_v33  ;;  %v2310_v33 = vld [vmem:[#allocation5 + $0x14] sm:$0xf] }
0x206d   :  { %v2317_v16 = vsub.f32 1.0, %v2310_v33 }
0x206e   :  { %3486 = vtanh.f32 %v2029_v24 }
0x2078   :  { %v3487_v25 = vpop.eup %3486 }
0x2079   :  { %2033 = vrot.lane.b32.xlu1 %v3487_v25, %s3642_s1 }
0x207c   :  { %v2046_v27 = vpop.permute.xlu0 %2045 }
0x207d   :  { %2057 = vrot.lane.b32.xlu1 %v2055_v17, %s3643_s18 }
0x2080   :  { %v2038_v28 = vpop.permute.xlu0 %2037 }
0x2081   :  { %v2040_v32 = vmul.f32 %v3485_v19, %v2038_v28 }
0x20eb   :  { %v2034_v30 = vpop.permute.xlu1 %2033 }
0x20ec   :  { %v2036_v35 = vmul.f32 %v2034_v30, %v2031_v29 }
0x20ee   :  { %v4100_v36 = vadd.f32 %v2040_v32, %v2036_v35 }
0x20ef   :  { %v2058_v20 = vpop.permute.xlu1 %2057 }
0x20f0   :  { %v2048_v37 = vmul.f32 %v2046_v27, %v4100_v36 }
0x20f2   :  { %v2060_v38 = vadd.f32 %v2058_v20, %v2048_v37 }
0x20f4   :  { %2062 = vrot.lane.b32.xlu0 %v2060_v38, %s3642_s1 }
0x2166   :  { %v2063_v39 = vpop.permute.xlu0 %2062 }
0x2167   :  { %2065 = vst.msk [vmem:[#allocation4] sm:$0xf] %vm270_vm0, %v2063_v39 }
0x216e   :  { %v2072_v34 = vld [vmem:[#allocation4] sm:$0xf] }
0x216f   :  { %3222 = vmatmul.mubr.msk.f32.vlgmr.msra.gmra.mrb[12].mxu0 %vm150_vm2, %v2072_v34 }
0x2170   :  { %3373 = vmatpush3.bf16.msra.mxu0 %v3964_v49  ;;  %3243 = vmatprep.mubr.msk.f32.mxu0 %vm3639_vm1, %v3640_v1 }
0x2171   :  { %3374 = vmatprep.subr.bf16.mxu0 %v3638_v0 }
0x2174   :  { %3376 = vmatpush3.bf16.msra.mxu0 %v3968_v55 }
0x2242   :  { %v2142_v41 = vpop.f32.mrb[12].mxu0 }
0x2243   :  { %v2153_v43 = vadd.f32 %v2142_v41, %v4005_v15  ;;  %v3223_v44 = vpop.f32.mrb[13].mxu0  ;;  %v2146_v21 = vadd.f32 %v2142_v41, %v2071_v12 }
0x2245   :  { %2155 = vrot.lane.b32.xlu1 %v2153_v43, %s3634_s2  ;;  %v2937_v47 = vmul.f32 -1.442695, %v2146_v21  ;;  %v2444_v43 = vld [vmem:[#allocation5 + $0x18] sm:$0xf]  ;;  %v2339_v21 = vld [vmem:[#allocation3 + $0x18] sm:$0xf] }
0x2247   :  { %3488 = vpow2.f32 %v2937_v47 }
0x2249   :  { %2186 = vperm.xlu1 %3406, %v2183_v45  }
0x2251   :  { %v3489_v48 = vpop.eup %3488 }
0x2252   :  { %v2150_v50 = vadd.f32 1.0, %v3489_v48 }
0x2254   :  { %3490 = vrcp.f32 %v2150_v50 }
0x225e   :  { %v3491_v52 = vpop.eup %3490 }
0x225f   :  { %v2165_v60 = vsub.f32 1.0, %v3491_v52 }
0x22b7   :  { %v2156_v53 = vpop.permute.xlu1 %2155 }
0x22b8   :  { %v2158_v54 = vmul.f32 %v3491_v52, %v2156_v53 }
0x22ba   :  { %2160 = vrot.lane.b32.xlu0 %v2158_v54, %s3634_s2 }
0x22be   :  { %2179 = vperm.xlu0 %3407, %v2176_v42  }
0x22c2   :  { %2171 = vrot.lane.b32.xlu0 %v2072_v34, %s3643_s18 }
0x22c8   :  { %v2187_v4 = vpop.permute.xlu1 %2186 }
0x22c9   :  { %v2189_v57 = vmul.f32 %v2187_v4, %v2072_v34 }
0x232c   :  { %v2161_v46 = vpop.permute.xlu0 %2160 }
0x232d   :  { %v2163_v61 = vadd.f32 %v2161_v46, %v2071_v12  ;;  %v2451_v12 = vsub.f32 1.0, %v2444_v43 }
0x232f   :  { %3492 = vtanh.f32 %v2163_v61 }
0x2339   :  { %v3493_v56 = vpop.eup %3492 }
0x233a   :  { %2167 = vrot.lane.b32.xlu1 %v3493_v56, %s3642_s1 }
0x233d   :  { %v2180_v58 = vpop.permute.xlu0 %2179 }
0x233e   :  { %2191 = vrot.lane.b32.xlu1 %v2189_v57, %s3643_s18 }
0x2341   :  { %v2172_v59 = vpop.permute.xlu0 %2171 }
0x2342   :  { %v2174_v2 = vmul.f32 %v3491_v52, %v2172_v59 }
0x23ac   :  { %v2168_v63 = vpop.permute.xlu1 %2167 }
0x23ad   :  { %v2170_v3 = vmul.f32 %v2168_v63, %v2165_v60 }
0x23af   :  { %v4117_v5 = vadd.f32 %v2174_v2, %v2170_v3 }
0x23b0   :  { %v2192_v7 = vpop.permute.xlu1 %2191 }
0x23b1   :  { %v2182_v6 = vmul.f32 %v2180_v58, %v4117_v5 }
0x23b3   :  { %v2194_v8 = vadd.f32 %v2192_v7, %v2182_v6 }
0x23b5   :  { %2196 = vrot.lane.b32.xlu0 %v2194_v8, %s3642_s1 }
0x2427   :  { %v2197_v9 = vpop.permute.xlu0 %2196 }
0x2428   :  { %2199 = vst.msk [vmem:[#allocation4] sm:$0xf] %vm270_vm0, %v2197_v9 }
0x242f   :  { %v2206_v10 = vld [vmem:[#allocation4] sm:$0xf] }
0x2430   :  { %3233 = vmatmul.mubr.msk.f32.vlgmr.msra.gmra.mrb[20].mxu1 %vm150_vm2, %v2206_v10 }
0x2431   :  { %3379 = vmatpush3.bf16.msra.mxu1 %v3964_v49  ;;  %3254 = vmatprep.mubr.msk.f32.mxu1 %vm3639_vm1, %v3640_v1 }
0x2432   :  { %3380 = vmatprep.subr.bf16.mxu1 %v3638_v0 }
0x2435   :  { %3382 = vmatpush3.bf16.msra.mxu1 %v3968_v55 }
0x2503   :  { %v2276_v13 = vpop.f32.mrb[20].mxu1 }
0x2504   :  { %v2287_v40 = vadd.f32 %v2276_v13, %v4005_v15  ;;  %v3234_v14 = vpop.f32.mrb[21].mxu1  ;;  %v2280_v19 = vadd.f32 %v2276_v13, %v2205_v18 }
0x2506   :  { %2289 = vrot.lane.b32.xlu1 %v2287_v40, %s3634_s2  ;;  %v2939_v22 = vmul.f32 -1.442695, %v2280_v19 }
0x2508   :  { %3494 = vpow2.f32 %v2939_v22 }
0x250a   :  { %2320 = vperm.xlu1 %3406, %v2317_v16  }
0x2512   :  { %v3495_v49 = vpop.eup %3494 }
0x2513   :  { %v2284_v23 = vadd.f32 1.0, %v3495_v49 }
0x2515   :  { %3496 = vrcp.f32 %v2284_v23 }
0x251f   :  { %v3497_v1 = vpop.eup %3496 }
0x2520   :  { %v2299_v29 = vsub.f32 1.0, %v3497_v1 }
0x2578   :  { %v2290_v0 = vpop.permute.xlu1 %2289 }
0x2579   :  { %v2292_v11 = vmul.f32 %v3497_v1, %v2290_v0 }
0x257b   :  { %2294 = vrot.lane.b32.xlu0 %v2292_v11, %s3634_s2 }
0x257f   :  { %2313 = vperm.xlu0 %3407, %v2310_v33  }
0x2583   :  { %2305 = vrot.lane.b32.xlu0 %v2206_v10, %s3643_s18 }
0x2589   :  { %v2321_v26 = vpop.permute.xlu1 %2320 }
0x258a   :  { %v2323_v17 = vmul.f32 %v2321_v26, %v2206_v10 }
0x25ed   :  { %v2295_v55 = vpop.permute.xlu0 %2294 }
0x25ee   :  { %v2297_v24 = vadd.f32 %v2295_v55, %v2205_v18  ;;  %v2473_v18 = vld [vmem:[#allocation3 + $0x1c] sm:$0xf] }
0x25f0   :  { %3498 = vtanh.f32 %v2297_v24  ;;  %v2610_v24 = vld [vmem:[#allocation5 + $0xc] sm:$0xf] }
0x25f1   :  { %v2674_v26 = vsub.f32 1.0, %v2610_v24 }
0x25fa   :  { %v3499_v25 = vpop.eup %3498 }
0x25fb   :  { %2301 = vrot.lane.b32.xlu1 %v3499_v25, %s3642_s1 }
0x25fe   :  { %v2314_v27 = vpop.permute.xlu0 %2313 }
0x25ff   :  { %2325 = vrot.lane.b32.xlu1 %v2323_v17, %s3643_s18  ;;  %v2682_v17 = vmul.f32 -1.0, %v2674_v26 }
0x2602   :  { %v2306_v28 = vpop.permute.xlu0 %2305 }
0x2603   :  { %v2308_v32 = vmul.f32 %v3497_v1, %v2306_v28 }
0x266d   :  { %v2302_v30 = vpop.permute.xlu1 %2301 }
0x266e   :  { %v2304_v35 = vmul.f32 %v2302_v30, %v2299_v29 }
0x2670   :  { %v4134_v37 = vadd.f32 %v2308_v32, %v2304_v35 }
0x2671   :  { %v2326_v38 = vpop.permute.xlu1 %2325 }
0x2672   :  { %v2316_v20 = vmul.f32 %v2314_v27, %v4134_v37  ;;  %v2612_v27 = vld [vmem:[#allocation5 + $0x14] sm:$0xf] }
0x2673   :  { %v2676_v28 = vsub.f32 1.0, %v2612_v27 }
0x2674   :  { %v2328_v39 = vadd.f32 %v2326_v38, %v2316_v20 }
0x2675   :  { %v2684_v29 = vmul.f32 -1.0, %v2676_v28 }
0x2676   :  { %2330 = vrot.lane.b32.xlu0 %v2328_v39, %s3642_s1 }
0x26e8   :  { %v2331_v34 = vpop.permute.xlu0 %2330 }
0x26e9   :  { %2333 = vst.msk [vmem:[#allocation4] sm:$0xf] %vm270_vm0, %v2331_v34  ;;  %v2609_v34 = vld [vmem:[#allocation5 + $0x8] sm:$0xf] }
0x26f0   :  { %v2340_v41 = vld [vmem:[#allocation4] sm:$0xf] }
0x26f1   :  { %3244 = vmatmul.mubr.msk.f32.vlgmr.msra.gmra.mrb[14].mxu0 %vm150_vm2, %v2340_v41 }
0x27c4   :  { %v2410_v42 = vpop.f32.mrb[14].mxu0 }
0x27c5   :  { %v2421_v44 = vadd.f32 %v2410_v42, %v4005_v15  ;;  %v3245_v45 = vpop.f32.mrb[15].mxu0  ;;  %v2414_v47 = vadd.f32 %v2410_v42, %v2339_v21 }
0x27c7   :  { %2423 = vrot.lane.b32.xlu1 %v2421_v44, %s3634_s2  ;;  %v2941_v48 = vmul.f32 -1.442695, %v2414_v47  ;;  %v2673_v44 = vsub.f32 1.0, %v2609_v34 }
0x27c9   :  { %3500 = vpow2.f32 %v2941_v48 }
0x27cb   :  { %2454 = vperm.xlu1 %3406, %v2451_v12   ;;  %v2735_v12 = vld [vmem:[#allocation12] sm:$0xff] }
0x27d3   :  { %v3501_v50 = vpop.eup %3500 }
0x27d4   :  { %v2418_v52 = vadd.f32 1.0, %v3501_v50  ;;  %v2681_v50 = vmul.f32 -1.0, %v2673_v44 }
0x27d6   :  { %3502 = vrcp.f32 %v2418_v52 }
0x27e0   :  { %v3503_v53 = vpop.eup %3502 }
0x27e1   :  { %v2433_v63 = vsub.f32 1.0, %v3503_v53 }
0x2839   :  { %v2424_v54 = vpop.permute.xlu1 %2423 }
0x283a   :  { %v2426_v46 = vmul.f32 %v3503_v53, %v2424_v54 }
0x283c   :  { %2428 = vrot.lane.b32.xlu0 %v2426_v46, %s3634_s2 }
0x2840   :  { %2447 = vperm.xlu0 %3407, %v2444_v43  }
0x2844   :  { %2439 = vrot.lane.b32.xlu0 %v2340_v41, %s3643_s18 }
0x284a   :  { %v2455_v57 = vpop.permute.xlu1 %2454 }
0x284b   :  { %v2457_v58 = vmul.f32 %v2455_v57, %v2340_v41 }
0x28ae   :  { %v2429_v61 = vpop.permute.xlu0 %2428 }
0x28af   :  { %v2431_v56 = vadd.f32 %v2429_v61, %v2339_v21  ;;  %v2736_v21 = vld [vmem:[#allocation12 + $0x8] sm:$0xff]  ;;  %v2611_v61 = vld [vmem:[#allocation5 + $0x10] sm:$0xf] }
0x28b0   :  { %v3383_v48 = vpack.c.bf16 %v2736_v21, %v2735_v12 }
0x28b1   :  { %3504 = vtanh.f32 %v2431_v56  ;;  %v2675_v56 = vsub.f32 1.0, %v2611_v61 }
0x28b2   :  { %3384 = vmatprep.subr.bf16.mxu0 %v3383_v48 }
0x28b3   :  { %3386 = vmatpush3.bf16.msra.mxu0 %v3383_v48  ;;  %v2683_v57 = vmul.f32 -1.0, %v2675_v56 }
0x28bb   :  { %v3505_v4 = vpop.eup %3504 }
0x28bc   :  { %2435 = vrot.lane.b32.xlu1 %v3505_v4, %s3642_s1  ;;  %v2613_v4 = vld [vmem:[#allocation5 + $0x18] sm:$0xf] }
0x28bf   :  { %v2448_v59 = vpop.permute.xlu0 %2447 }
0x28c0   :  { %2459 = vrot.lane.b32.xlu1 %v2457_v58, %s3643_s18 }
0x28c3   :  { %v2440_v60 = vpop.permute.xlu0 %2439 }
0x28c4   :  { %v2442_v3 = vmul.f32 %v3503_v53, %v2440_v60  ;;  %v2738_v53 = vld [vmem:[#allocation12 + $0x18] sm:$0xff] }
0x292e   :  { %v2436_v2 = vpop.permute.xlu1 %2435 }
0x292f   :  { %v2438_v6 = vmul.f32 %v2436_v2, %v2433_v63 }
0x2931   :  { %v4146_v7 = vadd.f32 %v2442_v3, %v2438_v6 }
0x2932   :  { %v2460_v9 = vpop.permute.xlu1 %2459 }
0x2933   :  { %v2450_v8 = vmul.f32 %v2448_v59, %v4146_v7  ;;  %v2578_v59 = vld [vmem:[#allocation5 + $0x1c] sm:$0xf] }
0x2934   :  { %v2585_v60 = vsub.f32 1.0, %v2578_v59 }
0x2935   :  { %v2462_v10 = vadd.f32 %v2460_v9, %v2450_v8 }
0x2937   :  { %2464 = vrot.lane.b32.xlu0 %v2462_v10, %s3642_s1 }
0x29a9   :  { %v2465_v13 = vpop.permute.xlu0 %2464 }
0x29aa   :  { %2467 = vst.msk [vmem:[#allocation4] sm:$0xf] %vm270_vm0, %v2465_v13 }
0x29b1   :  { %v4151_v33 = vld [vmem:[#allocation4] sm:$0xf] }
0x29b2   :  { %3255 = vmatmul.mubr.msk.f32.vlgmr.msra.gmra.mrb[22].mxu1 %vm150_vm2, %v4151_v33 }
0x2a85   :  { %v2544_v40 = vpop.f32.mrb[22].mxu1 }
0x2a86   :  { %v2555_v14 = vadd.f32 %v2544_v40, %v4005_v15  ;;  %v3256_v16 = vpop.f32.mrb[23].mxu1  ;;  %v2548_v19 = vadd.f32 %v2544_v40, %v2473_v18  ;;  %v2608_v15 = vld [vmem:[#allocation5 + $0x4] sm:$0xf] }
0x2a87   :  { %v2672_v55 = vsub.f32 1.0, %v2608_v15 }
0x2a88   :  { %2557 = vrot.lane.b32.xlu1 %v2555_v14, %s3634_s2  ;;  %v2943_v22 = vmul.f32 -1.442695, %v2548_v19 }
0x2a89   :  { %v2680_v25 = vmul.f32 -1.0, %v2672_v55 }
0x2a8a   :  { %3506 = vpow2.f32 %v2943_v22 }
0x2a94   :  { %v3507_v49 = vpop.eup %3506 }
0x2a95   :  { %v2552_v23 = vadd.f32 1.0, %v3507_v49 }
0x2a97   :  { %3508 = vrcp.f32 %v2552_v23 }
0x2aa1   :  { %v4157_v1 = vpop.eup %3508 }
0x2aa2   :  { %v2567_v63 = vsub.f32 1.0, %v4157_v1 }
0x2afa   :  { %v2558_v0 = vpop.permute.xlu1 %2557 }
0x2afb   :  { %v2560_v11 = vmul.f32 %v4157_v1, %v2558_v0 }
0x2afd   :  { %2562 = vrot.lane.b32.xlu0 %v2560_v11, %s3634_s2 }
0x2b01   :  { %2573 = vrot.lane.b32.xlu0 %v4151_v33, %s3643_s18 }
0x2b05   :  { %1799 = vrot.lane.b32.xlu0 %v4064_v31, %s3642_s1  ;;  %v4169_v31 = vld [vmem:[#allocation5 + $0x1c] sm:$0xf] }
0x2b06   :  { %v2678_v3 = vsub.f32 1.0, %v4169_v31 }
0x2b08   :  { %v2686_v10 = vmul.f32 -1.0, %v2678_v3 }
0x2b09   :  { %2067 = vrot.lane.b32.xlu0 %v4100_v36, %s3642_s1 }
0x2b0d   :  { %2630 = vperm.xlu0 %3407, %v2608_v15  }
0x2b11   :  { %2640 = vperm.xlu0 %3407, %v2610_v24  }
0x2b15   :  { %2694 = vperm.xlu0 %3407, %v2680_v25  }
0x2b19   :  { %2335 = vrot.lane.b32.xlu0 %v4134_v37, %s3642_s1  ;;  %v2607_v37 = vld [vmem:[#allocation5] sm:$0xf] }
0x2b1a   :  { %v2671_v39 = vsub.f32 1.0, %v2607_v37 }
0x2b1c   :  { %v2679_v42 = vmul.f32 -1.0, %v2671_v39 }
0x2b1d   :  { %2704 = vperm.xlu0 %3407, %v2682_v17  }
0x2b21   :  { %2650 = vperm.xlu0 %3407, %v2612_v27  }
0x2b25   :  { %2660 = vperm.xlu0 %3407, %v4169_v31  }
0x2b29   :  { %2714 = vperm.xlu0 %3407, %v2684_v29  }
0x2b6f   :  { %v2563_v36 = vpop.permute.xlu0 %2562 }
0x2b70   :  { %v2565_v30 = vadd.f32 %v2563_v36, %v2473_v18 }
0x2b72   :  { %3510 = vtanh.f32 %v2565_v30 }
0x2b73   :  { %v2574_v32 = vpop.permute.xlu0 %2573 }
0x2b74   :  { %v2576_v6 = vmul.f32 %v4157_v1, %v2574_v32 }
0x2b77   :  { %v1800_v35 = vpop.permute.xlu0 %1799 }
0x2b78   :  { %1802 = vst.msk [vmem:[#allocation2 + $0x4] sm:$0xf] %vm270_vm0, %v1800_v35 }
0x2b7b   :  { %v2068_v20 = vpop.permute.xlu0 %2067 }
0x2b7c   :  { %v3511_v38 = vpop.eup %3510  ;;  %2070 = vst.msk [vmem:[#allocation2 + $0xc] sm:$0xf] %vm270_vm0, %v2068_v20 }
0x2b7d   :  { %2569 = vrot.lane.b32.xlu1 %v3511_v38, %s3642_s1 }
0x2b7f   :  { %v2616_v45 = vld [vmem:[#allocation2 + $0x4] sm:$0xf] }
0x2b81   :  { %1665 = vrot.lane.b32.xlu1 %v4034_v51, %s3642_s1 }
0x2b83   :  { %v2618_v0 = vld [vmem:[#allocation2 + $0xc] sm:$0xf] }
0x2b85   :  { %1933 = vrot.lane.b32.xlu1 %v4082_v62, %s3642_s1  ;;  %v2737_v62 = vld [vmem:[#allocation12 + $0x10] sm:$0xff] }
0x2b86   :  { %v3387_v54 = vpack.c.bf16 %v2738_v53, %v2737_v62 }
0x2b88   :  { %3388 = vmatprep.subr.bf16.mxu0 %v3387_v54 }
0x2b89   :  { %2625 = vperm.xlu1 %3406, %v2607_v37   ;;  %3390 = vmatpush3.bf16.msra.mxu0 %v3387_v54 }
0x2b8c   :  { %v2631_v41 = vpop.permute.xlu0 %2630 }
0x2b8d   :  { %2635 = vperm.xlu1 %3406, %v2609_v34   ;;  %v2664_v47 = vmul.f32 %v2631_v41, %v2616_v45 }
0x2b90   :  { %v4179_v43 = vpop.permute.xlu0 %2640 }
0x2b91   :  { %2689 = vperm.xlu1 %3406, %v2679_v42   ;;  %v2666_v15 = vmul.f32 %v4179_v43, %v2618_v0 }
0x2b94   :  { %v2695_v51 = vpop.permute.xlu0 %2694 }
0x2b95   :  { %v2728_v52 = vadd.f32 %v2695_v51, %v2664_v47  ;;  %2201 = vrot.lane.b32.xlu1 %v4117_v5, %s3642_s1  ;;  %v2677_v5 = vsub.f32 1.0, %v2613_v4 }
0x2b97   :  { %v2685_v58 = vmul.f32 -1.0, %v2677_v5 }
0x2b98   :  { %v2336_v46 = vpop.permute.xlu0 %2335 }
0x2b99   :  { %2338 = vst.msk [vmem:[#allocation2 + $0x14] sm:$0xf] %vm270_vm0, %v2336_v46  ;;  %2699 = vperm.xlu1 %3406, %v2681_v50  }
0x2b9c   :  { %v2705_v23 = vpop.permute.xlu0 %2704 }
0x2b9d   :  { %2469 = vrot.lane.b32.xlu1 %v4146_v7, %s3642_s1  ;;  %v2730_v25 = vadd.f32 %v2705_v23, %v2666_v15 }
0x2ba0   :  { %v2651_v17 = vpop.permute.xlu0 %2650  ;;  %v2620_v36 = vld [vmem:[#allocation2 + $0x14] sm:$0xf] }
0x2ba1   :  { %2645 = vperm.xlu1 %3406, %v2611_v61   ;;  %v2668_v20 = vmul.f32 %v2651_v17, %v2620_v36 }
0x2ba4   :  { %v2661_v31 = vpop.permute.xlu0 %2660 }
0x2ba5   :  { %2655 = vperm.xlu1 %3406, %v2613_v4  }
0x2ba8   :  { %v2715_v32 = vpop.permute.xlu0 %2714 }
0x2ba9   :  { %2709 = vperm.xlu1 %3406, %v2683_v57   ;;  %v2732_v34 = vadd.f32 %v2715_v32, %v2668_v20 }
0x2bad   :  { %2719 = vperm.xlu1 %3406, %v2685_v58  }
0x2bb1   :  { %2588 = vperm.xlu1 %3406, %v2585_v60  }
0x2bef   :  { %v2570_v2 = vpop.permute.xlu1 %2569 }
0x2bf0   :  { %v2572_v7 = vmul.f32 %v2570_v2, %v2567_v63 }
0x2bf2   :  { %v2577_v8 = vadd.f32 %v2576_v6, %v2572_v7 }
0x2bf3   :  { %v1666_v9 = vpop.permute.xlu1 %1665 }
0x2bf4   :  { %1668 = vst.msk [vmem:[#allocation2] sm:$0xf] %vm270_vm0, %v1666_v9  ;;  %2603 = vrot.lane.b32.xlu0 %v2577_v8, %s3642_s1 }
0x2bf7   :  { %v1934_v13 = vpop.permute.xlu1 %1933 }
0x2bf8   :  { %1936 = vst.msk [vmem:[#allocation2 + $0x8] sm:$0xf] %vm270_vm0, %v1934_v13  ;;  %2724 = vperm.xlu0 %3407, %v2686_v10  }
0x2bfb   :  { %v2615_v16 = vld [vmem:[#allocation2] sm:$0xf] }
0x2bfc   :  { %2581 = vperm.xlu0 %3407, %v2578_v59  }
0x2bff   :  { %v2617_v11 = vld [vmem:[#allocation2 + $0x8] sm:$0xf] }
0x2c08   :  { %v2626_v40 = vpop.permute.xlu1 %2625 }
0x2c09   :  { %v2663_v18 = vmul.f32 %v2626_v40, %v2615_v16 }
0x2c0c   :  { %v2636_v14 = vpop.permute.xlu1 %2635 }
0x2c0d   :  { %v2665_v55 = vmul.f32 %v2636_v14, %v2617_v11 }
0x2c10   :  { %v2690_v19 = vpop.permute.xlu1 %2689 }
0x2c11   :  { %v2727_v22 = vadd.f32 %v2690_v19, %v2663_v18 }
0x2c13   :  { %v2754_v49 = vcombine.low %v2727_v22, %v2728_v52 }
0x2c14   :  { %v2202_v1 = vpop.permute.xlu1 %2201 }
0x2c15   :  { %2204 = vst.msk [vmem:[#allocation2 + $0x10] sm:$0xf] %vm270_vm0, %v2202_v1  ;;  %3265 = vmatprep.mubr.msk.f32.mxu0 %vm150_vm2, %v2754_v49 }
0x2c18   :  { %v2700_v24 = vpop.permute.xlu1 %2699 }
0x2c19   :  { %v2729_v26 = vadd.f32 %v2700_v24, %v2665_v55 }
0x2c1b   :  { %v2755_v27 = vcombine.low %v2729_v26, %v2730_v25 }
0x2c1c   :  { %v2470_v28 = vpop.permute.xlu1 %2469  ;;  %v2619_v35 = vld [vmem:[#allocation2 + $0x10] sm:$0xf] }
0x2c1d   :  { %2472 = vst.msk [vmem:[#allocation2 + $0x18] sm:$0xf] %vm270_vm0, %v2470_v28  ;;  %3266 = vmatmul.mubr.msk.f32.vlgmr.msra.gmra.mrb[16].mxu0 %vm150_vm2, %v2755_v27 }
0x2c20   :  { %v2646_v29 = vpop.permute.xlu1 %2645 }
0x2c21   :  { %v2667_v38 = vmul.f32 %v2646_v29, %v2619_v35 }
0x2c24   :  { %v2656_v30 = vpop.permute.xlu1 %2655  ;;  %v2621_v37 = vld [vmem:[#allocation2 + $0x18] sm:$0xf] }
0x2c25   :  { %v2669_v42 = vmul.f32 %v2656_v30, %v2621_v37 }
0x2c28   :  { %v2710_v39 = vpop.permute.xlu1 %2709 }
0x2c29   :  { %v2731_v41 = vadd.f32 %v2710_v39, %v2667_v38 }
0x2c2b   :  { %v2756_v43 = vcombine.low %v2731_v41, %v2732_v34 }
0x2c2c   :  { %v2720_v44 = vpop.permute.xlu1 %2719 }
0x2c2d   :  { %v2733_v45 = vadd.f32 %v2720_v44, %v2669_v42  ;;  %3268 = vmatprep.mubr.msk.f32.mxu0 %vm150_vm2, %v2756_v43 }
0x2c30   :  { %v2589_v12 = vpop.permute.xlu1 %2588 }
0x2c31   :  { %v2591_v21 = vmul.f32 %v2589_v12, %v4151_v33  ;;  %v2944_v33 = vld [vmem:[%s4229_s7] ss:$0 sm:$0xff]  ;;  %s3600_s7 = scalar_lea.vmem %s2877_s20, 512 }
0x2c32   :  { %p3601_p4 = scmp.ne.s32.totalorder %s2877_s20, %s3600_s7  ;;  %p3606_p6 = scmp.lt.s32.totalorder %s3600_s7, %s3600_s7 }
0x2c33   :  { %2593 = vrot.lane.b32.xlu1 %v2591_v21, %s3643_s18 }
0x2c34   :  { %p3607_p7 = por %p3606_p6, %p3605_p5 }
0x2c36   :  { %p3608_p8 = pnand %p3607_p7, %p3601_p4 }
0x2c66   :  { %v2604_v47 = vpop.permute.xlu0 %2603 }
0x2c67   :  { %2606 = vst.msk [vmem:[#allocation2 + $0x1c] sm:$0xf] %vm270_vm0, %v2604_v47 }
0x2c6e   :  { %v2622_v48 = vld [vmem:[#allocation2 + $0x1c] sm:$0xf] }
0x2c6f   :  { %v2670_v51 = vmul.f32 %v2661_v31, %v2622_v48 }
0x2c77   :  { %v2725_v50 = vpop.permute.xlu0 %2724 }
0x2c78   :  { %v2734_v52 = vadd.f32 %v2725_v50, %v2670_v51 }
0x2c7a   :  { %v2757_v62 = vcombine.low %v2733_v45, %v2734_v52 }
0x2c7b   :  { %v2582_v53 = vpop.permute.xlu0 %2581 }
0x2c7c   :  { %3269 = vmatmul.mubr.msk.f32.gmra.mrb[18].mxu0 %vm150_vm2, %v2757_v62  ;;  %v2584_v54 = vmul.f32 %v2582_v53, %v2577_v8 }
0x2ca5   :  { %v2594_v46 = vpop.permute.xlu1 %2593 }
0x2ca6   :  { %v2596_v61 = vadd.f32 %v2594_v46, %v2584_v54 }
0x2ca8   :  { %2598 = vrot.lane.b32.xlu0 %v2596_v61, %s3642_s1 }
0x2cf0   :  { %v3267_v56 = vpop.f32.mrb[16].mxu0 }
0x2cf1   :  { %v2838_v4 = vadd.f32 %v3267_v56, %v2944_v33  ;;  %v2832_v57 = vpop.f32.mrb[17].mxu0 }
0x2cf2   :  { %v2833_v5 = vadd.f32 %v2944_v33, %v2832_v57 }
0x2cf3   :  { %v2856_v58 = vcombine.high %v2838_v4, %v2838_v4  ;;  %2865 = vst [vmem:[#allocation14 + $0x8] sm:$0xf] %v2838_v4 }
0x2cf4   :  { %v2855_v59 = vcombine.high %v2833_v5, %v2833_v5  ;;  %2863 = vst [vmem:[#allocation14] sm:$0xf] %v2833_v5 }
0x2cf5   :  { %2866 = vst [vmem:[#allocation14 + $0xc] sm:$0xf] %v2856_v58 }
0x2cf6   :  { %2864 = vst [vmem:[#allocation14 + $0x4] sm:$0xf] %v2855_v59 }
0x2d1a   :  { %v2599_v60 = vpop.permute.xlu0 %2598 }
0x2d1b   :  { %2601 = vst.msk [vmem:[#allocation4] sm:$0xf] %vm270_vm0, %v2599_v60 }
0x2d4f   :  { %v3270_v63 = vpop.f32.mrb[18].mxu0 }
0x2d50   :  { %v2848_v2 = vadd.f32 %v3270_v63, %v2944_v33  ;;  %v2842_v3 = vpop.f32.mrb[19].mxu0 }
0x2d51   :  { %v2843_v6 = vadd.f32 %v2944_v33, %v2842_v3 }
0x2d52   :  { %v2858_v7 = vcombine.high %v2848_v2, %v2848_v2  ;;  %2869 = vst [vmem:[#allocation14 + $0x18] sm:$0xf] %v2848_v2 }
0x2d53   :  { %v2857_v8 = vcombine.high %v2843_v6, %v2843_v6  ;;  %2867 = vst [vmem:[#allocation14 + $0x10] sm:$0xf] %v2843_v6 }
0x2d54   :  { %2870 = vst [vmem:[#allocation14 + $0x1c] sm:$0xf] %v2858_v7 }
0x2d55   :  { %2868 = vst [vmem:[#allocation14 + $0x14] sm:$0xf] %v2857_v8 }
0x2d56   :  { %3611 = shalt.err (!%p3608_p8)
}
0x2d57   :  { %s3612_s26 = scalar_lea.hbm %s4230_s8, 512 }
0x2d58   :  { %p3613_p9 = scmp.ne.s32.totalorder %s4230_s8, %s3612_s26  ;;  %p3616_p10 = scmp.lt.u32.totalorder %s3612_s26, %s4230_s8 }
0x2d5a   :  { %p3618_p11 = pnand %p3616_p10, %p3613_p9 }
0x2d5c   :  { %3621 = shalt.err (!%p3618_p11)
}
0x2d5d   :  { %2882 = dma.vmem_to_hbm [thread:$0]  %s2877_s20, 512, %s4230_s8, [#allocation8], %s3634_s2, %s3634_s2, %s3635_s28  }
0x2d5e   :  { %3628 = dma.done.wait [#allocation8], 512  }
0x2d5f   :  { %3629 = vsyncadd [#allocation8], 4294966784 }
0x2d60   :  { %2886 = vsyncpa [#allocation7], 1 }
0x2d61   :  { %2887 = vsyncpa [#allocation10], 1 }
0x2d62   :  { %2888 = vsyncpa [#allocation13], 1 }
0x2d63   :  { %2889 = vsyncpa [#allocation8], 1 }

</bundles_post_ra>
